<compile_context>
chip_gen: v6e
topology: v6e:2x2x1
jax: 0.10.0
libtpu: 0.0.40
codegen_flags: <defaults>
</compile_context>

<pallas_src>
import math
import functools

import jax
import jax.numpy as jnp
from jax.experimental import pallas as pl
from jax.experimental.pallas import tpu as pltpu

LARGE_NUMBER = 1e10
NEG_INF = -1e30


def _round_up(x, m):
    return ((x + m - 1) // m) * m


def _simple_kernel(theta_ref, unif_ref, marg_ref, samp_ref, brev_ref,
                   *, N, K, S, KP8):
    """theta_ref: (N, R) log-weights.  unif_ref: (S, N, R) uniforms in [0,1).
    marg_ref: (N, R) exact inclusion marginals.  samp_ref: (S, N, R) 0/1 masks.
    brev_ref: (N, KP8, R) VMEM scratch holding the sublane-packed backward ESP
    table Brev[i][u] = log e_{K-u}(w_{i+1..N})."""
    R = theta_ref.shape[-1]
    NEG = jnp.float32(NEG_INF)

    row_idx = jax.lax.broadcasted_iota(jnp.int32, (KP8, R), 0)     # sublane id
    iota_s = jax.lax.broadcasted_iota(jnp.int32, (S, KP8, R), 1)
    neg_row = jnp.full((1, R), NEG, jnp.float32)

    def shift_up(x):        # out[u] = x[u+1] for u < K, NEG for u >= K
        shifted = jnp.concatenate([x[1:], neg_row], axis=0)
        return jnp.where(row_idx >= K, NEG, shifted)

    def shift_down(x):      # out[0] = NEG, out[u] = x[u-1] for u >= 1
        return jnp.concatenate([neg_row, x[:-1]], axis=0)

    # ---- backward ESP DP (reversed index u = K - t), packed on sublanes ----
    brev = jnp.where(row_idx == K, jnp.float32(0.0), NEG)          # Brev[N]
    brev_ref[N - 1] = brev
    for i in range(N - 1, 0, -1):
        th = theta_ref[i:i + 1, :]                                 # item i+1
        brev = jnp.logaddexp(brev, th + shift_up(brev))            # Brev[i]
        brev_ref[i - 1] = brev
    # one more step -> Brev[0]; its u = 0 entry is log Z = log e_K(w_1..w_N)
    brev0 = jnp.logaddexp(brev, theta_ref[0:1, :] + shift_up(brev))
    log_z = brev0[0:1, :]                                          # (1, R)

    # ---- streaming forward pass: marginals + exact k-subset sampling -------
    f_state = jnp.where(row_idx == 0, jnp.float32(0.0), NEG)       # F[0]
    r = jnp.full((S, 1, R), K, dtype=jnp.int32)                    # picks left
    for i in range(1, N + 1):
        th = theta_ref[i - 1:i, :]                                 # (1, R)
        brev_i = brev_ref[i - 1]                                   # (KP8, R)
        fs = shift_down(f_state)                                   # F[i-1][u-1]

        # exact marginal: p_i = w_i * sum_t e_t(prefix) e_{K-1-t}(tail) / e_K
        marg_ref[i - 1:i, :] = jnp.sum(
            jnp.exp(fs + brev_i + th - log_z), axis=0, keepdims=True)

        # conditional-Poisson step (vectorized over S sample ensembles):
        #   P(pick i | r left) = w_i e_{r-1}(tail) / (e_r(tail) + w_i e_{r-1}(tail))
        idx = K - r                                                # reversed e_r index
        b_r = jnp.max(jnp.where(iota_s == idx, brev_i[None], NEG),
                      axis=1, keepdims=True)                       # (S, 1, R)
        b_rm1 = jnp.max(jnp.where(iota_s == idx + 1, brev_i[None], NEG),
                        axis=1, keepdims=True)
        log_num = th[None] + b_rm1
        p = jnp.exp(log_num - jnp.logaddexp(b_r, log_num))
        p = jnp.where(r > 0, p, jnp.float32(0.0))

        u = unif_ref[:, i - 1:i, :]                                # (S, 1, R)
        inc = (u < p).astype(jnp.float32)
        samp_ref[:, i - 1:i, :] = inc
        r = r - inc.astype(jnp.int32)

        # forward ESP update: F[i][t] = logaddexp(F[i-1][t], th + F[i-1][t-1])
        f_state = jnp.logaddexp(f_state, th + fs)


def logsigmoid(x):
    return -jax.nn.softplus(-x) + 1e-07


class EdgeSIMPLEBatched:
    """JAX/Pallas port of the torch EdgeSIMPLEBatched forward pass."""

    def __init__(self, k, val_ensemble=1, train_ensemble=1, logits_activation=None):
        assert val_ensemble > 0 and train_ensemble > 0
        self.k = k
        self.val_ensemble = val_ensemble
        self.train_ensemble = train_ensemble
        self.logits_activation = logits_activation

    def __call__(self, scores, key, train=True):
        times_sampled = self.train_ensemble if train else self.val_ensemble
        bsz, window, ensemble = scores.shape
        flat = scores.reshape(bsz * window, ensemble).astype(jnp.float32)
        target_size = ensemble
        local_k = min(self.k, ensemble)
        N = 2 ** math.ceil(math.log2(target_size))

        # pad fake items with huge negative logits (zero weight)
        flat = jnp.concatenate(
            [flat,
             jnp.full((flat.shape[0], N - ensemble), -LARGE_NUMBER, flat.dtype)],
            axis=1)

        if self.logits_activation in (None, 'None'):
            pass
        elif self.logits_activation == 'logsigmoid':
            flat = logsigmoid(flat)
        else:
            # TODO(synk): 'logsoftmax' path depends on self_defined_softmax (not provided)
            raise NotImplementedError

        R = flat.shape[0]
        # lane tile: big enough to amortize pipeline overhead, small enough for
        # v7x's 64 MiB VMEM (usage here is well under 1 MiB/tile).
        R_TILE = min(512, _round_up(R, 128))
        R_pad = _round_up(R, R_TILE)
        theta = jnp.zeros((N, R_pad), jnp.float32).at[:, :R].set(flat.T)

        S = times_sampled
        KP8 = _round_up(local_k + 1, 8)
        # uniforms generated once outside (portable; the TPU stateful PRNG has
        # no interpret-mode lowering).
        unif = jax.random.uniform(key, (S, N, R_pad), dtype=jnp.float32)

        marg, samp = pl.pallas_call(
            functools.partial(_simple_kernel, N=N, K=local_k, S=S, KP8=KP8),
            out_shape=(
                jax.ShapeDtypeStruct((N, R_pad), jnp.float32),
                jax.ShapeDtypeStruct((S, N, R_pad), jnp.float32),
            ),
            grid_spec=pltpu.PrefetchScalarGridSpec(
                num_scalar_prefetch=0,
                grid=(R_pad // R_TILE,),
                in_specs=[pl.BlockSpec((N, R_TILE), lambda j: (0, j)),
                          pl.BlockSpec((S, N, R_TILE), lambda j: (0, 0, j))],
                out_specs=[pl.BlockSpec((N, R_TILE), lambda j: (0, j)),
                           pl.BlockSpec((S, N, R_TILE), lambda j: (0, 0, j))],
                scratch_shapes=[pltpu.VMEM((N, KP8, R_TILE), jnp.float32)],
            ),
            compiler_params=pltpu.CompilerParams(
                dimension_semantics=("parallel",),
                vmem_limit_bytes=32 * 1024 * 1024),
        )(theta, unif)

        marginals = marg.T[:R, :target_size]                           # (R, E)
        samples = jnp.transpose(samp, (0, 2, 1))[:, :R, :target_size]  # (S, R, E)

        # (samples - marginals).detach() + marginals  -> forward value == samples
        new_mask = samples.reshape(times_sampled, bsz, window, ensemble)
        if times_sampled == 1:
            new_mask = new_mask[0]
        new_marginals = marginals.reshape(bsz, window, ensemble)
        return new_mask, new_marginals


if __name__ == "__main__":
    key = jax.random.PRNGKey(0)
    k_scores, k_samp = jax.random.split(key)

    bsz, window, ensemble, k = 2, 8, 12, 4   # N pads to 16 inside
    scores = jax.random.normal(k_scores, (bsz, window, ensemble), dtype=jnp.float32)

    module = EdgeSIMPLEBatched(k=k, val_ensemble=1, train_ensemble=1,
                               logits_activation=None)
    mask, marginals = module(scores, k_samp, train=True)
    mask, marginals = jax.block_until_ready((mask, marginals))

    assert mask.shape == (bsz, window, ensemble)
    assert marginals.shape == (bsz, window, ensemble)
    # every (b, w) row picks exactly k items; exact marginals sum to k
    assert bool(jnp.all(jnp.abs(mask.sum(-1) - k) < 1e-3))
    assert bool(jnp.all(jnp.abs(marginals.sum(-1) - k) < 1e-3))
    assert bool(jnp.all((mask == 0.0) | (mask == 1.0)))

    print("KERNEL_OK")
</pallas_src>

<mosaic_0001>
module attributes {stable_mosaic.version = 11 : i64} {
  func.func @_simple_kernel(%arg0: i32, %arg1: memref<16x128xf32, #tpu.memory_space<vmem>>, %arg2: memref<1x16x128xf32, #tpu.memory_space<vmem>>, %arg3: memref<16x128xf32, #tpu.memory_space<vmem>>, %arg4: memref<1x16x128xf32, #tpu.memory_space<vmem>>, %arg5: memref<16x8x128xf32, #tpu.memory_space<vmem>>) attributes {dimension_semantics = [#tpu.dimension_semantics<parallel>], iteration_bounds = array<i64: 1>, scalar_prefetch = 0 : i64, scratch_operands = 1 : i64, tpu.core_type = #tpu.core_type<tc>, window_params = [{transform_indices = @transform_0, window_bounds = array<i64: 16, 128>}, {transform_indices = @transform_1, window_bounds = array<i64: 1, 16, 128>}, {transform_indices = @transform_2, window_bounds = array<i64: 16, 128>}, {transform_indices = @transform_3, window_bounds = array<i64: 1, 16, 128>}]} {
    %0 = tpu.iota {dimensions = array<i32: 0>} : vector<8x128xi32>
    %1 = tpu.iota {dimensions = array<i32: 1>} : vector<1x8x128xi32>
    %cst = arith.constant -1.000000e+30 : f32
    %2 = vector.broadcast %cst : f32 to vector<1x128xf32>
    %c4_i32 = arith.constant 4 : i32
    %3 = vector.broadcast %c4_i32 : i32 to vector<8x128xi32>
    %4 = arith.cmpi eq, %0, %3 : vector<8x128xi32>
    %cst_0 = arith.constant 0.000000e+00 : f32
    %cst_1 = arith.constant -1.000000e+30 : f32
    %5 = vector.broadcast %cst_0 : f32 to vector<8x128xf32>
    %6 = vector.broadcast %cst_1 : f32 to vector<8x128xf32>
    %7 = arith.select %4, %5, %6 : vector<8x128xi1>, vector<8x128xf32>
    %c15 = arith.constant 15 : index
    %c0 = arith.constant 0 : index
    %c0_2 = arith.constant 0 : index
    %8 = vector.load %arg5[%c15, %c0, %c0_2] : memref<16x8x128xf32, #tpu.memory_space<vmem>>, vector<1x8x128xf32>
    %9 = vector.shape_cast %8 : vector<1x8x128xf32> to vector<8x128xf32>
    %10 = vector.shape_cast %7 : vector<8x128xf32> to vector<1x8x128xf32>
    tpu.vector_store %arg5[%c15, %c0, %c0_2], %10 {strides = array<i32>} : memref<16x8x128xf32, #tpu.memory_space<vmem>>, vector<1x8x128xf32>,
    %c15_3 = arith.constant 15 : index
    %c0_4 = arith.constant 0 : index
    %11 = vector.load %arg1[%c15_3, %c0_4] : memref<16x128xf32, #tpu.memory_space<vmem>>, vector<1x128xf32>
    %12 = vector.extract_strided_slice %7 {offsets = [1, 0], sizes = [7, 128], strides = [1, 1]} : vector<8x128xf32> to vector<7x128xf32>
    %13 = tpu.concatenate %12, %2 in 0 : vector<7x128xf32>, vector<1x128xf32> -> vector<8x128xf32>
    %c4_i32_5 = arith.constant 4 : i32
    %14 = vector.broadcast %c4_i32_5 : i32 to vector<8x128xi32>
    %15 = arith.cmpi sge, %0, %14 : vector<8x128xi32>
    %cst_6 = arith.constant -1.000000e+30 : f32
    %16 = vector.broadcast %cst_6 : f32 to vector<8x128xf32>
    %17 = arith.select %15, %16, %13 : vector<8x128xi1>, vector<8x128xf32>
    %18 = vector.broadcast %11 : vector<1x128xf32> to vector<8x128xf32>
    %19 = arith.addf %18, %17 : vector<8x128xf32>
    %20 = arith.maximumf %7, %19 : vector<8x128xf32>
    %21 = arith.subf %7, %19 : vector<8x128xf32>
    %22 = arith.cmpf one, %21, %21 : vector<8x128xf32>
    %23 = arith.addf %7, %19 : vector<8x128xf32>
    %24 = math.absf %21 : vector<8x128xf32>
    %cst_7 = arith.constant 0.000000e+00 : f32
    %25 = vector.broadcast %cst_7 : f32 to vector<8x128xf32>
    %26 = arith.subf %25, %24 : vector<8x128xf32>
    %27 = math.exp %26 : vector<8x128xf32>
    %28 = math.log1p %27 : vector<8x128xf32>
    %29 = arith.addf %20, %28 : vector<8x128xf32>
    %30 = arith.select %22, %23, %29 : vector<8x128xi1>, vector<8x128xf32>
    %c14 = arith.constant 14 : index
    %c0_8 = arith.constant 0 : index
    %c0_9 = arith.constant 0 : index
    %31 = vector.load %arg5[%c14, %c0_8, %c0_9] : memref<16x8x128xf32, #tpu.memory_space<vmem>>, vector<1x8x128xf32>
    %32 = vector.shape_cast %31 : vector<1x8x128xf32> to vector<8x128xf32>
    %33 = vector.shape_cast %30 : vector<8x128xf32> to vector<1x8x128xf32>
    tpu.vector_store %arg5[%c14, %c0_8, %c0_9], %33 {strides = array<i32>} : memref<16x8x128xf32, #tpu.memory_space<vmem>>, vector<1x8x128xf32>,
    %c14_10 = arith.constant 14 : index
    %c0_11 = arith.constant 0 : index
    %34 = vector.load %arg1[%c14_10, %c0_11] : memref<16x128xf32, #tpu.memory_space<vmem>>, vector<1x128xf32>
    %35 = vector.extract_strided_slice %30 {offsets = [1, 0], sizes = [7, 128], strides = [1, 1]} : vector<8x128xf32> to vector<7x128xf32>
    %36 = tpu.concatenate %35, %2 in 0 : vector<7x128xf32>, vector<1x128xf32> -> vector<8x128xf32>
    %c4_i32_12 = arith.constant 4 : i32
    %37 = vector.broadcast %c4_i32_12 : i32 to vector<8x128xi32>
    %38 = arith.cmpi sge, %0, %37 : vector<8x128xi32>
    %cst_13 = arith.constant -1.000000e+30 : f32
    %39 = vector.broadcast %cst_13 : f32 to vector<8x128xf32>
    %40 = arith.select %38, %39, %36 : vector<8x128xi1>, vector<8x128xf32>
    %41 = vector.broadcast %34 : vector<1x128xf32> to vector<8x128xf32>
    %42 = arith.addf %41, %40 : vector<8x128xf32>
    %43 = arith.maximumf %30, %42 : vector<8x128xf32>
    %44 = arith.subf %30, %42 : vector<8x128xf32>
    %45 = arith.cmpf one, %44, %44 : vector<8x128xf32>
    %46 = arith.addf %30, %42 : vector<8x128xf32>
    %47 = math.absf %44 : vector<8x128xf32>
    %cst_14 = arith.constant 0.000000e+00 : f32
    %48 = vector.broadcast %cst_14 : f32 to vector<8x128xf32>
    %49 = arith.subf %48, %47 : vector<8x128xf32>
    %50 = math.exp %49 : vector<8x128xf32>
    %51 = math.log1p %50 : vector<8x128xf32>
    %52 = arith.addf %43, %51 : vector<8x128xf32>
    %53 = arith.select %45, %46, %52 : vector<8x128xi1>, vector<8x128xf32>
    %c13 = arith.constant 13 : index
    %c0_15 = arith.constant 0 : index
    %c0_16 = arith.constant 0 : index
    %54 = vector.load %arg5[%c13, %c0_15, %c0_16] : memref<16x8x128xf32, #tpu.memory_space<vmem>>, vector<1x8x128xf32>
    %55 = vector.shape_cast %54 : vector<1x8x128xf32> to vector<8x128xf32>
    %56 = vector.shape_cast %53 : vector<8x128xf32> to vector<1x8x128xf32>
    tpu.vector_store %arg5[%c13, %c0_15, %c0_16], %56 {strides = array<i32>} : memref<16x8x128xf32, #tpu.memory_space<vmem>>, vector<1x8x128xf32>,
    %c13_17 = arith.constant 13 : index
    %c0_18 = arith.constant 0 : index
    %57 = vector.load %arg1[%c13_17, %c0_18] : memref<16x128xf32, #tpu.memory_space<vmem>>, vector<1x128xf32>
    %58 = vector.extract_strided_slice %53 {offsets = [1, 0], sizes = [7, 128], strides = [1, 1]} : vector<8x128xf32> to vector<7x128xf32>
    %59 = tpu.concatenate %58, %2 in 0 : vector<7x128xf32>, vector<1x128xf32> -> vector<8x128xf32>
    %c4_i32_19 = arith.constant 4 : i32
    %60 = vector.broadcast %c4_i32_19 : i32 to vector<8x128xi32>
    %61 = arith.cmpi sge, %0, %60 : vector<8x128xi32>
    %cst_20 = arith.constant -1.000000e+30 : f32
    %62 = vector.broadcast %cst_20 : f32 to vector<8x128xf32>
    %63 = arith.select %61, %62, %59 : vector<8x128xi1>, vector<8x128xf32>
    %64 = vector.broadcast %57 : vector<1x128xf32> to vector<8x128xf32>
    %65 = arith.addf %64, %63 : vector<8x128xf32>
    %66 = arith.maximumf %53, %65 : vector<8x128xf32>
    %67 = arith.subf %53, %65 : vector<8x128xf32>
    %68 = arith.cmpf one, %67, %67 : vector<8x128xf32>
    %69 = arith.addf %53, %65 : vector<8x128xf32>
    %70 = math.absf %67 : vector<8x128xf32>
    %cst_21 = arith.constant 0.000000e+00 : f32
    %71 = vector.broadcast %cst_21 : f32 to vector<8x128xf32>
    %72 = arith.subf %71, %70 : vector<8x128xf32>
    %73 = math.exp %72 : vector<8x128xf32>
    %74 = math.log1p %73 : vector<8x128xf32>
    %75 = arith.addf %66, %74 : vector<8x128xf32>
    %76 = arith.select %68, %69, %75 : vector<8x128xi1>, vector<8x128xf32>
    %c12 = arith.constant 12 : index
    %c0_22 = arith.constant 0 : index
    %c0_23 = arith.constant 0 : index
    %77 = vector.load %arg5[%c12, %c0_22, %c0_23] : memref<16x8x128xf32, #tpu.memory_space<vmem>>, vector<1x8x128xf32>
    %78 = vector.shape_cast %77 : vector<1x8x128xf32> to vector<8x128xf32>
    %79 = vector.shape_cast %76 : vector<8x128xf32> to vector<1x8x128xf32>
    tpu.vector_store %arg5[%c12, %c0_22, %c0_23], %79 {strides = array<i32>} : memref<16x8x128xf32, #tpu.memory_space<vmem>>, vector<1x8x128xf32>,
    %c12_24 = arith.constant 12 : index
    %c0_25 = arith.constant 0 : index
    %80 = vector.load %arg1[%c12_24, %c0_25] : memref<16x128xf32, #tpu.memory_space<vmem>>, vector<1x128xf32>
    %81 = vector.extract_strided_slice %76 {offsets = [1, 0], sizes = [7, 128], strides = [1, 1]} : vector<8x128xf32> to vector<7x128xf32>
    %82 = tpu.concatenate %81, %2 in 0 : vector<7x128xf32>, vector<1x128xf32> -> vector<8x128xf32>
    %c4_i32_26 = arith.constant 4 : i32
    %83 = vector.broadcast %c4_i32_26 : i32 to vector<8x128xi32>
    %84 = arith.cmpi sge, %0, %83 : vector<8x128xi32>
    %cst_27 = arith.constant -1.000000e+30 : f32
    %85 = vector.broadcast %cst_27 : f32 to vector<8x128xf32>
    %86 = arith.select %84, %85, %82 : vector<8x128xi1>, vector<8x128xf32>
    %87 = vector.broadcast %80 : vector<1x128xf32> to vector<8x128xf32>
    %88 = arith.addf %87, %86 : vector<8x128xf32>
    %89 = arith.maximumf %76, %88 : vector<8x128xf32>
    %90 = arith.subf %76, %88 : vector<8x128xf32>
    %91 = arith.cmpf one, %90, %90 : vector<8x128xf32>
    %92 = arith.addf %76, %88 : vector<8x128xf32>
    %93 = math.absf %90 : vector<8x128xf32>
    %cst_28 = arith.constant 0.000000e+00 : f32
    %94 = vector.broadcast %cst_28 : f32 to vector<8x128xf32>
    %95 = arith.subf %94, %93 : vector<8x128xf32>
    %96 = math.exp %95 : vector<8x128xf32>
    %97 = math.log1p %96 : vector<8x128xf32>
    %98 = arith.addf %89, %97 : vector<8x128xf32>
    %99 = arith.select %91, %92, %98 : vector<8x128xi1>, vector<8x128xf32>
    %c11 = arith.constant 11 : index
    %c0_29 = arith.constant 0 : index
    %c0_30 = arith.constant 0 : index
    %100 = vector.load %arg5[%c11, %c0_29, %c0_30] : memref<16x8x128xf32, #tpu.memory_space<vmem>>, vector<1x8x128xf32>
    %101 = vector.shape_cast %100 : vector<1x8x128xf32> to vector<8x128xf32>
    %102 = vector.shape_cast %99 : vector<8x128xf32> to vector<1x8x128xf32>
    tpu.vector_store %arg5[%c11, %c0_29, %c0_30], %102 {strides = array<i32>} : memref<16x8x128xf32, #tpu.memory_space<vmem>>, vector<1x8x128xf32>,
    %c11_31 = arith.constant 11 : index
    %c0_32 = arith.constant 0 : index
    %103 = vector.load %arg1[%c11_31, %c0_32] : memref<16x128xf32, #tpu.memory_space<vmem>>, vector<1x128xf32>
    %104 = vector.extract_strided_slice %99 {offsets = [1, 0], sizes = [7, 128], strides = [1, 1]} : vector<8x128xf32> to vector<7x128xf32>
    %105 = tpu.concatenate %104, %2 in 0 : vector<7x128xf32>, vector<1x128xf32> -> vector<8x128xf32>
    %c4_i32_33 = arith.constant 4 : i32
    %106 = vector.broadcast %c4_i32_33 : i32 to vector<8x128xi32>
    %107 = arith.cmpi sge, %0, %106 : vector<8x128xi32>
    %cst_34 = arith.constant -1.000000e+30 : f32
    %108 = vector.broadcast %cst_34 : f32 to vector<8x128xf32>
    %109 = arith.select %107, %108, %105 : vector<8x128xi1>, vector<8x128xf32>
    %110 = vector.broadcast %103 : vector<1x128xf32> to vector<8x128xf32>
    %111 = arith.addf %110, %109 : vector<8x128xf32>
    %112 = arith.maximumf %99, %111 : vector<8x128xf32>
    %113 = arith.subf %99, %111 : vector<8x128xf32>
    %114 = arith.cmpf one, %113, %113 : vector<8x128xf32>
    %115 = arith.addf %99, %111 : vector<8x128xf32>
    %116 = math.absf %113 : vector<8x128xf32>
    %cst_35 = arith.constant 0.000000e+00 : f32
    %117 = vector.broadcast %cst_35 : f32 to vector<8x128xf32>
    %118 = arith.subf %117, %116 : vector<8x128xf32>
    %119 = math.exp %118 : vector<8x128xf32>
    %120 = math.log1p %119 : vector<8x128xf32>
    %121 = arith.addf %112, %120 : vector<8x128xf32>
    %122 = arith.select %114, %115, %121 : vector<8x128xi1>, vector<8x128xf32>
    %c10 = arith.constant 10 : index
    %c0_36 = arith.constant 0 : index
    %c0_37 = arith.constant 0 : index
    %123 = vector.load %arg5[%c10, %c0_36, %c0_37] : memref<16x8x128xf32, #tpu.memory_space<vmem>>, vector<1x8x128xf32>
    %124 = vector.shape_cast %123 : vector<1x8x128xf32> to vector<8x128xf32>
    %125 = vector.shape_cast %122 : vector<8x128xf32> to vector<1x8x128xf32>
    tpu.vector_store %arg5[%c10, %c0_36, %c0_37], %125 {strides = array<i32>} : memref<16x8x128xf32, #tpu.memory_space<vmem>>, vector<1x8x128xf32>,
    %c10_38 = arith.constant 10 : index
    %c0_39 = arith.constant 0 : index
    %126 = vector.load %arg1[%c10_38, %c0_39] : memref<16x128xf32, #tpu.memory_space<vmem>>, vector<1x128xf32>
    %127 = vector.extract_strided_slice %122 {offsets = [1, 0], sizes = [7, 128], strides = [1, 1]} : vector<8x128xf32> to vector<7x128xf32>
    %128 = tpu.concatenate %127, %2 in 0 : vector<7x128xf32>, vector<1x128xf32> -> vector<8x128xf32>
    %c4_i32_40 = arith.constant 4 : i32
    %129 = vector.broadcast %c4_i32_40 : i32 to vector<8x128xi32>
    %130 = arith.cmpi sge, %0, %129 : vector<8x128xi32>
    %cst_41 = arith.constant -1.000000e+30 : f32
    %131 = vector.broadcast %cst_41 : f32 to vector<8x128xf32>
    %132 = arith.select %130, %131, %128 : vector<8x128xi1>, vector<8x128xf32>
    %133 = vector.broadcast %126 : vector<1x128xf32> to vector<8x128xf32>
    %134 = arith.addf %133, %132 : vector<8x128xf32>
    %135 = arith.maximumf %122, %134 : vector<8x128xf32>
    %136 = arith.subf %122, %134 : vector<8x128xf32>
    %137 = arith.cmpf one, %136, %136 : vector<8x128xf32>
    %138 = arith.addf %122, %134 : vector<8x128xf32>
    %139 = math.absf %136 : vector<8x128xf32>
    %cst_42 = arith.constant 0.000000e+00 : f32
    %140 = vector.broadcast %cst_42 : f32 to vector<8x128xf32>
    %141 = arith.subf %140, %139 : vector<8x128xf32>
    %142 = math.exp %141 : vector<8x128xf32>
    %143 = math.log1p %142 : vector<8x128xf32>
    %144 = arith.addf %135, %143 : vector<8x128xf32>
    %145 = arith.select %137, %138, %144 : vector<8x128xi1>, vector<8x128xf32>
    %c9 = arith.constant 9 : index
    %c0_43 = arith.constant 0 : index
    %c0_44 = arith.constant 0 : index
    %146 = vector.load %arg5[%c9, %c0_43, %c0_44] : memref<16x8x128xf32, #tpu.memory_space<vmem>>, vector<1x8x128xf32>
    %147 = vector.shape_cast %146 : vector<1x8x128xf32> to vector<8x128xf32>
    %148 = vector.shape_cast %145 : vector<8x128xf32> to vector<1x8x128xf32>
    tpu.vector_store %arg5[%c9, %c0_43, %c0_44], %148 {strides = array<i32>} : memref<16x8x128xf32, #tpu.memory_space<vmem>>, vector<1x8x128xf32>,
    %c9_45 = arith.constant 9 : index
    %c0_46 = arith.constant 0 : index
    %149 = vector.load %arg1[%c9_45, %c0_46] : memref<16x128xf32, #tpu.memory_space<vmem>>, vector<1x128xf32>
    %150 = vector.extract_strided_slice %145 {offsets = [1, 0], sizes = [7, 128], strides = [1, 1]} : vector<8x128xf32> to vector<7x128xf32>
    %151 = tpu.concatenate %150, %2 in 0 : vector<7x128xf32>, vector<1x128xf32> -> vector<8x128xf32>
    %c4_i32_47 = arith.constant 4 : i32
    %152 = vector.broadcast %c4_i32_47 : i32 to vector<8x128xi32>
    %153 = arith.cmpi sge, %0, %152 : vector<8x128xi32>
    %cst_48 = arith.constant -1.000000e+30 : f32
    %154 = vector.broadcast %cst_48 : f32 to vector<8x128xf32>
    %155 = arith.select %153, %154, %151 : vector<8x128xi1>, vector<8x128xf32>
    %156 = vector.broadcast %149 : vector<1x128xf32> to vector<8x128xf32>
    %157 = arith.addf %156, %155 : vector<8x128xf32>
    %158 = arith.maximumf %145, %157 : vector<8x128xf32>
    %159 = arith.subf %145, %157 : vector<8x128xf32>
    %160 = arith.cmpf one, %159, %159 : vector<8x128xf32>
    %161 = arith.addf %145, %157 : vector<8x128xf32>
    %162 = math.absf %159 : vector<8x128xf32>
    %cst_49 = arith.constant 0.000000e+00 : f32
    %163 = vector.broadcast %cst_49 : f32 to vector<8x128xf32>
    %164 = arith.subf %163, %162 : vector<8x128xf32>
    %165 = math.exp %164 : vector<8x128xf32>
    %166 = math.log1p %165 : vector<8x128xf32>
    %167 = arith.addf %158, %166 : vector<8x128xf32>
    %168 = arith.select %160, %161, %167 : vector<8x128xi1>, vector<8x128xf32>
    %c8 = arith.constant 8 : index
    %c0_50 = arith.constant 0 : index
    %c0_51 = arith.constant 0 : index
    %169 = vector.load %arg5[%c8, %c0_50, %c0_51] : memref<16x8x128xf32, #tpu.memory_space<vmem>>, vector<1x8x128xf32>
    %170 = vector.shape_cast %169 : vector<1x8x128xf32> to vector<8x128xf32>
    %171 = vector.shape_cast %168 : vector<8x128xf32> to vector<1x8x128xf32>
    tpu.vector_store %arg5[%c8, %c0_50, %c0_51], %171 {strides = array<i32>} : memref<16x8x128xf32, #tpu.memory_space<vmem>>, vector<1x8x128xf32>,
    %c8_52 = arith.constant 8 : index
    %c0_53 = arith.constant 0 : index
    %172 = vector.load %arg1[%c8_52, %c0_53] : memref<16x128xf32, #tpu.memory_space<vmem>>, vector<1x128xf32>
    %173 = vector.extract_strided_slice %168 {offsets = [1, 0], sizes = [7, 128], strides = [1, 1]} : vector<8x128xf32> to vector<7x128xf32>
    %174 = tpu.concatenate %173, %2 in 0 : vector<7x128xf32>, vector<1x128xf32> -> vector<8x128xf32>
    %c4_i32_54 = arith.constant 4 : i32
    %175 = vector.broadcast %c4_i32_54 : i32 to vector<8x128xi32>
    %176 = arith.cmpi sge, %0, %175 : vector<8x128xi32>
    %cst_55 = arith.constant -1.000000e+30 : f32
    %177 = vector.broadcast %cst_55 : f32 to vector<8x128xf32>
    %178 = arith.select %176, %177, %174 : vector<8x128xi1>, vector<8x128xf32>
    %179 = vector.broadcast %172 : vector<1x128xf32> to vector<8x128xf32>
    %180 = arith.addf %179, %178 : vector<8x128xf32>
    %181 = arith.maximumf %168, %180 : vector<8x128xf32>
    %182 = arith.subf %168, %180 : vector<8x128xf32>
    %183 = arith.cmpf one, %182, %182 : vector<8x128xf32>
    %184 = arith.addf %168, %180 : vector<8x128xf32>
    %185 = math.absf %182 : vector<8x128xf32>
    %cst_56 = arith.constant 0.000000e+00 : f32
    %186 = vector.broadcast %cst_56 : f32 to vector<8x128xf32>
    %187 = arith.subf %186, %185 : vector<8x128xf32>
    %188 = math.exp %187 : vector<8x128xf32>
    %189 = math.log1p %188 : vector<8x128xf32>
    %190 = arith.addf %181, %189 : vector<8x128xf32>
    %191 = arith.select %183, %184, %190 : vector<8x128xi1>, vector<8x128xf32>
    %c7 = arith.constant 7 : index
    %c0_57 = arith.constant 0 : index
    %c0_58 = arith.constant 0 : index
    %192 = vector.load %arg5[%c7, %c0_57, %c0_58] : memref<16x8x128xf32, #tpu.memory_space<vmem>>, vector<1x8x128xf32>
    %193 = vector.shape_cast %192 : vector<1x8x128xf32> to vector<8x128xf32>
    %194 = vector.shape_cast %191 : vector<8x128xf32> to vector<1x8x128xf32>
    tpu.vector_store %arg5[%c7, %c0_57, %c0_58], %194 {strides = array<i32>} : memref<16x8x128xf32, #tpu.memory_space<vmem>>, vector<1x8x128xf32>,
    %c7_59 = arith.constant 7 : index
    %c0_60 = arith.constant 0 : index
    %195 = vector.load %arg1[%c7_59, %c0_60] : memref<16x128xf32, #tpu.memory_space<vmem>>, vector<1x128xf32>
    %196 = vector.extract_strided_slice %191 {offsets = [1, 0], sizes = [7, 128], strides = [1, 1]} : vector<8x128xf32> to vector<7x128xf32>
    %197 = tpu.concatenate %196, %2 in 0 : vector<7x128xf32>, vector<1x128xf32> -> vector<8x128xf32>
    %c4_i32_61 = arith.constant 4 : i32
    %198 = vector.broadcast %c4_i32_61 : i32 to vector<8x128xi32>
    %199 = arith.cmpi sge, %0, %198 : vector<8x128xi32>
    %cst_62 = arith.constant -1.000000e+30 : f32
    %200 = vector.broadcast %cst_62 : f32 to vector<8x128xf32>
    %201 = arith.select %199, %200, %197 : vector<8x128xi1>, vector<8x128xf32>
    %202 = vector.broadcast %195 : vector<1x128xf32> to vector<8x128xf32>
    %203 = arith.addf %202, %201 : vector<8x128xf32>
    %204 = arith.maximumf %191, %203 : vector<8x128xf32>
    %205 = arith.subf %191, %203 : vector<8x128xf32>
    %206 = arith.cmpf one, %205, %205 : vector<8x128xf32>
    %207 = arith.addf %191, %203 : vector<8x128xf32>
    %208 = math.absf %205 : vector<8x128xf32>
    %cst_63 = arith.constant 0.000000e+00 : f32
    %209 = vector.broadcast %cst_63 : f32 to vector<8x128xf32>
    %210 = arith.subf %209, %208 : vector<8x128xf32>
    %211 = math.exp %210 : vector<8x128xf32>
    %212 = math.log1p %211 : vector<8x128xf32>
    %213 = arith.addf %204, %212 : vector<8x128xf32>
    %214 = arith.select %206, %207, %213 : vector<8x128xi1>, vector<8x128xf32>
    %c6 = arith.constant 6 : index
    %c0_64 = arith.constant 0 : index
    %c0_65 = arith.constant 0 : index
    %215 = vector.load %arg5[%c6, %c0_64, %c0_65] : memref<16x8x128xf32, #tpu.memory_space<vmem>>, vector<1x8x128xf32>
    %216 = vector.shape_cast %215 : vector<1x8x128xf32> to vector<8x128xf32>
    %217 = vector.shape_cast %214 : vector<8x128xf32> to vector<1x8x128xf32>
    tpu.vector_store %arg5[%c6, %c0_64, %c0_65], %217 {strides = array<i32>} : memref<16x8x128xf32, #tpu.memory_space<vmem>>, vector<1x8x128xf32>,
    %c6_66 = arith.constant 6 : index
    %c0_67 = arith.constant 0 : index
    %218 = vector.load %arg1[%c6_66, %c0_67] : memref<16x128xf32, #tpu.memory_space<vmem>>, vector<1x128xf32>
    %219 = vector.extract_strided_slice %214 {offsets = [1, 0], sizes = [7, 128], strides = [1, 1]} : vector<8x128xf32> to vector<7x128xf32>
    %220 = tpu.concatenate %219, %2 in 0 : vector<7x128xf32>, vector<1x128xf32> -> vector<8x128xf32>
    %c4_i32_68 = arith.constant 4 : i32
    %221 = vector.broadcast %c4_i32_68 : i32 to vector<8x128xi32>
    %222 = arith.cmpi sge, %0, %221 : vector<8x128xi32>
    %cst_69 = arith.constant -1.000000e+30 : f32
    %223 = vector.broadcast %cst_69 : f32 to vector<8x128xf32>
    %224 = arith.select %222, %223, %220 : vector<8x128xi1>, vector<8x128xf32>
    %225 = vector.broadcast %218 : vector<1x128xf32> to vector<8x128xf32>
    %226 = arith.addf %225, %224 : vector<8x128xf32>
    %227 = arith.maximumf %214, %226 : vector<8x128xf32>
    %228 = arith.subf %214, %226 : vector<8x128xf32>
    %229 = arith.cmpf one, %228, %228 : vector<8x128xf32>
    %230 = arith.addf %214, %226 : vector<8x128xf32>
    %231 = math.absf %228 : vector<8x128xf32>
    %cst_70 = arith.constant 0.000000e+00 : f32
    %232 = vector.broadcast %cst_70 : f32 to vector<8x128xf32>
    %233 = arith.subf %232, %231 : vector<8x128xf32>
    %234 = math.exp %233 : vector<8x128xf32>
    %235 = math.log1p %234 : vector<8x128xf32>
    %236 = arith.addf %227, %235 : vector<8x128xf32>
    %237 = arith.select %229, %230, %236 : vector<8x128xi1>, vector<8x128xf32>
    %c5 = arith.constant 5 : index
    %c0_71 = arith.constant 0 : index
    %c0_72 = arith.constant 0 : index
    %238 = vector.load %arg5[%c5, %c0_71, %c0_72] : memref<16x8x128xf32, #tpu.memory_space<vmem>>, vector<1x8x128xf32>
    %239 = vector.shape_cast %238 : vector<1x8x128xf32> to vector<8x128xf32>
    %240 = vector.shape_cast %237 : vector<8x128xf32> to vector<1x8x128xf32>
    tpu.vector_store %arg5[%c5, %c0_71, %c0_72], %240 {strides = array<i32>} : memref<16x8x128xf32, #tpu.memory_space<vmem>>, vector<1x8x128xf32>,
    %c5_73 = arith.constant 5 : index
    %c0_74 = arith.constant 0 : index
    %241 = vector.load %arg1[%c5_73, %c0_74] : memref<16x128xf32, #tpu.memory_space<vmem>>, vector<1x128xf32>
    %242 = vector.extract_strided_slice %237 {offsets = [1, 0], sizes = [7, 128], strides = [1, 1]} : vector<8x128xf32> to vector<7x128xf32>
    %243 = tpu.concatenate %242, %2 in 0 : vector<7x128xf32>, vector<1x128xf32> -> vector<8x128xf32>
    %c4_i32_75 = arith.constant 4 : i32
    %244 = vector.broadcast %c4_i32_75 : i32 to vector<8x128xi32>
    %245 = arith.cmpi sge, %0, %244 : vector<8x128xi32>
    %cst_76 = arith.constant -1.000000e+30 : f32
    %246 = vector.broadcast %cst_76 : f32 to vector<8x128xf32>
    %247 = arith.select %245, %246, %243 : vector<8x128xi1>, vector<8x128xf32>
    %248 = vector.broadcast %241 : vector<1x128xf32> to vector<8x128xf32>
    %249 = arith.addf %248, %247 : vector<8x128xf32>
    %250 = arith.maximumf %237, %249 : vector<8x128xf32>
    %251 = arith.subf %237, %249 : vector<8x128xf32>
    %252 = arith.cmpf one, %251, %251 : vector<8x128xf32>
    %253 = arith.addf %237, %249 : vector<8x128xf32>
    %254 = math.absf %251 : vector<8x128xf32>
    %cst_77 = arith.constant 0.000000e+00 : f32
    %255 = vector.broadcast %cst_77 : f32 to vector<8x128xf32>
    %256 = arith.subf %255, %254 : vector<8x128xf32>
    %257 = math.exp %256 : vector<8x128xf32>
    %258 = math.log1p %257 : vector<8x128xf32>
    %259 = arith.addf %250, %258 : vector<8x128xf32>
    %260 = arith.select %252, %253, %259 : vector<8x128xi1>, vector<8x128xf32>
    %c4 = arith.constant 4 : index
    %c0_78 = arith.constant 0 : index
    %c0_79 = arith.constant 0 : index
    %261 = vector.load %arg5[%c4, %c0_78, %c0_79] : memref<16x8x128xf32, #tpu.memory_space<vmem>>, vector<1x8x128xf32>
    %262 = vector.shape_cast %261 : vector<1x8x128xf32> to vector<8x128xf32>
    %263 = vector.shape_cast %260 : vector<8x128xf32> to vector<1x8x128xf32>
    tpu.vector_store %arg5[%c4, %c0_78, %c0_79], %263 {strides = array<i32>} : memref<16x8x128xf32, #tpu.memory_space<vmem>>, vector<1x8x128xf32>,
    %c4_80 = arith.constant 4 : index
    %c0_81 = arith.constant 0 : index
    %264 = vector.load %arg1[%c4_80, %c0_81] : memref<16x128xf32, #tpu.memory_space<vmem>>, vector<1x128xf32>
    %265 = vector.extract_strided_slice %260 {offsets = [1, 0], sizes = [7, 128], strides = [1, 1]} : vector<8x128xf32> to vector<7x128xf32>
    %266 = tpu.concatenate %265, %2 in 0 : vector<7x128xf32>, vector<1x128xf32> -> vector<8x128xf32>
    %c4_i32_82 = arith.constant 4 : i32
    %267 = vector.broadcast %c4_i32_82 : i32 to vector<8x128xi32>
    %268 = arith.cmpi sge, %0, %267 : vector<8x128xi32>
    %cst_83 = arith.constant -1.000000e+30 : f32
    %269 = vector.broadcast %cst_83 : f32 to vector<8x128xf32>
    %270 = arith.select %268, %269, %266 : vector<8x128xi1>, vector<8x128xf32>
    %271 = vector.broadcast %264 : vector<1x128xf32> to vector<8x128xf32>
    %272 = arith.addf %271, %270 : vector<8x128xf32>
    %273 = arith.maximumf %260, %272 : vector<8x128xf32>
    %274 = arith.subf %260, %272 : vector<8x128xf32>
    %275 = arith.cmpf one, %274, %274 : vector<8x128xf32>
    %276 = arith.addf %260, %272 : vector<8x128xf32>
    %277 = math.absf %274 : vector<8x128xf32>
    %cst_84 = arith.constant 0.000000e+00 : f32
    %278 = vector.broadcast %cst_84 : f32 to vector<8x128xf32>
    %279 = arith.subf %278, %277 : vector<8x128xf32>
    %280 = math.exp %279 : vector<8x128xf32>
    %281 = math.log1p %280 : vector<8x128xf32>
    %282 = arith.addf %273, %281 : vector<8x128xf32>
    %283 = arith.select %275, %276, %282 : vector<8x128xi1>, vector<8x128xf32>
    %c3 = arith.constant 3 : index
    %c0_85 = arith.constant 0 : index
    %c0_86 = arith.constant 0 : index
    %284 = vector.load %arg5[%c3, %c0_85, %c0_86] : memref<16x8x128xf32, #tpu.memory_space<vmem>>, vector<1x8x128xf32>
    %285 = vector.shape_cast %284 : vector<1x8x128xf32> to vector<8x128xf32>
    %286 = vector.shape_cast %283 : vector<8x128xf32> to vector<1x8x128xf32>
    tpu.vector_store %arg5[%c3, %c0_85, %c0_86], %286 {strides = array<i32>} : memref<16x8x128xf32, #tpu.memory_space<vmem>>, vector<1x8x128xf32>,
    %c3_87 = arith.constant 3 : index
    %c0_88 = arith.constant 0 : index
    %287 = vector.load %arg1[%c3_87, %c0_88] : memref<16x128xf32, #tpu.memory_space<vmem>>, vector<1x128xf32>
    %288 = vector.extract_strided_slice %283 {offsets = [1, 0], sizes = [7, 128], strides = [1, 1]} : vector<8x128xf32> to vector<7x128xf32>
    %289 = tpu.concatenate %288, %2 in 0 : vector<7x128xf32>, vector<1x128xf32> -> vector<8x128xf32>
    %c4_i32_89 = arith.constant 4 : i32
    %290 = vector.broadcast %c4_i32_89 : i32 to vector<8x128xi32>
    %291 = arith.cmpi sge, %0, %290 : vector<8x128xi32>
    %cst_90 = arith.constant -1.000000e+30 : f32
    %292 = vector.broadcast %cst_90 : f32 to vector<8x128xf32>
    %293 = arith.select %291, %292, %289 : vector<8x128xi1>, vector<8x128xf32>
    %294 = vector.broadcast %287 : vector<1x128xf32> to vector<8x128xf32>
    %295 = arith.addf %294, %293 : vector<8x128xf32>
    %296 = arith.maximumf %283, %295 : vector<8x128xf32>
    %297 = arith.subf %283, %295 : vector<8x128xf32>
    %298 = arith.cmpf one, %297, %297 : vector<8x128xf32>
    %299 = arith.addf %283, %295 : vector<8x128xf32>
    %300 = math.absf %297 : vector<8x128xf32>
    %cst_91 = arith.constant 0.000000e+00 : f32
    %301 = vector.broadcast %cst_91 : f32 to vector<8x128xf32>
    %302 = arith.subf %301, %300 : vector<8x128xf32>
    %303 = math.exp %302 : vector<8x128xf32>
    %304 = math.log1p %303 : vector<8x128xf32>
    %305 = arith.addf %296, %304 : vector<8x128xf32>
    %306 = arith.select %298, %299, %305 : vector<8x128xi1>, vector<8x128xf32>
    %c2 = arith.constant 2 : index
    %c0_92 = arith.constant 0 : index
    %c0_93 = arith.constant 0 : index
    %307 = vector.load %arg5[%c2, %c0_92, %c0_93] : memref<16x8x128xf32, #tpu.memory_space<vmem>>, vector<1x8x128xf32>
    %308 = vector.shape_cast %307 : vector<1x8x128xf32> to vector<8x128xf32>
    %309 = vector.shape_cast %306 : vector<8x128xf32> to vector<1x8x128xf32>
    tpu.vector_store %arg5[%c2, %c0_92, %c0_93], %309 {strides = array<i32>} : memref<16x8x128xf32, #tpu.memory_space<vmem>>, vector<1x8x128xf32>,
    %c2_94 = arith.constant 2 : index
    %c0_95 = arith.constant 0 : index
    %310 = vector.load %arg1[%c2_94, %c0_95] : memref<16x128xf32, #tpu.memory_space<vmem>>, vector<1x128xf32>
    %311 = vector.extract_strided_slice %306 {offsets = [1, 0], sizes = [7, 128], strides = [1, 1]} : vector<8x128xf32> to vector<7x128xf32>
    %312 = tpu.concatenate %311, %2 in 0 : vector<7x128xf32>, vector<1x128xf32> -> vector<8x128xf32>
    %c4_i32_96 = arith.constant 4 : i32
    %313 = vector.broadcast %c4_i32_96 : i32 to vector<8x128xi32>
    %314 = arith.cmpi sge, %0, %313 : vector<8x128xi32>
    %cst_97 = arith.constant -1.000000e+30 : f32
    %315 = vector.broadcast %cst_97 : f32 to vector<8x128xf32>
    %316 = arith.select %314, %315, %312 : vector<8x128xi1>, vector<8x128xf32>
    %317 = vector.broadcast %310 : vector<1x128xf32> to vector<8x128xf32>
    %318 = arith.addf %317, %316 : vector<8x128xf32>
    %319 = arith.maximumf %306, %318 : vector<8x128xf32>
    %320 = arith.subf %306, %318 : vector<8x128xf32>
    %321 = arith.cmpf one, %320, %320 : vector<8x128xf32>
    %322 = arith.addf %306, %318 : vector<8x128xf32>
    %323 = math.absf %320 : vector<8x128xf32>
    %cst_98 = arith.constant 0.000000e+00 : f32
    %324 = vector.broadcast %cst_98 : f32 to vector<8x128xf32>
    %325 = arith.subf %324, %323 : vector<8x128xf32>
    %326 = math.exp %325 : vector<8x128xf32>
    %327 = math.log1p %326 : vector<8x128xf32>
    %328 = arith.addf %319, %327 : vector<8x128xf32>
    %329 = arith.select %321, %322, %328 : vector<8x128xi1>, vector<8x128xf32>
    %c1 = arith.constant 1 : index
    %c0_99 = arith.constant 0 : index
    %c0_100 = arith.constant 0 : index
    %330 = vector.load %arg5[%c1, %c0_99, %c0_100] : memref<16x8x128xf32, #tpu.memory_space<vmem>>, vector<1x8x128xf32>
    %331 = vector.shape_cast %330 : vector<1x8x128xf32> to vector<8x128xf32>
    %332 = vector.shape_cast %329 : vector<8x128xf32> to vector<1x8x128xf32>
    tpu.vector_store %arg5[%c1, %c0_99, %c0_100], %332 {strides = array<i32>} : memref<16x8x128xf32, #tpu.memory_space<vmem>>, vector<1x8x128xf32>,
    %c1_101 = arith.constant 1 : index
    %c0_102 = arith.constant 0 : index
    %333 = vector.load %arg1[%c1_101, %c0_102] : memref<16x128xf32, #tpu.memory_space<vmem>>, vector<1x128xf32>
    %334 = vector.extract_strided_slice %329 {offsets = [1, 0], sizes = [7, 128], strides = [1, 1]} : vector<8x128xf32> to vector<7x128xf32>
    %335 = tpu.concatenate %334, %2 in 0 : vector<7x128xf32>, vector<1x128xf32> -> vector<8x128xf32>
    %c4_i32_103 = arith.constant 4 : i32
    %336 = vector.broadcast %c4_i32_103 : i32 to vector<8x128xi32>
    %337 = arith.cmpi sge, %0, %336 : vector<8x128xi32>
    %cst_104 = arith.constant -1.000000e+30 : f32
    %338 = vector.broadcast %cst_104 : f32 to vector<8x128xf32>
    %339 = arith.select %337, %338, %335 : vector<8x128xi1>, vector<8x128xf32>
    %340 = vector.broadcast %333 : vector<1x128xf32> to vector<8x128xf32>
    %341 = arith.addf %340, %339 : vector<8x128xf32>
    %342 = arith.maximumf %329, %341 : vector<8x128xf32>
    %343 = arith.subf %329, %341 : vector<8x128xf32>
    %344 = arith.cmpf one, %343, %343 : vector<8x128xf32>
    %345 = arith.addf %329, %341 : vector<8x128xf32>
    %346 = math.absf %343 : vector<8x128xf32>
    %cst_105 = arith.constant 0.000000e+00 : f32
    %347 = vector.broadcast %cst_105 : f32 to vector<8x128xf32>
    %348 = arith.subf %347, %346 : vector<8x128xf32>
    %349 = math.exp %348 : vector<8x128xf32>
    %350 = math.log1p %349 : vector<8x128xf32>
    %351 = arith.addf %342, %350 : vector<8x128xf32>
    %352 = arith.select %344, %345, %351 : vector<8x128xi1>, vector<8x128xf32>
    %c0_106 = arith.constant 0 : index
    %c0_107 = arith.constant 0 : index
    %c0_108 = arith.constant 0 : index
    %353 = vector.load %arg5[%c0_106, %c0_107, %c0_108] : memref<16x8x128xf32, #tpu.memory_space<vmem>>, vector<1x8x128xf32>
    %354 = vector.shape_cast %353 : vector<1x8x128xf32> to vector<8x128xf32>
    %355 = vector.shape_cast %352 : vector<8x128xf32> to vector<1x8x128xf32>
    tpu.vector_store %arg5[%c0_106, %c0_107, %c0_108], %355 {strides = array<i32>} : memref<16x8x128xf32, #tpu.memory_space<vmem>>, vector<1x8x128xf32>,
    %c0_109 = arith.constant 0 : index
    %c0_110 = arith.constant 0 : index
    %356 = vector.load %arg1[%c0_109, %c0_110] : memref<16x128xf32, #tpu.memory_space<vmem>>, vector<1x128xf32>
    %357 = vector.extract_strided_slice %352 {offsets = [1, 0], sizes = [7, 128], strides = [1, 1]} : vector<8x128xf32> to vector<7x128xf32>
    %358 = tpu.concatenate %357, %2 in 0 : vector<7x128xf32>, vector<1x128xf32> -> vector<8x128xf32>
    %c4_i32_111 = arith.constant 4 : i32
    %359 = vector.broadcast %c4_i32_111 : i32 to vector<8x128xi32>
    %360 = arith.cmpi sge, %0, %359 : vector<8x128xi32>
    %cst_112 = arith.constant -1.000000e+30 : f32
    %361 = vector.broadcast %cst_112 : f32 to vector<8x128xf32>
    %362 = arith.select %360, %361, %358 : vector<8x128xi1>, vector<8x128xf32>
    %363 = vector.broadcast %356 : vector<1x128xf32> to vector<8x128xf32>
    %364 = arith.addf %363, %362 : vector<8x128xf32>
    %365 = arith.maximumf %352, %364 : vector<8x128xf32>
    %366 = arith.subf %352, %364 : vector<8x128xf32>
    %367 = arith.cmpf one, %366, %366 : vector<8x128xf32>
    %368 = arith.addf %352, %364 : vector<8x128xf32>
    %369 = math.absf %366 : vector<8x128xf32>
    %cst_113 = arith.constant 0.000000e+00 : f32
    %370 = vector.broadcast %cst_113 : f32 to vector<8x128xf32>
    %371 = arith.subf %370, %369 : vector<8x128xf32>
    %372 = math.exp %371 : vector<8x128xf32>
    %373 = math.log1p %372 : vector<8x128xf32>
    %374 = arith.addf %365, %373 : vector<8x128xf32>
    %375 = arith.select %367, %368, %374 : vector<8x128xi1>, vector<8x128xf32>
    %376 = vector.extract_strided_slice %375 {offsets = [0, 0], sizes = [1, 128], strides = [1, 1]} : vector<8x128xf32> to vector<1x128xf32>
    %c0_i32 = arith.constant 0 : i32
    %377 = vector.broadcast %c0_i32 : i32 to vector<8x128xi32>
    %378 = arith.cmpi eq, %0, %377 : vector<8x128xi32>
    %cst_114 = arith.constant 0.000000e+00 : f32
    %cst_115 = arith.constant -1.000000e+30 : f32
    %379 = vector.broadcast %cst_114 : f32 to vector<8x128xf32>
    %380 = vector.broadcast %cst_115 : f32 to vector<8x128xf32>
    %381 = arith.select %378, %379, %380 : vector<8x128xi1>, vector<8x128xf32>
    %c4_i32_116 = arith.constant 4 : i32
    %382 = vector.broadcast %c4_i32_116 : i32 to vector<1x1x128xi32>
    %c0_117 = arith.constant 0 : index
    %c0_118 = arith.constant 0 : index
    %383 = vector.load %arg1[%c0_117, %c0_118] : memref<16x128xf32, #tpu.memory_space<vmem>>, vector<1x128xf32>
    %c0_119 = arith.constant 0 : index
    %c0_120 = arith.constant 0 : index
    %c0_121 = arith.constant 0 : index
    %384 = vector.load %arg5[%c0_119, %c0_120, %c0_121] : memref<16x8x128xf32, #tpu.memory_space<vmem>>, vector<1x8x128xf32>
    %385 = vector.shape_cast %384 : vector<1x8x128xf32> to vector<8x128xf32>
    %386 = vector.extract_strided_slice %381 {offsets = [0, 0], sizes = [7, 128], strides = [1, 1]} : vector<8x128xf32> to vector<7x128xf32>
    %387 = tpu.concatenate %2, %386 in 0 : vector<1x128xf32>, vector<7x128xf32> -> vector<8x128xf32>
    %388 = arith.addf %387, %385 : vector<8x128xf32>
    %389 = vector.broadcast %383 : vector<1x128xf32> to vector<8x128xf32>
    %390 = arith.addf %388, %389 : vector<8x128xf32>
    %391 = vector.broadcast %376 : vector<1x128xf32> to vector<8x128xf32>
    %392 = arith.subf %390, %391 : vector<8x128xf32>
    %393 = math.exp %392 : vector<8x128xf32>
    %cst_122 = arith.constant dense<0.000000e+00> : vector<128xf32>
    %394 = vector.multi_reduction <add>, %393, %cst_122 [0] : vector<8x128xf32> to vector<128xf32>
    %395 = vector.shape_cast %394 : vector<128xf32> to vector<1x128xf32>
    %c0_123 = arith.constant 0 : index
    %c0_124 = arith.constant 0 : index
    %396 = vector.load %arg3[%c0_123, %c0_124] : memref<16x128xf32, #tpu.memory_space<vmem>>, vector<1x128xf32>
    tpu.vector_store %arg3[%c0_123, %c0_124], %395 {strides = array<i32>} : memref<16x128xf32, #tpu.memory_space<vmem>>, vector<1x128xf32>,
    %c4_i32_125 = arith.constant 4 : i32
    %397 = vector.broadcast %c4_i32_125 : i32 to vector<1x1x128xi32>
    %398 = arith.subi %397, %382 : vector<1x1x128xi32>
    %399 = vector.broadcast %398 : vector<1x1x128xi32> to vector<1x8x128xi32>
    %400 = arith.cmpi eq, %1, %399 : vector<1x8x128xi32>
    %401 = vector.shape_cast %385 : vector<8x128xf32> to vector<1x8x128xf32>
    %cst_126 = arith.constant -1.000000e+30 : f32
    %402 = vector.broadcast %cst_126 : f32 to vector<1x8x128xf32>
    %403 = arith.select %400, %401, %402 : vector<1x8x128xi1>, vector<1x8x128xf32>
    %cst_127 = arith.constant dense<0xFF800000> : vector<1x128xf32>
    %404 = vector.multi_reduction <maximumf>, %403, %cst_127 [1] : vector<1x8x128xf32> to vector<1x128xf32>
    %405 = vector.shape_cast %404 : vector<1x128xf32> to vector<1x1x128xf32>
    %c1_i32 = arith.constant 1 : i32
    %406 = vector.broadcast %c1_i32 : i32 to vector<1x1x128xi32>
    %407 = arith.addi %398, %406 : vector<1x1x128xi32>
    %408 = vector.broadcast %407 : vector<1x1x128xi32> to vector<1x8x128xi32>
    %409 = arith.cmpi eq, %1, %408 : vector<1x8x128xi32>
    %410 = vector.shape_cast %385 : vector<8x128xf32> to vector<1x8x128xf32>
    %cst_128 = arith.constant -1.000000e+30 : f32
    %411 = vector.broadcast %cst_128 : f32 to vector<1x8x128xf32>
    %412 = arith.select %409, %410, %411 : vector<1x8x128xi1>, vector<1x8x128xf32>
    %cst_129 = arith.constant dense<0xFF800000> : vector<1x128xf32>
    %413 = vector.multi_reduction <maximumf>, %412, %cst_129 [1] : vector<1x8x128xf32> to vector<1x128xf32>
    %414 = vector.shape_cast %413 : vector<1x128xf32> to vector<1x1x128xf32>
    %415 = vector.shape_cast %383 : vector<1x128xf32> to vector<1x1x128xf32>
    %416 = arith.addf %415, %414 : vector<1x1x128xf32>
    %417 = arith.maximumf %405, %416 : vector<1x1x128xf32>
    %418 = arith.subf %405, %416 : vector<1x1x128xf32>
    %419 = arith.cmpf one, %418, %418 : vector<1x1x128xf32>
    %420 = arith.addf %405, %416 : vector<1x1x128xf32>
    %421 = math.absf %418 : vector<1x1x128xf32>
    %cst_130 = arith.constant 0.000000e+00 : f32
    %422 = vector.broadcast %cst_130 : f32 to vector<1x1x128xf32>
    %423 = arith.subf %422, %421 : vector<1x1x128xf32>
    %424 = math.exp %423 : vector<1x1x128xf32>
    %425 = math.log1p %424 : vector<1x1x128xf32>
    %426 = arith.addf %417, %425 : vector<1x1x128xf32>
    %427 = arith.select %419, %420, %426 : vector<1x1x128xi1>, vector<1x1x128xf32>
    %428 = arith.subf %416, %427 : vector<1x1x128xf32>
    %429 = math.exp %428 : vector<1x1x128xf32>
    %c0_i32_131 = arith.constant 0 : i32
    %430 = vector.broadcast %c0_i32_131 : i32 to vector<1x1x128xi32>
    %431 = arith.cmpi sgt, %382, %430 : vector<1x1x128xi32>
    %cst_132 = arith.constant 0.000000e+00 : f32
    %432 = vector.broadcast %cst_132 : f32 to vector<1x1x128xf32>
    %433 = arith.select %431, %429, %432 : vector<1x1x128xi1>, vector<1x1x128xf32>
    %c0_133 = arith.constant 0 : index
    %c0_134 = arith.constant 0 : index
    %c0_135 = arith.constant 0 : index
    %434 = vector.load %arg2[%c0_133, %c0_134, %c0_135] : memref<1x16x128xf32, #tpu.memory_space<vmem>>, vector<1x1x128xf32>
    %435 = arith.cmpf olt, %434, %433 : vector<1x1x128xf32>
    %436 = arith.extui %435 : vector<1x1x128xi1> to vector<1x1x128xi32>
    %437 = arith.sitofp %436 : vector<1x1x128xi32> to vector<1x1x128xf32>
    %c0_136 = arith.constant 0 : index
    %c0_137 = arith.constant 0 : index
    %c0_138 = arith.constant 0 : index
    %438 = vector.load %arg4[%c0_136, %c0_137, %c0_138] : memref<1x16x128xf32, #tpu.memory_space<vmem>>, vector<1x1x128xf32>
    tpu.vector_store %arg4[%c0_136, %c0_137, %c0_138], %437 {strides = array<i32>} : memref<1x16x128xf32, #tpu.memory_space<vmem>>, vector<1x1x128xf32>,
    %439 = arith.fptosi %437 : vector<1x1x128xf32> to vector<1x1x128xi32>
    %440 = arith.subi %382, %439 : vector<1x1x128xi32>
    %441 = vector.broadcast %383 : vector<1x128xf32> to vector<8x128xf32>
    %442 = arith.addf %441, %387 : vector<8x128xf32>
    %443 = arith.maximumf %381, %442 : vector<8x128xf32>
    %444 = arith.subf %381, %442 : vector<8x128xf32>
    %445 = arith.cmpf one, %444, %444 : vector<8x128xf32>
    %446 = arith.addf %381, %442 : vector<8x128xf32>
    %447 = math.absf %444 : vector<8x128xf32>
    %cst_139 = arith.constant 0.000000e+00 : f32
    %448 = vector.broadcast %cst_139 : f32 to vector<8x128xf32>
    %449 = arith.subf %448, %447 : vector<8x128xf32>
    %450 = math.exp %449 : vector<8x128xf32>
    %451 = math.log1p %450 : vector<8x128xf32>
    %452 = arith.addf %443, %451 : vector<8x128xf32>
    %453 = arith.select %445, %446, %452 : vector<8x128xi1>, vector<8x128xf32>
    %c1_140 = arith.constant 1 : index
    %c0_141 = arith.constant 0 : index
    %454 = vector.load %arg1[%c1_140, %c0_141] : memref<16x128xf32, #tpu.memory_space<vmem>>, vector<1x128xf32>
    %c1_142 = arith.constant 1 : index
    %c0_143 = arith.constant 0 : index
    %c0_144 = arith.constant 0 : index
    %455 = vector.load %arg5[%c1_142, %c0_143, %c0_144] : memref<16x8x128xf32, #tpu.memory_space<vmem>>, vector<1x8x128xf32>
    %456 = vector.shape_cast %455 : vector<1x8x128xf32> to vector<8x128xf32>
    %457 = vector.extract_strided_slice %453 {offsets = [0, 0], sizes = [7, 128], strides = [1, 1]} : vector<8x128xf32> to vector<7x128xf32>
    %458 = tpu.concatenate %2, %457 in 0 : vector<1x128xf32>, vector<7x128xf32> -> vector<8x128xf32>
    %459 = arith.addf %458, %456 : vector<8x128xf32>
    %460 = vector.broadcast %454 : vector<1x128xf32> to vector<8x128xf32>
    %461 = arith.addf %459, %460 : vector<8x128xf32>
    %462 = vector.broadcast %376 : vector<1x128xf32> to vector<8x128xf32>
    %463 = arith.subf %461, %462 : vector<8x128xf32>
    %464 = math.exp %463 : vector<8x128xf32>
    %cst_145 = arith.constant dense<0.000000e+00> : vector<128xf32>
    %465 = vector.multi_reduction <add>, %464, %cst_145 [0] : vector<8x128xf32> to vector<128xf32>
    %466 = vector.shape_cast %465 : vector<128xf32> to vector<1x128xf32>
    %c1_146 = arith.constant 1 : index
    %c0_147 = arith.constant 0 : index
    %467 = vector.load %arg3[%c1_146, %c0_147] : memref<16x128xf32, #tpu.memory_space<vmem>>, vector<1x128xf32>
    tpu.vector_store %arg3[%c1_146, %c0_147], %466 {strides = array<i32>} : memref<16x128xf32, #tpu.memory_space<vmem>>, vector<1x128xf32>,
    %c4_i32_148 = arith.constant 4 : i32
    %468 = vector.broadcast %c4_i32_148 : i32 to vector<1x1x128xi32>
    %469 = arith.subi %468, %440 : vector<1x1x128xi32>
    %470 = vector.broadcast %469 : vector<1x1x128xi32> to vector<1x8x128xi32>
    %471 = arith.cmpi eq, %1, %470 : vector<1x8x128xi32>
    %472 = vector.shape_cast %456 : vector<8x128xf32> to vector<1x8x128xf32>
    %cst_149 = arith.constant -1.000000e+30 : f32
    %473 = vector.broadcast %cst_149 : f32 to vector<1x8x128xf32>
    %474 = arith.select %471, %472, %473 : vector<1x8x128xi1>, vector<1x8x128xf32>
    %cst_150 = arith.constant dense<0xFF800000> : vector<1x128xf32>
    %475 = vector.multi_reduction <maximumf>, %474, %cst_150 [1] : vector<1x8x128xf32> to vector<1x128xf32>
    %476 = vector.shape_cast %475 : vector<1x128xf32> to vector<1x1x128xf32>
    %c1_i32_151 = arith.constant 1 : i32
    %477 = vector.broadcast %c1_i32_151 : i32 to vector<1x1x128xi32>
    %478 = arith.addi %469, %477 : vector<1x1x128xi32>
    %479 = vector.broadcast %478 : vector<1x1x128xi32> to vector<1x8x128xi32>
    %480 = arith.cmpi eq, %1, %479 : vector<1x8x128xi32>
    %481 = vector.shape_cast %456 : vector<8x128xf32> to vector<1x8x128xf32>
    %cst_152 = arith.constant -1.000000e+30 : f32
    %482 = vector.broadcast %cst_152 : f32 to vector<1x8x128xf32>
    %483 = arith.select %480, %481, %482 : vector<1x8x128xi1>, vector<1x8x128xf32>
    %cst_153 = arith.constant dense<0xFF800000> : vector<1x128xf32>
    %484 = vector.multi_reduction <maximumf>, %483, %cst_153 [1] : vector<1x8x128xf32> to vector<1x128xf32>
    %485 = vector.shape_cast %484 : vector<1x128xf32> to vector<1x1x128xf32>
    %486 = vector.shape_cast %454 : vector<1x128xf32> to vector<1x1x128xf32>
    %487 = arith.addf %486, %485 : vector<1x1x128xf32>
    %488 = arith.maximumf %476, %487 : vector<1x1x128xf32>
    %489 = arith.subf %476, %487 : vector<1x1x128xf32>
    %490 = arith.cmpf one, %489, %489 : vector<1x1x128xf32>
    %491 = arith.addf %476, %487 : vector<1x1x128xf32>
    %492 = math.absf %489 : vector<1x1x128xf32>
    %cst_154 = arith.constant 0.000000e+00 : f32
    %493 = vector.broadcast %cst_154 : f32 to vector<1x1x128xf32>
    %494 = arith.subf %493, %492 : vector<1x1x128xf32>
    %495 = math.exp %494 : vector<1x1x128xf32>
    %496 = math.log1p %495 : vector<1x1x128xf32>
    %497 = arith.addf %488, %496 : vector<1x1x128xf32>
    %498 = arith.select %490, %491, %497 : vector<1x1x128xi1>, vector<1x1x128xf32>
    %499 = arith.subf %487, %498 : vector<1x1x128xf32>
    %500 = math.exp %499 : vector<1x1x128xf32>
    %c0_i32_155 = arith.constant 0 : i32
    %501 = vector.broadcast %c0_i32_155 : i32 to vector<1x1x128xi32>
    %502 = arith.cmpi sgt, %440, %501 : vector<1x1x128xi32>
    %cst_156 = arith.constant 0.000000e+00 : f32
    %503 = vector.broadcast %cst_156 : f32 to vector<1x1x128xf32>
    %504 = arith.select %502, %500, %503 : vector<1x1x128xi1>, vector<1x1x128xf32>
    %c0_157 = arith.constant 0 : index
    %c1_158 = arith.constant 1 : index
    %c0_159 = arith.constant 0 : index
    %505 = vector.load %arg2[%c0_157, %c1_158, %c0_159] : memref<1x16x128xf32, #tpu.memory_space<vmem>>, vector<1x1x128xf32>
    %506 = arith.cmpf olt, %505, %504 : vector<1x1x128xf32>
    %507 = arith.extui %506 : vector<1x1x128xi1> to vector<1x1x128xi32>
    %508 = arith.sitofp %507 : vector<1x1x128xi32> to vector<1x1x128xf32>
    %c0_160 = arith.constant 0 : index
    %c1_161 = arith.constant 1 : index
    %c0_162 = arith.constant 0 : index
    %509 = vector.load %arg4[%c0_160, %c1_161, %c0_162] : memref<1x16x128xf32, #tpu.memory_space<vmem>>, vector<1x1x128xf32>
    tpu.vector_store %arg4[%c0_160, %c1_161, %c0_162], %508 {strides = array<i32>} : memref<1x16x128xf32, #tpu.memory_space<vmem>>, vector<1x1x128xf32>,
    %510 = arith.fptosi %508 : vector<1x1x128xf32> to vector<1x1x128xi32>
    %511 = arith.subi %440, %510 : vector<1x1x128xi32>
    %512 = vector.broadcast %454 : vector<1x128xf32> to vector<8x128xf32>
    %513 = arith.addf %512, %458 : vector<8x128xf32>
    %514 = arith.maximumf %453, %513 : vector<8x128xf32>
    %515 = arith.subf %453, %513 : vector<8x128xf32>
    %516 = arith.cmpf one, %515, %515 : vector<8x128xf32>
    %517 = arith.addf %453, %513 : vector<8x128xf32>
    %518 = math.absf %515 : vector<8x128xf32>
    %cst_163 = arith.constant 0.000000e+00 : f32
    %519 = vector.broadcast %cst_163 : f32 to vector<8x128xf32>
    %520 = arith.subf %519, %518 : vector<8x128xf32>
    %521 = math.exp %520 : vector<8x128xf32>
    %522 = math.log1p %521 : vector<8x128xf32>
    %523 = arith.addf %514, %522 : vector<8x128xf32>
    %524 = arith.select %516, %517, %523 : vector<8x128xi1>, vector<8x128xf32>
    %c2_164 = arith.constant 2 : index
    %c0_165 = arith.constant 0 : index
    %525 = vector.load %arg1[%c2_164, %c0_165] : memref<16x128xf32, #tpu.memory_space<vmem>>, vector<1x128xf32>
    %c2_166 = arith.constant 2 : index
    %c0_167 = arith.constant 0 : index
    %c0_168 = arith.constant 0 : index
    %526 = vector.load %arg5[%c2_166, %c0_167, %c0_168] : memref<16x8x128xf32, #tpu.memory_space<vmem>>, vector<1x8x128xf32>
    %527 = vector.shape_cast %526 : vector<1x8x128xf32> to vector<8x128xf32>
    %528 = vector.extract_strided_slice %524 {offsets = [0, 0], sizes = [7, 128], strides = [1, 1]} : vector<8x128xf32> to vector<7x128xf32>
    %529 = tpu.concatenate %2, %528 in 0 : vector<1x128xf32>, vector<7x128xf32> -> vector<8x128xf32>
    %530 = arith.addf %529, %527 : vector<8x128xf32>
    %531 = vector.broadcast %525 : vector<1x128xf32> to vector<8x128xf32>
    %532 = arith.addf %530, %531 : vector<8x128xf32>
    %533 = vector.broadcast %376 : vector<1x128xf32> to vector<8x128xf32>
    %534 = arith.subf %532, %533 : vector<8x128xf32>
    %535 = math.exp %534 : vector<8x128xf32>
    %cst_169 = arith.constant dense<0.000000e+00> : vector<128xf32>
    %536 = vector.multi_reduction <add>, %535, %cst_169 [0] : vector<8x128xf32> to vector<128xf32>
    %537 = vector.shape_cast %536 : vector<128xf32> to vector<1x128xf32>
    %c2_170 = arith.constant 2 : index
    %c0_171 = arith.constant 0 : index
    %538 = vector.load %arg3[%c2_170, %c0_171] : memref<16x128xf32, #tpu.memory_space<vmem>>, vector<1x128xf32>
    tpu.vector_store %arg3[%c2_170, %c0_171], %537 {strides = array<i32>} : memref<16x128xf32, #tpu.memory_space<vmem>>, vector<1x128xf32>,
    %c4_i32_172 = arith.constant 4 : i32
    %539 = vector.broadcast %c4_i32_172 : i32 to vector<1x1x128xi32>
    %540 = arith.subi %539, %511 : vector<1x1x128xi32>
    %541 = vector.broadcast %540 : vector<1x1x128xi32> to vector<1x8x128xi32>
    %542 = arith.cmpi eq, %1, %541 : vector<1x8x128xi32>
    %543 = vector.shape_cast %527 : vector<8x128xf32> to vector<1x8x128xf32>
    %cst_173 = arith.constant -1.000000e+30 : f32
    %544 = vector.broadcast %cst_173 : f32 to vector<1x8x128xf32>
    %545 = arith.select %542, %543, %544 : vector<1x8x128xi1>, vector<1x8x128xf32>
    %cst_174 = arith.constant dense<0xFF800000> : vector<1x128xf32>
    %546 = vector.multi_reduction <maximumf>, %545, %cst_174 [1] : vector<1x8x128xf32> to vector<1x128xf32>
    %547 = vector.shape_cast %546 : vector<1x128xf32> to vector<1x1x128xf32>
    %c1_i32_175 = arith.constant 1 : i32
    %548 = vector.broadcast %c1_i32_175 : i32 to vector<1x1x128xi32>
    %549 = arith.addi %540, %548 : vector<1x1x128xi32>
    %550 = vector.broadcast %549 : vector<1x1x128xi32> to vector<1x8x128xi32>
    %551 = arith.cmpi eq, %1, %550 : vector<1x8x128xi32>
    %552 = vector.shape_cast %527 : vector<8x128xf32> to vector<1x8x128xf32>
    %cst_176 = arith.constant -1.000000e+30 : f32
    %553 = vector.broadcast %cst_176 : f32 to vector<1x8x128xf32>
    %554 = arith.select %551, %552, %553 : vector<1x8x128xi1>, vector<1x8x128xf32>
    %cst_177 = arith.constant dense<0xFF800000> : vector<1x128xf32>
    %555 = vector.multi_reduction <maximumf>, %554, %cst_177 [1] : vector<1x8x128xf32> to vector<1x128xf32>
    %556 = vector.shape_cast %555 : vector<1x128xf32> to vector<1x1x128xf32>
    %557 = vector.shape_cast %525 : vector<1x128xf32> to vector<1x1x128xf32>
    %558 = arith.addf %557, %556 : vector<1x1x128xf32>
    %559 = arith.maximumf %547, %558 : vector<1x1x128xf32>
    %560 = arith.subf %547, %558 : vector<1x1x128xf32>
    %561 = arith.cmpf one, %560, %560 : vector<1x1x128xf32>
    %562 = arith.addf %547, %558 : vector<1x1x128xf32>
    %563 = math.absf %560 : vector<1x1x128xf32>
    %cst_178 = arith.constant 0.000000e+00 : f32
    %564 = vector.broadcast %cst_178 : f32 to vector<1x1x128xf32>
    %565 = arith.subf %564, %563 : vector<1x1x128xf32>
    %566 = math.exp %565 : vector<1x1x128xf32>
    %567 = math.log1p %566 : vector<1x1x128xf32>
    %568 = arith.addf %559, %567 : vector<1x1x128xf32>
    %569 = arith.select %561, %562, %568 : vector<1x1x128xi1>, vector<1x1x128xf32>
    %570 = arith.subf %558, %569 : vector<1x1x128xf32>
    %571 = math.exp %570 : vector<1x1x128xf32>
    %c0_i32_179 = arith.constant 0 : i32
    %572 = vector.broadcast %c0_i32_179 : i32 to vector<1x1x128xi32>
    %573 = arith.cmpi sgt, %511, %572 : vector<1x1x128xi32>
    %cst_180 = arith.constant 0.000000e+00 : f32
    %574 = vector.broadcast %cst_180 : f32 to vector<1x1x128xf32>
    %575 = arith.select %573, %571, %574 : vector<1x1x128xi1>, vector<1x1x128xf32>
    %c0_181 = arith.constant 0 : index
    %c2_182 = arith.constant 2 : index
    %c0_183 = arith.constant 0 : index
    %576 = vector.load %arg2[%c0_181, %c2_182, %c0_183] : memref<1x16x128xf32, #tpu.memory_space<vmem>>, vector<1x1x128xf32>
    %577 = arith.cmpf olt, %576, %575 : vector<1x1x128xf32>
    %578 = arith.extui %577 : vector<1x1x128xi1> to vector<1x1x128xi32>
    %579 = arith.sitofp %578 : vector<1x1x128xi32> to vector<1x1x128xf32>
    %c0_184 = arith.constant 0 : index
    %c2_185 = arith.constant 2 : index
    %c0_186 = arith.constant 0 : index
    %580 = vector.load %arg4[%c0_184, %c2_185, %c0_186] : memref<1x16x128xf32, #tpu.memory_space<vmem>>, vector<1x1x128xf32>
    tpu.vector_store %arg4[%c0_184, %c2_185, %c0_186], %579 {strides = array<i32>} : memref<1x16x128xf32, #tpu.memory_space<vmem>>, vector<1x1x128xf32>,
    %581 = arith.fptosi %579 : vector<1x1x128xf32> to vector<1x1x128xi32>
    %582 = arith.subi %511, %581 : vector<1x1x128xi32>
    %583 = vector.broadcast %525 : vector<1x128xf32> to vector<8x128xf32>
    %584 = arith.addf %583, %529 : vector<8x128xf32>
    %585 = arith.maximumf %524, %584 : vector<8x128xf32>
    %586 = arith.subf %524, %584 : vector<8x128xf32>
    %587 = arith.cmpf one, %586, %586 : vector<8x128xf32>
    %588 = arith.addf %524, %584 : vector<8x128xf32>
    %589 = math.absf %586 : vector<8x128xf32>
    %cst_187 = arith.constant 0.000000e+00 : f32
    %590 = vector.broadcast %cst_187 : f32 to vector<8x128xf32>
    %591 = arith.subf %590, %589 : vector<8x128xf32>
    %592 = math.exp %591 : vector<8x128xf32>
    %593 = math.log1p %592 : vector<8x128xf32>
    %594 = arith.addf %585, %593 : vector<8x128xf32>
    %595 = arith.select %587, %588, %594 : vector<8x128xi1>, vector<8x128xf32>
    %c3_188 = arith.constant 3 : index
    %c0_189 = arith.constant 0 : index
    %596 = vector.load %arg1[%c3_188, %c0_189] : memref<16x128xf32, #tpu.memory_space<vmem>>, vector<1x128xf32>
    %c3_190 = arith.constant 3 : index
    %c0_191 = arith.constant 0 : index
    %c0_192 = arith.constant 0 : index
    %597 = vector.load %arg5[%c3_190, %c0_191, %c0_192] : memref<16x8x128xf32, #tpu.memory_space<vmem>>, vector<1x8x128xf32>
    %598 = vector.shape_cast %597 : vector<1x8x128xf32> to vector<8x128xf32>
    %599 = vector.extract_strided_slice %595 {offsets = [0, 0], sizes = [7, 128], strides = [1, 1]} : vector<8x128xf32> to vector<7x128xf32>
    %600 = tpu.concatenate %2, %599 in 0 : vector<1x128xf32>, vector<7x128xf32> -> vector<8x128xf32>
    %601 = arith.addf %600, %598 : vector<8x128xf32>
    %602 = vector.broadcast %596 : vector<1x128xf32> to vector<8x128xf32>
    %603 = arith.addf %601, %602 : vector<8x128xf32>
    %604 = vector.broadcast %376 : vector<1x128xf32> to vector<8x128xf32>
    %605 = arith.subf %603, %604 : vector<8x128xf32>
    %606 = math.exp %605 : vector<8x128xf32>
    %cst_193 = arith.constant dense<0.000000e+00> : vector<128xf32>
    %607 = vector.multi_reduction <add>, %606, %cst_193 [0] : vector<8x128xf32> to vector<128xf32>
    %608 = vector.shape_cast %607 : vector<128xf32> to vector<1x128xf32>
    %c3_194 = arith.constant 3 : index
    %c0_195 = arith.constant 0 : index
    %609 = vector.load %arg3[%c3_194, %c0_195] : memref<16x128xf32, #tpu.memory_space<vmem>>, vector<1x128xf32>
    tpu.vector_store %arg3[%c3_194, %c0_195], %608 {strides = array<i32>} : memref<16x128xf32, #tpu.memory_space<vmem>>, vector<1x128xf32>,
    %c4_i32_196 = arith.constant 4 : i32
    %610 = vector.broadcast %c4_i32_196 : i32 to vector<1x1x128xi32>
    %611 = arith.subi %610, %582 : vector<1x1x128xi32>
    %612 = vector.broadcast %611 : vector<1x1x128xi32> to vector<1x8x128xi32>
    %613 = arith.cmpi eq, %1, %612 : vector<1x8x128xi32>
    %614 = vector.shape_cast %598 : vector<8x128xf32> to vector<1x8x128xf32>
    %cst_197 = arith.constant -1.000000e+30 : f32
    %615 = vector.broadcast %cst_197 : f32 to vector<1x8x128xf32>
    %616 = arith.select %613, %614, %615 : vector<1x8x128xi1>, vector<1x8x128xf32>
    %cst_198 = arith.constant dense<0xFF800000> : vector<1x128xf32>
    %617 = vector.multi_reduction <maximumf>, %616, %cst_198 [1] : vector<1x8x128xf32> to vector<1x128xf32>
    %618 = vector.shape_cast %617 : vector<1x128xf32> to vector<1x1x128xf32>
    %c1_i32_199 = arith.constant 1 : i32
    %619 = vector.broadcast %c1_i32_199 : i32 to vector<1x1x128xi32>
    %620 = arith.addi %611, %619 : vector<1x1x128xi32>
    %621 = vector.broadcast %620 : vector<1x1x128xi32> to vector<1x8x128xi32>
    %622 = arith.cmpi eq, %1, %621 : vector<1x8x128xi32>
    %623 = vector.shape_cast %598 : vector<8x128xf32> to vector<1x8x128xf32>
    %cst_200 = arith.constant -1.000000e+30 : f32
    %624 = vector.broadcast %cst_200 : f32 to vector<1x8x128xf32>
    %625 = arith.select %622, %623, %624 : vector<1x8x128xi1>, vector<1x8x128xf32>
    %cst_201 = arith.constant dense<0xFF800000> : vector<1x128xf32>
    %626 = vector.multi_reduction <maximumf>, %625, %cst_201 [1] : vector<1x8x128xf32> to vector<1x128xf32>
    %627 = vector.shape_cast %626 : vector<1x128xf32> to vector<1x1x128xf32>
    %628 = vector.shape_cast %596 : vector<1x128xf32> to vector<1x1x128xf32>
    %629 = arith.addf %628, %627 : vector<1x1x128xf32>
    %630 = arith.maximumf %618, %629 : vector<1x1x128xf32>
    %631 = arith.subf %618, %629 : vector<1x1x128xf32>
    %632 = arith.cmpf one, %631, %631 : vector<1x1x128xf32>
    %633 = arith.addf %618, %629 : vector<1x1x128xf32>
    %634 = math.absf %631 : vector<1x1x128xf32>
    %cst_202 = arith.constant 0.000000e+00 : f32
    %635 = vector.broadcast %cst_202 : f32 to vector<1x1x128xf32>
    %636 = arith.subf %635, %634 : vector<1x1x128xf32>
    %637 = math.exp %636 : vector<1x1x128xf32>
    %638 = math.log1p %637 : vector<1x1x128xf32>
    %639 = arith.addf %630, %638 : vector<1x1x128xf32>
    %640 = arith.select %632, %633, %639 : vector<1x1x128xi1>, vector<1x1x128xf32>
    %641 = arith.subf %629, %640 : vector<1x1x128xf32>
    %642 = math.exp %641 : vector<1x1x128xf32>
    %c0_i32_203 = arith.constant 0 : i32
    %643 = vector.broadcast %c0_i32_203 : i32 to vector<1x1x128xi32>
    %644 = arith.cmpi sgt, %582, %643 : vector<1x1x128xi32>
    %cst_204 = arith.constant 0.000000e+00 : f32
    %645 = vector.broadcast %cst_204 : f32 to vector<1x1x128xf32>
    %646 = arith.select %644, %642, %645 : vector<1x1x128xi1>, vector<1x1x128xf32>
    %c0_205 = arith.constant 0 : index
    %c3_206 = arith.constant 3 : index
    %c0_207 = arith.constant 0 : index
    %647 = vector.load %arg2[%c0_205, %c3_206, %c0_207] : memref<1x16x128xf32, #tpu.memory_space<vmem>>, vector<1x1x128xf32>
    %648 = arith.cmpf olt, %647, %646 : vector<1x1x128xf32>
    %649 = arith.extui %648 : vector<1x1x128xi1> to vector<1x1x128xi32>
    %650 = arith.sitofp %649 : vector<1x1x128xi32> to vector<1x1x128xf32>
    %c0_208 = arith.constant 0 : index
    %c3_209 = arith.constant 3 : index
    %c0_210 = arith.constant 0 : index
    %651 = vector.load %arg4[%c0_208, %c3_209, %c0_210] : memref<1x16x128xf32, #tpu.memory_space<vmem>>, vector<1x1x128xf32>
    tpu.vector_store %arg4[%c0_208, %c3_209, %c0_210], %650 {strides = array<i32>} : memref<1x16x128xf32, #tpu.memory_space<vmem>>, vector<1x1x128xf32>,
    %652 = arith.fptosi %650 : vector<1x1x128xf32> to vector<1x1x128xi32>
    %653 = arith.subi %582, %652 : vector<1x1x128xi32>
    %654 = vector.broadcast %596 : vector<1x128xf32> to vector<8x128xf32>
    %655 = arith.addf %654, %600 : vector<8x128xf32>
    %656 = arith.maximumf %595, %655 : vector<8x128xf32>
    %657 = arith.subf %595, %655 : vector<8x128xf32>
    %658 = arith.cmpf one, %657, %657 : vector<8x128xf32>
    %659 = arith.addf %595, %655 : vector<8x128xf32>
    %660 = math.absf %657 : vector<8x128xf32>
    %cst_211 = arith.constant 0.000000e+00 : f32
    %661 = vector.broadcast %cst_211 : f32 to vector<8x128xf32>
    %662 = arith.subf %661, %660 : vector<8x128xf32>
    %663 = math.exp %662 : vector<8x128xf32>
    %664 = math.log1p %663 : vector<8x128xf32>
    %665 = arith.addf %656, %664 : vector<8x128xf32>
    %666 = arith.select %658, %659, %665 : vector<8x128xi1>, vector<8x128xf32>
    %c4_212 = arith.constant 4 : index
    %c0_213 = arith.constant 0 : index
    %667 = vector.load %arg1[%c4_212, %c0_213] : memref<16x128xf32, #tpu.memory_space<vmem>>, vector<1x128xf32>
    %c4_214 = arith.constant 4 : index
    %c0_215 = arith.constant 0 : index
    %c0_216 = arith.constant 0 : index
    %668 = vector.load %arg5[%c4_214, %c0_215, %c0_216] : memref<16x8x128xf32, #tpu.memory_space<vmem>>, vector<1x8x128xf32>
    %669 = vector.shape_cast %668 : vector<1x8x128xf32> to vector<8x128xf32>
    %670 = vector.extract_strided_slice %666 {offsets = [0, 0], sizes = [7, 128], strides = [1, 1]} : vector<8x128xf32> to vector<7x128xf32>
    %671 = tpu.concatenate %2, %670 in 0 : vector<1x128xf32>, vector<7x128xf32> -> vector<8x128xf32>
    %672 = arith.addf %671, %669 : vector<8x128xf32>
    %673 = vector.broadcast %667 : vector<1x128xf32> to vector<8x128xf32>
    %674 = arith.addf %672, %673 : vector<8x128xf32>
    %675 = vector.broadcast %376 : vector<1x128xf32> to vector<8x128xf32>
    %676 = arith.subf %674, %675 : vector<8x128xf32>
    %677 = math.exp %676 : vector<8x128xf32>
    %cst_217 = arith.constant dense<0.000000e+00> : vector<128xf32>
    %678 = vector.multi_reduction <add>, %677, %cst_217 [0] : vector<8x128xf32> to vector<128xf32>
    %679 = vector.shape_cast %678 : vector<128xf32> to vector<1x128xf32>
    %c4_218 = arith.constant 4 : index
    %c0_219 = arith.constant 0 : index
    %680 = vector.load %arg3[%c4_218, %c0_219] : memref<16x128xf32, #tpu.memory_space<vmem>>, vector<1x128xf32>
    tpu.vector_store %arg3[%c4_218, %c0_219], %679 {strides = array<i32>} : memref<16x128xf32, #tpu.memory_space<vmem>>, vector<1x128xf32>,
    %c4_i32_220 = arith.constant 4 : i32
    %681 = vector.broadcast %c4_i32_220 : i32 to vector<1x1x128xi32>
    %682 = arith.subi %681, %653 : vector<1x1x128xi32>
    %683 = vector.broadcast %682 : vector<1x1x128xi32> to vector<1x8x128xi32>
    %684 = arith.cmpi eq, %1, %683 : vector<1x8x128xi32>
    %685 = vector.shape_cast %669 : vector<8x128xf32> to vector<1x8x128xf32>
    %cst_221 = arith.constant -1.000000e+30 : f32
    %686 = vector.broadcast %cst_221 : f32 to vector<1x8x128xf32>
    %687 = arith.select %684, %685, %686 : vector<1x8x128xi1>, vector<1x8x128xf32>
    %cst_222 = arith.constant dense<0xFF800000> : vector<1x128xf32>
    %688 = vector.multi_reduction <maximumf>, %687, %cst_222 [1] : vector<1x8x128xf32> to vector<1x128xf32>
    %689 = vector.shape_cast %688 : vector<1x128xf32> to vector<1x1x128xf32>
    %c1_i32_223 = arith.constant 1 : i32
    %690 = vector.broadcast %c1_i32_223 : i32 to vector<1x1x128xi32>
    %691 = arith.addi %682, %690 : vector<1x1x128xi32>
    %692 = vector.broadcast %691 : vector<1x1x128xi32> to vector<1x8x128xi32>
    %693 = arith.cmpi eq, %1, %692 : vector<1x8x128xi32>
    %694 = vector.shape_cast %669 : vector<8x128xf32> to vector<1x8x128xf32>
    %cst_224 = arith.constant -1.000000e+30 : f32
    %695 = vector.broadcast %cst_224 : f32 to vector<1x8x128xf32>
    %696 = arith.select %693, %694, %695 : vector<1x8x128xi1>, vector<1x8x128xf32>
    %cst_225 = arith.constant dense<0xFF800000> : vector<1x128xf32>
    %697 = vector.multi_reduction <maximumf>, %696, %cst_225 [1] : vector<1x8x128xf32> to vector<1x128xf32>
    %698 = vector.shape_cast %697 : vector<1x128xf32> to vector<1x1x128xf32>
    %699 = vector.shape_cast %667 : vector<1x128xf32> to vector<1x1x128xf32>
    %700 = arith.addf %699, %698 : vector<1x1x128xf32>
    %701 = arith.maximumf %689, %700 : vector<1x1x128xf32>
    %702 = arith.subf %689, %700 : vector<1x1x128xf32>
    %703 = arith.cmpf one, %702, %702 : vector<1x1x128xf32>
    %704 = arith.addf %689, %700 : vector<1x1x128xf32>
    %705 = math.absf %702 : vector<1x1x128xf32>
    %cst_226 = arith.constant 0.000000e+00 : f32
    %706 = vector.broadcast %cst_226 : f32 to vector<1x1x128xf32>
    %707 = arith.subf %706, %705 : vector<1x1x128xf32>
    %708 = math.exp %707 : vector<1x1x128xf32>
    %709 = math.log1p %708 : vector<1x1x128xf32>
    %710 = arith.addf %701, %709 : vector<1x1x128xf32>
    %711 = arith.select %703, %704, %710 : vector<1x1x128xi1>, vector<1x1x128xf32>
    %712 = arith.subf %700, %711 : vector<1x1x128xf32>
    %713 = math.exp %712 : vector<1x1x128xf32>
    %c0_i32_227 = arith.constant 0 : i32
    %714 = vector.broadcast %c0_i32_227 : i32 to vector<1x1x128xi32>
    %715 = arith.cmpi sgt, %653, %714 : vector<1x1x128xi32>
    %cst_228 = arith.constant 0.000000e+00 : f32
    %716 = vector.broadcast %cst_228 : f32 to vector<1x1x128xf32>
    %717 = arith.select %715, %713, %716 : vector<1x1x128xi1>, vector<1x1x128xf32>
    %c0_229 = arith.constant 0 : index
    %c4_230 = arith.constant 4 : index
    %c0_231 = arith.constant 0 : index
    %718 = vector.load %arg2[%c0_229, %c4_230, %c0_231] : memref<1x16x128xf32, #tpu.memory_space<vmem>>, vector<1x1x128xf32>
    %719 = arith.cmpf olt, %718, %717 : vector<1x1x128xf32>
    %720 = arith.extui %719 : vector<1x1x128xi1> to vector<1x1x128xi32>
    %721 = arith.sitofp %720 : vector<1x1x128xi32> to vector<1x1x128xf32>
    %c0_232 = arith.constant 0 : index
    %c4_233 = arith.constant 4 : index
    %c0_234 = arith.constant 0 : index
    %722 = vector.load %arg4[%c0_232, %c4_233, %c0_234] : memref<1x16x128xf32, #tpu.memory_space<vmem>>, vector<1x1x128xf32>
    tpu.vector_store %arg4[%c0_232, %c4_233, %c0_234], %721 {strides = array<i32>} : memref<1x16x128xf32, #tpu.memory_space<vmem>>, vector<1x1x128xf32>,
    %723 = arith.fptosi %721 : vector<1x1x128xf32> to vector<1x1x128xi32>
    %724 = arith.subi %653, %723 : vector<1x1x128xi32>
    %725 = vector.broadcast %667 : vector<1x128xf32> to vector<8x128xf32>
    %726 = arith.addf %725, %671 : vector<8x128xf32>
    %727 = arith.maximumf %666, %726 : vector<8x128xf32>
    %728 = arith.subf %666, %726 : vector<8x128xf32>
    %729 = arith.cmpf one, %728, %728 : vector<8x128xf32>
    %730 = arith.addf %666, %726 : vector<8x128xf32>
    %731 = math.absf %728 : vector<8x128xf32>
    %cst_235 = arith.constant 0.000000e+00 : f32
    %732 = vector.broadcast %cst_235 : f32 to vector<8x128xf32>
    %733 = arith.subf %732, %731 : vector<8x128xf32>
    %734 = math.exp %733 : vector<8x128xf32>
    %735 = math.log1p %734 : vector<8x128xf32>
    %736 = arith.addf %727, %735 : vector<8x128xf32>
    %737 = arith.select %729, %730, %736 : vector<8x128xi1>, vector<8x128xf32>
    %c5_236 = arith.constant 5 : index
    %c0_237 = arith.constant 0 : index
    %738 = vector.load %arg1[%c5_236, %c0_237] : memref<16x128xf32, #tpu.memory_space<vmem>>, vector<1x128xf32>
    %c5_238 = arith.constant 5 : index
    %c0_239 = arith.constant 0 : index
    %c0_240 = arith.constant 0 : index
    %739 = vector.load %arg5[%c5_238, %c0_239, %c0_240] : memref<16x8x128xf32, #tpu.memory_space<vmem>>, vector<1x8x128xf32>
    %740 = vector.shape_cast %739 : vector<1x8x128xf32> to vector<8x128xf32>
    %741 = vector.extract_strided_slice %737 {offsets = [0, 0], sizes = [7, 128], strides = [1, 1]} : vector<8x128xf32> to vector<7x128xf32>
    %742 = tpu.concatenate %2, %741 in 0 : vector<1x128xf32>, vector<7x128xf32> -> vector<8x128xf32>
    %743 = arith.addf %742, %740 : vector<8x128xf32>
    %744 = vector.broadcast %738 : vector<1x128xf32> to vector<8x128xf32>
    %745 = arith.addf %743, %744 : vector<8x128xf32>
    %746 = vector.broadcast %376 : vector<1x128xf32> to vector<8x128xf32>
    %747 = arith.subf %745, %746 : vector<8x128xf32>
    %748 = math.exp %747 : vector<8x128xf32>
    %cst_241 = arith.constant dense<0.000000e+00> : vector<128xf32>
    %749 = vector.multi_reduction <add>, %748, %cst_241 [0] : vector<8x128xf32> to vector<128xf32>
    %750 = vector.shape_cast %749 : vector<128xf32> to vector<1x128xf32>
    %c5_242 = arith.constant 5 : index
    %c0_243 = arith.constant 0 : index
    %751 = vector.load %arg3[%c5_242, %c0_243] : memref<16x128xf32, #tpu.memory_space<vmem>>, vector<1x128xf32>
    tpu.vector_store %arg3[%c5_242, %c0_243], %750 {strides = array<i32>} : memref<16x128xf32, #tpu.memory_space<vmem>>, vector<1x128xf32>,
    %c4_i32_244 = arith.constant 4 : i32
    %752 = vector.broadcast %c4_i32_244 : i32 to vector<1x1x128xi32>
    %753 = arith.subi %752, %724 : vector<1x1x128xi32>
    %754 = vector.broadcast %753 : vector<1x1x128xi32> to vector<1x8x128xi32>
    %755 = arith.cmpi eq, %1, %754 : vector<1x8x128xi32>
    %756 = vector.shape_cast %740 : vector<8x128xf32> to vector<1x8x128xf32>
    %cst_245 = arith.constant -1.000000e+30 : f32
    %757 = vector.broadcast %cst_245 : f32 to vector<1x8x128xf32>
    %758 = arith.select %755, %756, %757 : vector<1x8x128xi1>, vector<1x8x128xf32>
    %cst_246 = arith.constant dense<0xFF800000> : vector<1x128xf32>
    %759 = vector.multi_reduction <maximumf>, %758, %cst_246 [1] : vector<1x8x128xf32> to vector<1x128xf32>
    %760 = vector.shape_cast %759 : vector<1x128xf32> to vector<1x1x128xf32>
    %c1_i32_247 = arith.constant 1 : i32
    %761 = vector.broadcast %c1_i32_247 : i32 to vector<1x1x128xi32>
    %762 = arith.addi %753, %761 : vector<1x1x128xi32>
    %763 = vector.broadcast %762 : vector<1x1x128xi32> to vector<1x8x128xi32>
    %764 = arith.cmpi eq, %1, %763 : vector<1x8x128xi32>
    %765 = vector.shape_cast %740 : vector<8x128xf32> to vector<1x8x128xf32>
    %cst_248 = arith.constant -1.000000e+30 : f32
    %766 = vector.broadcast %cst_248 : f32 to vector<1x8x128xf32>
    %767 = arith.select %764, %765, %766 : vector<1x8x128xi1>, vector<1x8x128xf32>
    %cst_249 = arith.constant dense<0xFF800000> : vector<1x128xf32>
    %768 = vector.multi_reduction <maximumf>, %767, %cst_249 [1] : vector<1x8x128xf32> to vector<1x128xf32>
    %769 = vector.shape_cast %768 : vector<1x128xf32> to vector<1x1x128xf32>
    %770 = vector.shape_cast %738 : vector<1x128xf32> to vector<1x1x128xf32>
    %771 = arith.addf %770, %769 : vector<1x1x128xf32>
    %772 = arith.maximumf %760, %771 : vector<1x1x128xf32>
    %773 = arith.subf %760, %771 : vector<1x1x128xf32>
    %774 = arith.cmpf one, %773, %773 : vector<1x1x128xf32>
    %775 = arith.addf %760, %771 : vector<1x1x128xf32>
    %776 = math.absf %773 : vector<1x1x128xf32>
    %cst_250 = arith.constant 0.000000e+00 : f32
    %777 = vector.broadcast %cst_250 : f32 to vector<1x1x128xf32>
    %778 = arith.subf %777, %776 : vector<1x1x128xf32>
    %779 = math.exp %778 : vector<1x1x128xf32>
    %780 = math.log1p %779 : vector<1x1x128xf32>
    %781 = arith.addf %772, %780 : vector<1x1x128xf32>
    %782 = arith.select %774, %775, %781 : vector<1x1x128xi1>, vector<1x1x128xf32>
    %783 = arith.subf %771, %782 : vector<1x1x128xf32>
    %784 = math.exp %783 : vector<1x1x128xf32>
    %c0_i32_251 = arith.constant 0 : i32
    %785 = vector.broadcast %c0_i32_251 : i32 to vector<1x1x128xi32>
    %786 = arith.cmpi sgt, %724, %785 : vector<1x1x128xi32>
    %cst_252 = arith.constant 0.000000e+00 : f32
    %787 = vector.broadcast %cst_252 : f32 to vector<1x1x128xf32>
    %788 = arith.select %786, %784, %787 : vector<1x1x128xi1>, vector<1x1x128xf32>
    %c0_253 = arith.constant 0 : index
    %c5_254 = arith.constant 5 : index
    %c0_255 = arith.constant 0 : index
    %789 = vector.load %arg2[%c0_253, %c5_254, %c0_255] : memref<1x16x128xf32, #tpu.memory_space<vmem>>, vector<1x1x128xf32>
    %790 = arith.cmpf olt, %789, %788 : vector<1x1x128xf32>
    %791 = arith.extui %790 : vector<1x1x128xi1> to vector<1x1x128xi32>
    %792 = arith.sitofp %791 : vector<1x1x128xi32> to vector<1x1x128xf32>
    %c0_256 = arith.constant 0 : index
    %c5_257 = arith.constant 5 : index
    %c0_258 = arith.constant 0 : index
    %793 = vector.load %arg4[%c0_256, %c5_257, %c0_258] : memref<1x16x128xf32, #tpu.memory_space<vmem>>, vector<1x1x128xf32>
    tpu.vector_store %arg4[%c0_256, %c5_257, %c0_258], %792 {strides = array<i32>} : memref<1x16x128xf32, #tpu.memory_space<vmem>>, vector<1x1x128xf32>,
    %794 = arith.fptosi %792 : vector<1x1x128xf32> to vector<1x1x128xi32>
    %795 = arith.subi %724, %794 : vector<1x1x128xi32>
    %796 = vector.broadcast %738 : vector<1x128xf32> to vector<8x128xf32>
    %797 = arith.addf %796, %742 : vector<8x128xf32>
    %798 = arith.maximumf %737, %797 : vector<8x128xf32>
    %799 = arith.subf %737, %797 : vector<8x128xf32>
    %800 = arith.cmpf one, %799, %799 : vector<8x128xf32>
    %801 = arith.addf %737, %797 : vector<8x128xf32>
    %802 = math.absf %799 : vector<8x128xf32>
    %cst_259 = arith.constant 0.000000e+00 : f32
    %803 = vector.broadcast %cst_259 : f32 to vector<8x128xf32>
    %804 = arith.subf %803, %802 : vector<8x128xf32>
    %805 = math.exp %804 : vector<8x128xf32>
    %806 = math.log1p %805 : vector<8x128xf32>
    %807 = arith.addf %798, %806 : vector<8x128xf32>
    %808 = arith.select %800, %801, %807 : vector<8x128xi1>, vector<8x128xf32>
    %c6_260 = arith.constant 6 : index
    %c0_261 = arith.constant 0 : index
    %809 = vector.load %arg1[%c6_260, %c0_261] : memref<16x128xf32, #tpu.memory_space<vmem>>, vector<1x128xf32>
    %c6_262 = arith.constant 6 : index
    %c0_263 = arith.constant 0 : index
    %c0_264 = arith.constant 0 : index
    %810 = vector.load %arg5[%c6_262, %c0_263, %c0_264] : memref<16x8x128xf32, #tpu.memory_space<vmem>>, vector<1x8x128xf32>
    %811 = vector.shape_cast %810 : vector<1x8x128xf32> to vector<8x128xf32>
    %812 = vector.extract_strided_slice %808 {offsets = [0, 0], sizes = [7, 128], strides = [1, 1]} : vector<8x128xf32> to vector<7x128xf32>
    %813 = tpu.concatenate %2, %812 in 0 : vector<1x128xf32>, vector<7x128xf32> -> vector<8x128xf32>
    %814 = arith.addf %813, %811 : vector<8x128xf32>
    %815 = vector.broadcast %809 : vector<1x128xf32> to vector<8x128xf32>
    %816 = arith.addf %814, %815 : vector<8x128xf32>
    %817 = vector.broadcast %376 : vector<1x128xf32> to vector<8x128xf32>
    %818 = arith.subf %816, %817 : vector<8x128xf32>
    %819 = math.exp %818 : vector<8x128xf32>
    %cst_265 = arith.constant dense<0.000000e+00> : vector<128xf32>
    %820 = vector.multi_reduction <add>, %819, %cst_265 [0] : vector<8x128xf32> to vector<128xf32>
    %821 = vector.shape_cast %820 : vector<128xf32> to vector<1x128xf32>
    %c6_266 = arith.constant 6 : index
    %c0_267 = arith.constant 0 : index
    %822 = vector.load %arg3[%c6_266, %c0_267] : memref<16x128xf32, #tpu.memory_space<vmem>>, vector<1x128xf32>
    tpu.vector_store %arg3[%c6_266, %c0_267], %821 {strides = array<i32>} : memref<16x128xf32, #tpu.memory_space<vmem>>, vector<1x128xf32>,
    %c4_i32_268 = arith.constant 4 : i32
    %823 = vector.broadcast %c4_i32_268 : i32 to vector<1x1x128xi32>
    %824 = arith.subi %823, %795 : vector<1x1x128xi32>
    %825 = vector.broadcast %824 : vector<1x1x128xi32> to vector<1x8x128xi32>
    %826 = arith.cmpi eq, %1, %825 : vector<1x8x128xi32>
    %827 = vector.shape_cast %811 : vector<8x128xf32> to vector<1x8x128xf32>
    %cst_269 = arith.constant -1.000000e+30 : f32
    %828 = vector.broadcast %cst_269 : f32 to vector<1x8x128xf32>
    %829 = arith.select %826, %827, %828 : vector<1x8x128xi1>, vector<1x8x128xf32>
    %cst_270 = arith.constant dense<0xFF800000> : vector<1x128xf32>
    %830 = vector.multi_reduction <maximumf>, %829, %cst_270 [1] : vector<1x8x128xf32> to vector<1x128xf32>
    %831 = vector.shape_cast %830 : vector<1x128xf32> to vector<1x1x128xf32>
    %c1_i32_271 = arith.constant 1 : i32
    %832 = vector.broadcast %c1_i32_271 : i32 to vector<1x1x128xi32>
    %833 = arith.addi %824, %832 : vector<1x1x128xi32>
    %834 = vector.broadcast %833 : vector<1x1x128xi32> to vector<1x8x128xi32>
    %835 = arith.cmpi eq, %1, %834 : vector<1x8x128xi32>
    %836 = vector.shape_cast %811 : vector<8x128xf32> to vector<1x8x128xf32>
    %cst_272 = arith.constant -1.000000e+30 : f32
    %837 = vector.broadcast %cst_272 : f32 to vector<1x8x128xf32>
    %838 = arith.select %835, %836, %837 : vector<1x8x128xi1>, vector<1x8x128xf32>
    %cst_273 = arith.constant dense<0xFF800000> : vector<1x128xf32>
    %839 = vector.multi_reduction <maximumf>, %838, %cst_273 [1] : vector<1x8x128xf32> to vector<1x128xf32>
    %840 = vector.shape_cast %839 : vector<1x128xf32> to vector<1x1x128xf32>
    %841 = vector.shape_cast %809 : vector<1x128xf32> to vector<1x1x128xf32>
    %842 = arith.addf %841, %840 : vector<1x1x128xf32>
    %843 = arith.maximumf %831, %842 : vector<1x1x128xf32>
    %844 = arith.subf %831, %842 : vector<1x1x128xf32>
    %845 = arith.cmpf one, %844, %844 : vector<1x1x128xf32>
    %846 = arith.addf %831, %842 : vector<1x1x128xf32>
    %847 = math.absf %844 : vector<1x1x128xf32>
    %cst_274 = arith.constant 0.000000e+00 : f32
    %848 = vector.broadcast %cst_274 : f32 to vector<1x1x128xf32>
    %849 = arith.subf %848, %847 : vector<1x1x128xf32>
    %850 = math.exp %849 : vector<1x1x128xf32>
    %851 = math.log1p %850 : vector<1x1x128xf32>
    %852 = arith.addf %843, %851 : vector<1x1x128xf32>
    %853 = arith.select %845, %846, %852 : vector<1x1x128xi1>, vector<1x1x128xf32>
    %854 = arith.subf %842, %853 : vector<1x1x128xf32>
    %855 = math.exp %854 : vector<1x1x128xf32>
    %c0_i32_275 = arith.constant 0 : i32
    %856 = vector.broadcast %c0_i32_275 : i32 to vector<1x1x128xi32>
    %857 = arith.cmpi sgt, %795, %856 : vector<1x1x128xi32>
    %cst_276 = arith.constant 0.000000e+00 : f32
    %858 = vector.broadcast %cst_276 : f32 to vector<1x1x128xf32>
    %859 = arith.select %857, %855, %858 : vector<1x1x128xi1>, vector<1x1x128xf32>
    %c0_277 = arith.constant 0 : index
    %c6_278 = arith.constant 6 : index
    %c0_279 = arith.constant 0 : index
    %860 = vector.load %arg2[%c0_277, %c6_278, %c0_279] : memref<1x16x128xf32, #tpu.memory_space<vmem>>, vector<1x1x128xf32>
    %861 = arith.cmpf olt, %860, %859 : vector<1x1x128xf32>
    %862 = arith.extui %861 : vector<1x1x128xi1> to vector<1x1x128xi32>
    %863 = arith.sitofp %862 : vector<1x1x128xi32> to vector<1x1x128xf32>
    %c0_280 = arith.constant 0 : index
    %c6_281 = arith.constant 6 : index
    %c0_282 = arith.constant 0 : index
    %864 = vector.load %arg4[%c0_280, %c6_281, %c0_282] : memref<1x16x128xf32, #tpu.memory_space<vmem>>, vector<1x1x128xf32>
    tpu.vector_store %arg4[%c0_280, %c6_281, %c0_282], %863 {strides = array<i32>} : memref<1x16x128xf32, #tpu.memory_space<vmem>>, vector<1x1x128xf32>,
    %865 = arith.fptosi %863 : vector<1x1x128xf32> to vector<1x1x128xi32>
    %866 = arith.subi %795, %865 : vector<1x1x128xi32>
    %867 = vector.broadcast %809 : vector<1x128xf32> to vector<8x128xf32>
    %868 = arith.addf %867, %813 : vector<8x128xf32>
    %869 = arith.maximumf %808, %868 : vector<8x128xf32>
    %870 = arith.subf %808, %868 : vector<8x128xf32>
    %871 = arith.cmpf one, %870, %870 : vector<8x128xf32>
    %872 = arith.addf %808, %868 : vector<8x128xf32>
    %873 = math.absf %870 : vector<8x128xf32>
    %cst_283 = arith.constant 0.000000e+00 : f32
    %874 = vector.broadcast %cst_283 : f32 to vector<8x128xf32>
    %875 = arith.subf %874, %873 : vector<8x128xf32>
    %876 = math.exp %875 : vector<8x128xf32>
    %877 = math.log1p %876 : vector<8x128xf32>
    %878 = arith.addf %869, %877 : vector<8x128xf32>
    %879 = arith.select %871, %872, %878 : vector<8x128xi1>, vector<8x128xf32>
    %c7_284 = arith.constant 7 : index
    %c0_285 = arith.constant 0 : index
    %880 = vector.load %arg1[%c7_284, %c0_285] : memref<16x128xf32, #tpu.memory_space<vmem>>, vector<1x128xf32>
    %c7_286 = arith.constant 7 : index
    %c0_287 = arith.constant 0 : index
    %c0_288 = arith.constant 0 : index
    %881 = vector.load %arg5[%c7_286, %c0_287, %c0_288] : memref<16x8x128xf32, #tpu.memory_space<vmem>>, vector<1x8x128xf32>
    %882 = vector.shape_cast %881 : vector<1x8x128xf32> to vector<8x128xf32>
    %883 = vector.extract_strided_slice %879 {offsets = [0, 0], sizes = [7, 128], strides = [1, 1]} : vector<8x128xf32> to vector<7x128xf32>
    %884 = tpu.concatenate %2, %883 in 0 : vector<1x128xf32>, vector<7x128xf32> -> vector<8x128xf32>
    %885 = arith.addf %884, %882 : vector<8x128xf32>
    %886 = vector.broadcast %880 : vector<1x128xf32> to vector<8x128xf32>
    %887 = arith.addf %885, %886 : vector<8x128xf32>
    %888 = vector.broadcast %376 : vector<1x128xf32> to vector<8x128xf32>
    %889 = arith.subf %887, %888 : vector<8x128xf32>
    %890 = math.exp %889 : vector<8x128xf32>
    %cst_289 = arith.constant dense<0.000000e+00> : vector<128xf32>
    %891 = vector.multi_reduction <add>, %890, %cst_289 [0] : vector<8x128xf32> to vector<128xf32>
    %892 = vector.shape_cast %891 : vector<128xf32> to vector<1x128xf32>
    %c7_290 = arith.constant 7 : index
    %c0_291 = arith.constant 0 : index
    %893 = vector.load %arg3[%c7_290, %c0_291] : memref<16x128xf32, #tpu.memory_space<vmem>>, vector<1x128xf32>
    tpu.vector_store %arg3[%c7_290, %c0_291], %892 {strides = array<i32>} : memref<16x128xf32, #tpu.memory_space<vmem>>, vector<1x128xf32>,
    %c4_i32_292 = arith.constant 4 : i32
    %894 = vector.broadcast %c4_i32_292 : i32 to vector<1x1x128xi32>
    %895 = arith.subi %894, %866 : vector<1x1x128xi32>
    %896 = vector.broadcast %895 : vector<1x1x128xi32> to vector<1x8x128xi32>
    %897 = arith.cmpi eq, %1, %896 : vector<1x8x128xi32>
    %898 = vector.shape_cast %882 : vector<8x128xf32> to vector<1x8x128xf32>
    %cst_293 = arith.constant -1.000000e+30 : f32
    %899 = vector.broadcast %cst_293 : f32 to vector<1x8x128xf32>
    %900 = arith.select %897, %898, %899 : vector<1x8x128xi1>, vector<1x8x128xf32>
    %cst_294 = arith.constant dense<0xFF800000> : vector<1x128xf32>
    %901 = vector.multi_reduction <maximumf>, %900, %cst_294 [1] : vector<1x8x128xf32> to vector<1x128xf32>
    %902 = vector.shape_cast %901 : vector<1x128xf32> to vector<1x1x128xf32>
    %c1_i32_295 = arith.constant 1 : i32
    %903 = vector.broadcast %c1_i32_295 : i32 to vector<1x1x128xi32>
    %904 = arith.addi %895, %903 : vector<1x1x128xi32>
    %905 = vector.broadcast %904 : vector<1x1x128xi32> to vector<1x8x128xi32>
    %906 = arith.cmpi eq, %1, %905 : vector<1x8x128xi32>
    %907 = vector.shape_cast %882 : vector<8x128xf32> to vector<1x8x128xf32>
    %cst_296 = arith.constant -1.000000e+30 : f32
    %908 = vector.broadcast %cst_296 : f32 to vector<1x8x128xf32>
    %909 = arith.select %906, %907, %908 : vector<1x8x128xi1>, vector<1x8x128xf32>
    %cst_297 = arith.constant dense<0xFF800000> : vector<1x128xf32>
    %910 = vector.multi_reduction <maximumf>, %909, %cst_297 [1] : vector<1x8x128xf32> to vector<1x128xf32>
    %911 = vector.shape_cast %910 : vector<1x128xf32> to vector<1x1x128xf32>
    %912 = vector.shape_cast %880 : vector<1x128xf32> to vector<1x1x128xf32>
    %913 = arith.addf %912, %911 : vector<1x1x128xf32>
    %914 = arith.maximumf %902, %913 : vector<1x1x128xf32>
    %915 = arith.subf %902, %913 : vector<1x1x128xf32>
    %916 = arith.cmpf one, %915, %915 : vector<1x1x128xf32>
    %917 = arith.addf %902, %913 : vector<1x1x128xf32>
    %918 = math.absf %915 : vector<1x1x128xf32>
    %cst_298 = arith.constant 0.000000e+00 : f32
    %919 = vector.broadcast %cst_298 : f32 to vector<1x1x128xf32>
    %920 = arith.subf %919, %918 : vector<1x1x128xf32>
    %921 = math.exp %920 : vector<1x1x128xf32>
    %922 = math.log1p %921 : vector<1x1x128xf32>
    %923 = arith.addf %914, %922 : vector<1x1x128xf32>
    %924 = arith.select %916, %917, %923 : vector<1x1x128xi1>, vector<1x1x128xf32>
    %925 = arith.subf %913, %924 : vector<1x1x128xf32>
    %926 = math.exp %925 : vector<1x1x128xf32>
    %c0_i32_299 = arith.constant 0 : i32
    %927 = vector.broadcast %c0_i32_299 : i32 to vector<1x1x128xi32>
    %928 = arith.cmpi sgt, %866, %927 : vector<1x1x128xi32>
    %cst_300 = arith.constant 0.000000e+00 : f32
    %929 = vector.broadcast %cst_300 : f32 to vector<1x1x128xf32>
    %930 = arith.select %928, %926, %929 : vector<1x1x128xi1>, vector<1x1x128xf32>
    %c0_301 = arith.constant 0 : index
    %c7_302 = arith.constant 7 : index
    %c0_303 = arith.constant 0 : index
    %931 = vector.load %arg2[%c0_301, %c7_302, %c0_303] : memref<1x16x128xf32, #tpu.memory_space<vmem>>, vector<1x1x128xf32>
    %932 = arith.cmpf olt, %931, %930 : vector<1x1x128xf32>
    %933 = arith.extui %932 : vector<1x1x128xi1> to vector<1x1x128xi32>
    %934 = arith.sitofp %933 : vector<1x1x128xi32> to vector<1x1x128xf32>
    %c0_304 = arith.constant 0 : index
    %c7_305 = arith.constant 7 : index
    %c0_306 = arith.constant 0 : index
    %935 = vector.load %arg4[%c0_304, %c7_305, %c0_306] : memref<1x16x128xf32, #tpu.memory_space<vmem>>, vector<1x1x128xf32>
    tpu.vector_store %arg4[%c0_304, %c7_305, %c0_306], %934 {strides = array<i32>} : memref<1x16x128xf32, #tpu.memory_space<vmem>>, vector<1x1x128xf32>,
    %936 = arith.fptosi %934 : vector<1x1x128xf32> to vector<1x1x128xi32>
    %937 = arith.subi %866, %936 : vector<1x1x128xi32>
    %938 = vector.broadcast %880 : vector<1x128xf32> to vector<8x128xf32>
    %939 = arith.addf %938, %884 : vector<8x128xf32>
    %940 = arith.maximumf %879, %939 : vector<8x128xf32>
    %941 = arith.subf %879, %939 : vector<8x128xf32>
    %942 = arith.cmpf one, %941, %941 : vector<8x128xf32>
    %943 = arith.addf %879, %939 : vector<8x128xf32>
    %944 = math.absf %941 : vector<8x128xf32>
    %cst_307 = arith.constant 0.000000e+00 : f32
    %945 = vector.broadcast %cst_307 : f32 to vector<8x128xf32>
    %946 = arith.subf %945, %944 : vector<8x128xf32>
    %947 = math.exp %946 : vector<8x128xf32>
    %948 = math.log1p %947 : vector<8x128xf32>
    %949 = arith.addf %940, %948 : vector<8x128xf32>
    %950 = arith.select %942, %943, %949 : vector<8x128xi1>, vector<8x128xf32>
    %c8_308 = arith.constant 8 : index
    %c0_309 = arith.constant 0 : index
    %951 = vector.load %arg1[%c8_308, %c0_309] : memref<16x128xf32, #tpu.memory_space<vmem>>, vector<1x128xf32>
    %c8_310 = arith.constant 8 : index
    %c0_311 = arith.constant 0 : index
    %c0_312 = arith.constant 0 : index
    %952 = vector.load %arg5[%c8_310, %c0_311, %c0_312] : memref<16x8x128xf32, #tpu.memory_space<vmem>>, vector<1x8x128xf32>
    %953 = vector.shape_cast %952 : vector<1x8x128xf32> to vector<8x128xf32>
    %954 = vector.extract_strided_slice %950 {offsets = [0, 0], sizes = [7, 128], strides = [1, 1]} : vector<8x128xf32> to vector<7x128xf32>
    %955 = tpu.concatenate %2, %954 in 0 : vector<1x128xf32>, vector<7x128xf32> -> vector<8x128xf32>
    %956 = arith.addf %955, %953 : vector<8x128xf32>
    %957 = vector.broadcast %951 : vector<1x128xf32> to vector<8x128xf32>
    %958 = arith.addf %956, %957 : vector<8x128xf32>
    %959 = vector.broadcast %376 : vector<1x128xf32> to vector<8x128xf32>
    %960 = arith.subf %958, %959 : vector<8x128xf32>
    %961 = math.exp %960 : vector<8x128xf32>
    %cst_313 = arith.constant dense<0.000000e+00> : vector<128xf32>
    %962 = vector.multi_reduction <add>, %961, %cst_313 [0] : vector<8x128xf32> to vector<128xf32>
    %963 = vector.shape_cast %962 : vector<128xf32> to vector<1x128xf32>
    %c8_314 = arith.constant 8 : index
    %c0_315 = arith.constant 0 : index
    %964 = vector.load %arg3[%c8_314, %c0_315] : memref<16x128xf32, #tpu.memory_space<vmem>>, vector<1x128xf32>
    tpu.vector_store %arg3[%c8_314, %c0_315], %963 {strides = array<i32>} : memref<16x128xf32, #tpu.memory_space<vmem>>, vector<1x128xf32>,
    %c4_i32_316 = arith.constant 4 : i32
    %965 = vector.broadcast %c4_i32_316 : i32 to vector<1x1x128xi32>
    %966 = arith.subi %965, %937 : vector<1x1x128xi32>
    %967 = vector.broadcast %966 : vector<1x1x128xi32> to vector<1x8x128xi32>
    %968 = arith.cmpi eq, %1, %967 : vector<1x8x128xi32>
    %969 = vector.shape_cast %953 : vector<8x128xf32> to vector<1x8x128xf32>
    %cst_317 = arith.constant -1.000000e+30 : f32
    %970 = vector.broadcast %cst_317 : f32 to vector<1x8x128xf32>
    %971 = arith.select %968, %969, %970 : vector<1x8x128xi1>, vector<1x8x128xf32>
    %cst_318 = arith.constant dense<0xFF800000> : vector<1x128xf32>
    %972 = vector.multi_reduction <maximumf>, %971, %cst_318 [1] : vector<1x8x128xf32> to vector<1x128xf32>
    %973 = vector.shape_cast %972 : vector<1x128xf32> to vector<1x1x128xf32>
    %c1_i32_319 = arith.constant 1 : i32
    %974 = vector.broadcast %c1_i32_319 : i32 to vector<1x1x128xi32>
    %975 = arith.addi %966, %974 : vector<1x1x128xi32>
    %976 = vector.broadcast %975 : vector<1x1x128xi32> to vector<1x8x128xi32>
    %977 = arith.cmpi eq, %1, %976 : vector<1x8x128xi32>
    %978 = vector.shape_cast %953 : vector<8x128xf32> to vector<1x8x128xf32>
    %cst_320 = arith.constant -1.000000e+30 : f32
    %979 = vector.broadcast %cst_320 : f32 to vector<1x8x128xf32>
    %980 = arith.select %977, %978, %979 : vector<1x8x128xi1>, vector<1x8x128xf32>
    %cst_321 = arith.constant dense<0xFF800000> : vector<1x128xf32>
    %981 = vector.multi_reduction <maximumf>, %980, %cst_321 [1] : vector<1x8x128xf32> to vector<1x128xf32>
    %982 = vector.shape_cast %981 : vector<1x128xf32> to vector<1x1x128xf32>
    %983 = vector.shape_cast %951 : vector<1x128xf32> to vector<1x1x128xf32>
    %984 = arith.addf %983, %982 : vector<1x1x128xf32>
    %985 = arith.maximumf %973, %984 : vector<1x1x128xf32>
    %986 = arith.subf %973, %984 : vector<1x1x128xf32>
    %987 = arith.cmpf one, %986, %986 : vector<1x1x128xf32>
    %988 = arith.addf %973, %984 : vector<1x1x128xf32>
    %989 = math.absf %986 : vector<1x1x128xf32>
    %cst_322 = arith.constant 0.000000e+00 : f32
    %990 = vector.broadcast %cst_322 : f32 to vector<1x1x128xf32>
    %991 = arith.subf %990, %989 : vector<1x1x128xf32>
    %992 = math.exp %991 : vector<1x1x128xf32>
    %993 = math.log1p %992 : vector<1x1x128xf32>
    %994 = arith.addf %985, %993 : vector<1x1x128xf32>
    %995 = arith.select %987, %988, %994 : vector<1x1x128xi1>, vector<1x1x128xf32>
    %996 = arith.subf %984, %995 : vector<1x1x128xf32>
    %997 = math.exp %996 : vector<1x1x128xf32>
    %c0_i32_323 = arith.constant 0 : i32
    %998 = vector.broadcast %c0_i32_323 : i32 to vector<1x1x128xi32>
    %999 = arith.cmpi sgt, %937, %998 : vector<1x1x128xi32>
    %cst_324 = arith.constant 0.000000e+00 : f32
    %1000 = vector.broadcast %cst_324 : f32 to vector<1x1x128xf32>
    %1001 = arith.select %999, %997, %1000 : vector<1x1x128xi1>, vector<1x1x128xf32>
    %c0_325 = arith.constant 0 : index
    %c8_326 = arith.constant 8 : index
    %c0_327 = arith.constant 0 : index
    %1002 = vector.load %arg2[%c0_325, %c8_326, %c0_327] : memref<1x16x128xf32, #tpu.memory_space<vmem>>, vector<1x1x128xf32>
    %1003 = arith.cmpf olt, %1002, %1001 : vector<1x1x128xf32>
    %1004 = arith.extui %1003 : vector<1x1x128xi1> to vector<1x1x128xi32>
    %1005 = arith.sitofp %1004 : vector<1x1x128xi32> to vector<1x1x128xf32>
    %c0_328 = arith.constant 0 : index
    %c8_329 = arith.constant 8 : index
    %c0_330 = arith.constant 0 : index
    %1006 = vector.load %arg4[%c0_328, %c8_329, %c0_330] : memref<1x16x128xf32, #tpu.memory_space<vmem>>, vector<1x1x128xf32>
    tpu.vector_store %arg4[%c0_328, %c8_329, %c0_330], %1005 {strides = array<i32>} : memref<1x16x128xf32, #tpu.memory_space<vmem>>, vector<1x1x128xf32>,
    %1007 = arith.fptosi %1005 : vector<1x1x128xf32> to vector<1x1x128xi32>
    %1008 = arith.subi %937, %1007 : vector<1x1x128xi32>
    %1009 = vector.broadcast %951 : vector<1x128xf32> to vector<8x128xf32>
    %1010 = arith.addf %1009, %955 : vector<8x128xf32>
    %1011 = arith.maximumf %950, %1010 : vector<8x128xf32>
    %1012 = arith.subf %950, %1010 : vector<8x128xf32>
    %1013 = arith.cmpf one, %1012, %1012 : vector<8x128xf32>
    %1014 = arith.addf %950, %1010 : vector<8x128xf32>
    %1015 = math.absf %1012 : vector<8x128xf32>
    %cst_331 = arith.constant 0.000000e+00 : f32
    %1016 = vector.broadcast %cst_331 : f32 to vector<8x128xf32>
    %1017 = arith.subf %1016, %1015 : vector<8x128xf32>
    %1018 = math.exp %1017 : vector<8x128xf32>
    %1019 = math.log1p %1018 : vector<8x128xf32>
    %1020 = arith.addf %1011, %1019 : vector<8x128xf32>
    %1021 = arith.select %1013, %1014, %1020 : vector<8x128xi1>, vector<8x128xf32>
    %c9_332 = arith.constant 9 : index
    %c0_333 = arith.constant 0 : index
    %1022 = vector.load %arg1[%c9_332, %c0_333] : memref<16x128xf32, #tpu.memory_space<vmem>>, vector<1x128xf32>
    %c9_334 = arith.constant 9 : index
    %c0_335 = arith.constant 0 : index
    %c0_336 = arith.constant 0 : index
    %1023 = vector.load %arg5[%c9_334, %c0_335, %c0_336] : memref<16x8x128xf32, #tpu.memory_space<vmem>>, vector<1x8x128xf32>
    %1024 = vector.shape_cast %1023 : vector<1x8x128xf32> to vector<8x128xf32>
    %1025 = vector.extract_strided_slice %1021 {offsets = [0, 0], sizes = [7, 128], strides = [1, 1]} : vector<8x128xf32> to vector<7x128xf32>
    %1026 = tpu.concatenate %2, %1025 in 0 : vector<1x128xf32>, vector<7x128xf32> -> vector<8x128xf32>
    %1027 = arith.addf %1026, %1024 : vector<8x128xf32>
    %1028 = vector.broadcast %1022 : vector<1x128xf32> to vector<8x128xf32>
    %1029 = arith.addf %1027, %1028 : vector<8x128xf32>
    %1030 = vector.broadcast %376 : vector<1x128xf32> to vector<8x128xf32>
    %1031 = arith.subf %1029, %1030 : vector<8x128xf32>
    %1032 = math.exp %1031 : vector<8x128xf32>
    %cst_337 = arith.constant dense<0.000000e+00> : vector<128xf32>
    %1033 = vector.multi_reduction <add>, %1032, %cst_337 [0] : vector<8x128xf32> to vector<128xf32>
    %1034 = vector.shape_cast %1033 : vector<128xf32> to vector<1x128xf32>
    %c9_338 = arith.constant 9 : index
    %c0_339 = arith.constant 0 : index
    %1035 = vector.load %arg3[%c9_338, %c0_339] : memref<16x128xf32, #tpu.memory_space<vmem>>, vector<1x128xf32>
    tpu.vector_store %arg3[%c9_338, %c0_339], %1034 {strides = array<i32>} : memref<16x128xf32, #tpu.memory_space<vmem>>, vector<1x128xf32>,
    %c4_i32_340 = arith.constant 4 : i32
    %1036 = vector.broadcast %c4_i32_340 : i32 to vector<1x1x128xi32>
    %1037 = arith.subi %1036, %1008 : vector<1x1x128xi32>
    %1038 = vector.broadcast %1037 : vector<1x1x128xi32> to vector<1x8x128xi32>
    %1039 = arith.cmpi eq, %1, %1038 : vector<1x8x128xi32>
    %1040 = vector.shape_cast %1024 : vector<8x128xf32> to vector<1x8x128xf32>
    %cst_341 = arith.constant -1.000000e+30 : f32
    %1041 = vector.broadcast %cst_341 : f32 to vector<1x8x128xf32>
    %1042 = arith.select %1039, %1040, %1041 : vector<1x8x128xi1>, vector<1x8x128xf32>
    %cst_342 = arith.constant dense<0xFF800000> : vector<1x128xf32>
    %1043 = vector.multi_reduction <maximumf>, %1042, %cst_342 [1] : vector<1x8x128xf32> to vector<1x128xf32>
    %1044 = vector.shape_cast %1043 : vector<1x128xf32> to vector<1x1x128xf32>
    %c1_i32_343 = arith.constant 1 : i32
    %1045 = vector.broadcast %c1_i32_343 : i32 to vector<1x1x128xi32>
    %1046 = arith.addi %1037, %1045 : vector<1x1x128xi32>
    %1047 = vector.broadcast %1046 : vector<1x1x128xi32> to vector<1x8x128xi32>
    %1048 = arith.cmpi eq, %1, %1047 : vector<1x8x128xi32>
    %1049 = vector.shape_cast %1024 : vector<8x128xf32> to vector<1x8x128xf32>
    %cst_344 = arith.constant -1.000000e+30 : f32
    %1050 = vector.broadcast %cst_344 : f32 to vector<1x8x128xf32>
    %1051 = arith.select %1048, %1049, %1050 : vector<1x8x128xi1>, vector<1x8x128xf32>
    %cst_345 = arith.constant dense<0xFF800000> : vector<1x128xf32>
    %1052 = vector.multi_reduction <maximumf>, %1051, %cst_345 [1] : vector<1x8x128xf32> to vector<1x128xf32>
    %1053 = vector.shape_cast %1052 : vector<1x128xf32> to vector<1x1x128xf32>
    %1054 = vector.shape_cast %1022 : vector<1x128xf32> to vector<1x1x128xf32>
    %1055 = arith.addf %1054, %1053 : vector<1x1x128xf32>
    %1056 = arith.maximumf %1044, %1055 : vector<1x1x128xf32>
    %1057 = arith.subf %1044, %1055 : vector<1x1x128xf32>
    %1058 = arith.cmpf one, %1057, %1057 : vector<1x1x128xf32>
    %1059 = arith.addf %1044, %1055 : vector<1x1x128xf32>
    %1060 = math.absf %1057 : vector<1x1x128xf32>
    %cst_346 = arith.constant 0.000000e+00 : f32
    %1061 = vector.broadcast %cst_346 : f32 to vector<1x1x128xf32>
    %1062 = arith.subf %1061, %1060 : vector<1x1x128xf32>
    %1063 = math.exp %1062 : vector<1x1x128xf32>
    %1064 = math.log1p %1063 : vector<1x1x128xf32>
    %1065 = arith.addf %1056, %1064 : vector<1x1x128xf32>
    %1066 = arith.select %1058, %1059, %1065 : vector<1x1x128xi1>, vector<1x1x128xf32>
    %1067 = arith.subf %1055, %1066 : vector<1x1x128xf32>
    %1068 = math.exp %1067 : vector<1x1x128xf32>
    %c0_i32_347 = arith.constant 0 : i32
    %1069 = vector.broadcast %c0_i32_347 : i32 to vector<1x1x128xi32>
    %1070 = arith.cmpi sgt, %1008, %1069 : vector<1x1x128xi32>
    %cst_348 = arith.constant 0.000000e+00 : f32
    %1071 = vector.broadcast %cst_348 : f32 to vector<1x1x128xf32>
    %1072 = arith.select %1070, %1068, %1071 : vector<1x1x128xi1>, vector<1x1x128xf32>
    %c0_349 = arith.constant 0 : index
    %c9_350 = arith.constant 9 : index
    %c0_351 = arith.constant 0 : index
    %1073 = vector.load %arg2[%c0_349, %c9_350, %c0_351] : memref<1x16x128xf32, #tpu.memory_space<vmem>>, vector<1x1x128xf32>
    %1074 = arith.cmpf olt, %1073, %1072 : vector<1x1x128xf32>
    %1075 = arith.extui %1074 : vector<1x1x128xi1> to vector<1x1x128xi32>
    %1076 = arith.sitofp %1075 : vector<1x1x128xi32> to vector<1x1x128xf32>
    %c0_352 = arith.constant 0 : index
    %c9_353 = arith.constant 9 : index
    %c0_354 = arith.constant 0 : index
    %1077 = vector.load %arg4[%c0_352, %c9_353, %c0_354] : memref<1x16x128xf32, #tpu.memory_space<vmem>>, vector<1x1x128xf32>
    tpu.vector_store %arg4[%c0_352, %c9_353, %c0_354], %1076 {strides = array<i32>} : memref<1x16x128xf32, #tpu.memory_space<vmem>>, vector<1x1x128xf32>,
    %1078 = arith.fptosi %1076 : vector<1x1x128xf32> to vector<1x1x128xi32>
    %1079 = arith.subi %1008, %1078 : vector<1x1x128xi32>
    %1080 = vector.broadcast %1022 : vector<1x128xf32> to vector<8x128xf32>
    %1081 = arith.addf %1080, %1026 : vector<8x128xf32>
    %1082 = arith.maximumf %1021, %1081 : vector<8x128xf32>
    %1083 = arith.subf %1021, %1081 : vector<8x128xf32>
    %1084 = arith.cmpf one, %1083, %1083 : vector<8x128xf32>
    %1085 = arith.addf %1021, %1081 : vector<8x128xf32>
    %1086 = math.absf %1083 : vector<8x128xf32>
    %cst_355 = arith.constant 0.000000e+00 : f32
    %1087 = vector.broadcast %cst_355 : f32 to vector<8x128xf32>
    %1088 = arith.subf %1087, %1086 : vector<8x128xf32>
    %1089 = math.exp %1088 : vector<8x128xf32>
    %1090 = math.log1p %1089 : vector<8x128xf32>
    %1091 = arith.addf %1082, %1090 : vector<8x128xf32>
    %1092 = arith.select %1084, %1085, %1091 : vector<8x128xi1>, vector<8x128xf32>
    %c10_356 = arith.constant 10 : index
    %c0_357 = arith.constant 0 : index
    %1093 = vector.load %arg1[%c10_356, %c0_357] : memref<16x128xf32, #tpu.memory_space<vmem>>, vector<1x128xf32>
    %c10_358 = arith.constant 10 : index
    %c0_359 = arith.constant 0 : index
    %c0_360 = arith.constant 0 : index
    %1094 = vector.load %arg5[%c10_358, %c0_359, %c0_360] : memref<16x8x128xf32, #tpu.memory_space<vmem>>, vector<1x8x128xf32>
    %1095 = vector.shape_cast %1094 : vector<1x8x128xf32> to vector<8x128xf32>
    %1096 = vector.extract_strided_slice %1092 {offsets = [0, 0], sizes = [7, 128], strides = [1, 1]} : vector<8x128xf32> to vector<7x128xf32>
    %1097 = tpu.concatenate %2, %1096 in 0 : vector<1x128xf32>, vector<7x128xf32> -> vector<8x128xf32>
    %1098 = arith.addf %1097, %1095 : vector<8x128xf32>
    %1099 = vector.broadcast %1093 : vector<1x128xf32> to vector<8x128xf32>
    %1100 = arith.addf %1098, %1099 : vector<8x128xf32>
    %1101 = vector.broadcast %376 : vector<1x128xf32> to vector<8x128xf32>
    %1102 = arith.subf %1100, %1101 : vector<8x128xf32>
    %1103 = math.exp %1102 : vector<8x128xf32>
    %cst_361 = arith.constant dense<0.000000e+00> : vector<128xf32>
    %1104 = vector.multi_reduction <add>, %1103, %cst_361 [0] : vector<8x128xf32> to vector<128xf32>
    %1105 = vector.shape_cast %1104 : vector<128xf32> to vector<1x128xf32>
    %c10_362 = arith.constant 10 : index
    %c0_363 = arith.constant 0 : index
    %1106 = vector.load %arg3[%c10_362, %c0_363] : memref<16x128xf32, #tpu.memory_space<vmem>>, vector<1x128xf32>
    tpu.vector_store %arg3[%c10_362, %c0_363], %1105 {strides = array<i32>} : memref<16x128xf32, #tpu.memory_space<vmem>>, vector<1x128xf32>,
    %c4_i32_364 = arith.constant 4 : i32
    %1107 = vector.broadcast %c4_i32_364 : i32 to vector<1x1x128xi32>
    %1108 = arith.subi %1107, %1079 : vector<1x1x128xi32>
    %1109 = vector.broadcast %1108 : vector<1x1x128xi32> to vector<1x8x128xi32>
    %1110 = arith.cmpi eq, %1, %1109 : vector<1x8x128xi32>
    %1111 = vector.shape_cast %1095 : vector<8x128xf32> to vector<1x8x128xf32>
    %cst_365 = arith.constant -1.000000e+30 : f32
    %1112 = vector.broadcast %cst_365 : f32 to vector<1x8x128xf32>
    %1113 = arith.select %1110, %1111, %1112 : vector<1x8x128xi1>, vector<1x8x128xf32>
    %cst_366 = arith.constant dense<0xFF800000> : vector<1x128xf32>
    %1114 = vector.multi_reduction <maximumf>, %1113, %cst_366 [1] : vector<1x8x128xf32> to vector<1x128xf32>
    %1115 = vector.shape_cast %1114 : vector<1x128xf32> to vector<1x1x128xf32>
    %c1_i32_367 = arith.constant 1 : i32
    %1116 = vector.broadcast %c1_i32_367 : i32 to vector<1x1x128xi32>
    %1117 = arith.addi %1108, %1116 : vector<1x1x128xi32>
    %1118 = vector.broadcast %1117 : vector<1x1x128xi32> to vector<1x8x128xi32>
    %1119 = arith.cmpi eq, %1, %1118 : vector<1x8x128xi32>
    %1120 = vector.shape_cast %1095 : vector<8x128xf32> to vector<1x8x128xf32>
    %cst_368 = arith.constant -1.000000e+30 : f32
    %1121 = vector.broadcast %cst_368 : f32 to vector<1x8x128xf32>
    %1122 = arith.select %1119, %1120, %1121 : vector<1x8x128xi1>, vector<1x8x128xf32>
    %cst_369 = arith.constant dense<0xFF800000> : vector<1x128xf32>
    %1123 = vector.multi_reduction <maximumf>, %1122, %cst_369 [1] : vector<1x8x128xf32> to vector<1x128xf32>
    %1124 = vector.shape_cast %1123 : vector<1x128xf32> to vector<1x1x128xf32>
    %1125 = vector.shape_cast %1093 : vector<1x128xf32> to vector<1x1x128xf32>
    %1126 = arith.addf %1125, %1124 : vector<1x1x128xf32>
    %1127 = arith.maximumf %1115, %1126 : vector<1x1x128xf32>
    %1128 = arith.subf %1115, %1126 : vector<1x1x128xf32>
    %1129 = arith.cmpf one, %1128, %1128 : vector<1x1x128xf32>
    %1130 = arith.addf %1115, %1126 : vector<1x1x128xf32>
    %1131 = math.absf %1128 : vector<1x1x128xf32>
    %cst_370 = arith.constant 0.000000e+00 : f32
    %1132 = vector.broadcast %cst_370 : f32 to vector<1x1x128xf32>
    %1133 = arith.subf %1132, %1131 : vector<1x1x128xf32>
    %1134 = math.exp %1133 : vector<1x1x128xf32>
    %1135 = math.log1p %1134 : vector<1x1x128xf32>
    %1136 = arith.addf %1127, %1135 : vector<1x1x128xf32>
    %1137 = arith.select %1129, %1130, %1136 : vector<1x1x128xi1>, vector<1x1x128xf32>
    %1138 = arith.subf %1126, %1137 : vector<1x1x128xf32>
    %1139 = math.exp %1138 : vector<1x1x128xf32>
    %c0_i32_371 = arith.constant 0 : i32
    %1140 = vector.broadcast %c0_i32_371 : i32 to vector<1x1x128xi32>
    %1141 = arith.cmpi sgt, %1079, %1140 : vector<1x1x128xi32>
    %cst_372 = arith.constant 0.000000e+00 : f32
    %1142 = vector.broadcast %cst_372 : f32 to vector<1x1x128xf32>
    %1143 = arith.select %1141, %1139, %1142 : vector<1x1x128xi1>, vector<1x1x128xf32>
    %c0_373 = arith.constant 0 : index
    %c10_374 = arith.constant 10 : index
    %c0_375 = arith.constant 0 : index
    %1144 = vector.load %arg2[%c0_373, %c10_374, %c0_375] : memref<1x16x128xf32, #tpu.memory_space<vmem>>, vector<1x1x128xf32>
    %1145 = arith.cmpf olt, %1144, %1143 : vector<1x1x128xf32>
    %1146 = arith.extui %1145 : vector<1x1x128xi1> to vector<1x1x128xi32>
    %1147 = arith.sitofp %1146 : vector<1x1x128xi32> to vector<1x1x128xf32>
    %c0_376 = arith.constant 0 : index
    %c10_377 = arith.constant 10 : index
    %c0_378 = arith.constant 0 : index
    %1148 = vector.load %arg4[%c0_376, %c10_377, %c0_378] : memref<1x16x128xf32, #tpu.memory_space<vmem>>, vector<1x1x128xf32>
    tpu.vector_store %arg4[%c0_376, %c10_377, %c0_378], %1147 {strides = array<i32>} : memref<1x16x128xf32, #tpu.memory_space<vmem>>, vector<1x1x128xf32>,
    %1149 = arith.fptosi %1147 : vector<1x1x128xf32> to vector<1x1x128xi32>
    %1150 = arith.subi %1079, %1149 : vector<1x1x128xi32>
    %1151 = vector.broadcast %1093 : vector<1x128xf32> to vector<8x128xf32>
    %1152 = arith.addf %1151, %1097 : vector<8x128xf32>
    %1153 = arith.maximumf %1092, %1152 : vector<8x128xf32>
    %1154 = arith.subf %1092, %1152 : vector<8x128xf32>
    %1155 = arith.cmpf one, %1154, %1154 : vector<8x128xf32>
    %1156 = arith.addf %1092, %1152 : vector<8x128xf32>
    %1157 = math.absf %1154 : vector<8x128xf32>
    %cst_379 = arith.constant 0.000000e+00 : f32
    %1158 = vector.broadcast %cst_379 : f32 to vector<8x128xf32>
    %1159 = arith.subf %1158, %1157 : vector<8x128xf32>
    %1160 = math.exp %1159 : vector<8x128xf32>
    %1161 = math.log1p %1160 : vector<8x128xf32>
    %1162 = arith.addf %1153, %1161 : vector<8x128xf32>
    %1163 = arith.select %1155, %1156, %1162 : vector<8x128xi1>, vector<8x128xf32>
    %c11_380 = arith.constant 11 : index
    %c0_381 = arith.constant 0 : index
    %1164 = vector.load %arg1[%c11_380, %c0_381] : memref<16x128xf32, #tpu.memory_space<vmem>>, vector<1x128xf32>
    %c11_382 = arith.constant 11 : index
    %c0_383 = arith.constant 0 : index
    %c0_384 = arith.constant 0 : index
    %1165 = vector.load %arg5[%c11_382, %c0_383, %c0_384] : memref<16x8x128xf32, #tpu.memory_space<vmem>>, vector<1x8x128xf32>
    %1166 = vector.shape_cast %1165 : vector<1x8x128xf32> to vector<8x128xf32>
    %1167 = vector.extract_strided_slice %1163 {offsets = [0, 0], sizes = [7, 128], strides = [1, 1]} : vector<8x128xf32> to vector<7x128xf32>
    %1168 = tpu.concatenate %2, %1167 in 0 : vector<1x128xf32>, vector<7x128xf32> -> vector<8x128xf32>
    %1169 = arith.addf %1168, %1166 : vector<8x128xf32>
    %1170 = vector.broadcast %1164 : vector<1x128xf32> to vector<8x128xf32>
    %1171 = arith.addf %1169, %1170 : vector<8x128xf32>
    %1172 = vector.broadcast %376 : vector<1x128xf32> to vector<8x128xf32>
    %1173 = arith.subf %1171, %1172 : vector<8x128xf32>
    %1174 = math.exp %1173 : vector<8x128xf32>
    %cst_385 = arith.constant dense<0.000000e+00> : vector<128xf32>
    %1175 = vector.multi_reduction <add>, %1174, %cst_385 [0] : vector<8x128xf32> to vector<128xf32>
    %1176 = vector.shape_cast %1175 : vector<128xf32> to vector<1x128xf32>
    %c11_386 = arith.constant 11 : index
    %c0_387 = arith.constant 0 : index
    %1177 = vector.load %arg3[%c11_386, %c0_387] : memref<16x128xf32, #tpu.memory_space<vmem>>, vector<1x128xf32>
    tpu.vector_store %arg3[%c11_386, %c0_387], %1176 {strides = array<i32>} : memref<16x128xf32, #tpu.memory_space<vmem>>, vector<1x128xf32>,
    %c4_i32_388 = arith.constant 4 : i32
    %1178 = vector.broadcast %c4_i32_388 : i32 to vector<1x1x128xi32>
    %1179 = arith.subi %1178, %1150 : vector<1x1x128xi32>
    %1180 = vector.broadcast %1179 : vector<1x1x128xi32> to vector<1x8x128xi32>
    %1181 = arith.cmpi eq, %1, %1180 : vector<1x8x128xi32>
    %1182 = vector.shape_cast %1166 : vector<8x128xf32> to vector<1x8x128xf32>
    %cst_389 = arith.constant -1.000000e+30 : f32
    %1183 = vector.broadcast %cst_389 : f32 to vector<1x8x128xf32>
    %1184 = arith.select %1181, %1182, %1183 : vector<1x8x128xi1>, vector<1x8x128xf32>
    %cst_390 = arith.constant dense<0xFF800000> : vector<1x128xf32>
    %1185 = vector.multi_reduction <maximumf>, %1184, %cst_390 [1] : vector<1x8x128xf32> to vector<1x128xf32>
    %1186 = vector.shape_cast %1185 : vector<1x128xf32> to vector<1x1x128xf32>
    %c1_i32_391 = arith.constant 1 : i32
    %1187 = vector.broadcast %c1_i32_391 : i32 to vector<1x1x128xi32>
    %1188 = arith.addi %1179, %1187 : vector<1x1x128xi32>
    %1189 = vector.broadcast %1188 : vector<1x1x128xi32> to vector<1x8x128xi32>
    %1190 = arith.cmpi eq, %1, %1189 : vector<1x8x128xi32>
    %1191 = vector.shape_cast %1166 : vector<8x128xf32> to vector<1x8x128xf32>
    %cst_392 = arith.constant -1.000000e+30 : f32
    %1192 = vector.broadcast %cst_392 : f32 to vector<1x8x128xf32>
    %1193 = arith.select %1190, %1191, %1192 : vector<1x8x128xi1>, vector<1x8x128xf32>
    %cst_393 = arith.constant dense<0xFF800000> : vector<1x128xf32>
    %1194 = vector.multi_reduction <maximumf>, %1193, %cst_393 [1] : vector<1x8x128xf32> to vector<1x128xf32>
    %1195 = vector.shape_cast %1194 : vector<1x128xf32> to vector<1x1x128xf32>
    %1196 = vector.shape_cast %1164 : vector<1x128xf32> to vector<1x1x128xf32>
    %1197 = arith.addf %1196, %1195 : vector<1x1x128xf32>
    %1198 = arith.maximumf %1186, %1197 : vector<1x1x128xf32>
    %1199 = arith.subf %1186, %1197 : vector<1x1x128xf32>
    %1200 = arith.cmpf one, %1199, %1199 : vector<1x1x128xf32>
    %1201 = arith.addf %1186, %1197 : vector<1x1x128xf32>
    %1202 = math.absf %1199 : vector<1x1x128xf32>
    %cst_394 = arith.constant 0.000000e+00 : f32
    %1203 = vector.broadcast %cst_394 : f32 to vector<1x1x128xf32>
    %1204 = arith.subf %1203, %1202 : vector<1x1x128xf32>
    %1205 = math.exp %1204 : vector<1x1x128xf32>
    %1206 = math.log1p %1205 : vector<1x1x128xf32>
    %1207 = arith.addf %1198, %1206 : vector<1x1x128xf32>
    %1208 = arith.select %1200, %1201, %1207 : vector<1x1x128xi1>, vector<1x1x128xf32>
    %1209 = arith.subf %1197, %1208 : vector<1x1x128xf32>
    %1210 = math.exp %1209 : vector<1x1x128xf32>
    %c0_i32_395 = arith.constant 0 : i32
    %1211 = vector.broadcast %c0_i32_395 : i32 to vector<1x1x128xi32>
    %1212 = arith.cmpi sgt, %1150, %1211 : vector<1x1x128xi32>
    %cst_396 = arith.constant 0.000000e+00 : f32
    %1213 = vector.broadcast %cst_396 : f32 to vector<1x1x128xf32>
    %1214 = arith.select %1212, %1210, %1213 : vector<1x1x128xi1>, vector<1x1x128xf32>
    %c0_397 = arith.constant 0 : index
    %c11_398 = arith.constant 11 : index
    %c0_399 = arith.constant 0 : index
    %1215 = vector.load %arg2[%c0_397, %c11_398, %c0_399] : memref<1x16x128xf32, #tpu.memory_space<vmem>>, vector<1x1x128xf32>
    %1216 = arith.cmpf olt, %1215, %1214 : vector<1x1x128xf32>
    %1217 = arith.extui %1216 : vector<1x1x128xi1> to vector<1x1x128xi32>
    %1218 = arith.sitofp %1217 : vector<1x1x128xi32> to vector<1x1x128xf32>
    %c0_400 = arith.constant 0 : index
    %c11_401 = arith.constant 11 : index
    %c0_402 = arith.constant 0 : index
    %1219 = vector.load %arg4[%c0_400, %c11_401, %c0_402] : memref<1x16x128xf32, #tpu.memory_space<vmem>>, vector<1x1x128xf32>
    tpu.vector_store %arg4[%c0_400, %c11_401, %c0_402], %1218 {strides = array<i32>} : memref<1x16x128xf32, #tpu.memory_space<vmem>>, vector<1x1x128xf32>,
    %1220 = arith.fptosi %1218 : vector<1x1x128xf32> to vector<1x1x128xi32>
    %1221 = arith.subi %1150, %1220 : vector<1x1x128xi32>
    %1222 = vector.broadcast %1164 : vector<1x128xf32> to vector<8x128xf32>
    %1223 = arith.addf %1222, %1168 : vector<8x128xf32>
    %1224 = arith.maximumf %1163, %1223 : vector<8x128xf32>
    %1225 = arith.subf %1163, %1223 : vector<8x128xf32>
    %1226 = arith.cmpf one, %1225, %1225 : vector<8x128xf32>
    %1227 = arith.addf %1163, %1223 : vector<8x128xf32>
    %1228 = math.absf %1225 : vector<8x128xf32>
    %cst_403 = arith.constant 0.000000e+00 : f32
    %1229 = vector.broadcast %cst_403 : f32 to vector<8x128xf32>
    %1230 = arith.subf %1229, %1228 : vector<8x128xf32>
    %1231 = math.exp %1230 : vector<8x128xf32>
    %1232 = math.log1p %1231 : vector<8x128xf32>
    %1233 = arith.addf %1224, %1232 : vector<8x128xf32>
    %1234 = arith.select %1226, %1227, %1233 : vector<8x128xi1>, vector<8x128xf32>
    %c12_404 = arith.constant 12 : index
    %c0_405 = arith.constant 0 : index
    %1235 = vector.load %arg1[%c12_404, %c0_405] : memref<16x128xf32, #tpu.memory_space<vmem>>, vector<1x128xf32>
    %c12_406 = arith.constant 12 : index
    %c0_407 = arith.constant 0 : index
    %c0_408 = arith.constant 0 : index
    %1236 = vector.load %arg5[%c12_406, %c0_407, %c0_408] : memref<16x8x128xf32, #tpu.memory_space<vmem>>, vector<1x8x128xf32>
    %1237 = vector.shape_cast %1236 : vector<1x8x128xf32> to vector<8x128xf32>
    %1238 = vector.extract_strided_slice %1234 {offsets = [0, 0], sizes = [7, 128], strides = [1, 1]} : vector<8x128xf32> to vector<7x128xf32>
    %1239 = tpu.concatenate %2, %1238 in 0 : vector<1x128xf32>, vector<7x128xf32> -> vector<8x128xf32>
    %1240 = arith.addf %1239, %1237 : vector<8x128xf32>
    %1241 = vector.broadcast %1235 : vector<1x128xf32> to vector<8x128xf32>
    %1242 = arith.addf %1240, %1241 : vector<8x128xf32>
    %1243 = vector.broadcast %376 : vector<1x128xf32> to vector<8x128xf32>
    %1244 = arith.subf %1242, %1243 : vector<8x128xf32>
    %1245 = math.exp %1244 : vector<8x128xf32>
    %cst_409 = arith.constant dense<0.000000e+00> : vector<128xf32>
    %1246 = vector.multi_reduction <add>, %1245, %cst_409 [0] : vector<8x128xf32> to vector<128xf32>
    %1247 = vector.shape_cast %1246 : vector<128xf32> to vector<1x128xf32>
    %c12_410 = arith.constant 12 : index
    %c0_411 = arith.constant 0 : index
    %1248 = vector.load %arg3[%c12_410, %c0_411] : memref<16x128xf32, #tpu.memory_space<vmem>>, vector<1x128xf32>
    tpu.vector_store %arg3[%c12_410, %c0_411], %1247 {strides = array<i32>} : memref<16x128xf32, #tpu.memory_space<vmem>>, vector<1x128xf32>,
    %c4_i32_412 = arith.constant 4 : i32
    %1249 = vector.broadcast %c4_i32_412 : i32 to vector<1x1x128xi32>
    %1250 = arith.subi %1249, %1221 : vector<1x1x128xi32>
    %1251 = vector.broadcast %1250 : vector<1x1x128xi32> to vector<1x8x128xi32>
    %1252 = arith.cmpi eq, %1, %1251 : vector<1x8x128xi32>
    %1253 = vector.shape_cast %1237 : vector<8x128xf32> to vector<1x8x128xf32>
    %cst_413 = arith.constant -1.000000e+30 : f32
    %1254 = vector.broadcast %cst_413 : f32 to vector<1x8x128xf32>
    %1255 = arith.select %1252, %1253, %1254 : vector<1x8x128xi1>, vector<1x8x128xf32>
    %cst_414 = arith.constant dense<0xFF800000> : vector<1x128xf32>
    %1256 = vector.multi_reduction <maximumf>, %1255, %cst_414 [1] : vector<1x8x128xf32> to vector<1x128xf32>
    %1257 = vector.shape_cast %1256 : vector<1x128xf32> to vector<1x1x128xf32>
    %c1_i32_415 = arith.constant 1 : i32
    %1258 = vector.broadcast %c1_i32_415 : i32 to vector<1x1x128xi32>
    %1259 = arith.addi %1250, %1258 : vector<1x1x128xi32>
    %1260 = vector.broadcast %1259 : vector<1x1x128xi32> to vector<1x8x128xi32>
    %1261 = arith.cmpi eq, %1, %1260 : vector<1x8x128xi32>
    %1262 = vector.shape_cast %1237 : vector<8x128xf32> to vector<1x8x128xf32>
    %cst_416 = arith.constant -1.000000e+30 : f32
    %1263 = vector.broadcast %cst_416 : f32 to vector<1x8x128xf32>
    %1264 = arith.select %1261, %1262, %1263 : vector<1x8x128xi1>, vector<1x8x128xf32>
    %cst_417 = arith.constant dense<0xFF800000> : vector<1x128xf32>
    %1265 = vector.multi_reduction <maximumf>, %1264, %cst_417 [1] : vector<1x8x128xf32> to vector<1x128xf32>
    %1266 = vector.shape_cast %1265 : vector<1x128xf32> to vector<1x1x128xf32>
    %1267 = vector.shape_cast %1235 : vector<1x128xf32> to vector<1x1x128xf32>
    %1268 = arith.addf %1267, %1266 : vector<1x1x128xf32>
    %1269 = arith.maximumf %1257, %1268 : vector<1x1x128xf32>
    %1270 = arith.subf %1257, %1268 : vector<1x1x128xf32>
    %1271 = arith.cmpf one, %1270, %1270 : vector<1x1x128xf32>
    %1272 = arith.addf %1257, %1268 : vector<1x1x128xf32>
    %1273 = math.absf %1270 : vector<1x1x128xf32>
    %cst_418 = arith.constant 0.000000e+00 : f32
    %1274 = vector.broadcast %cst_418 : f32 to vector<1x1x128xf32>
    %1275 = arith.subf %1274, %1273 : vector<1x1x128xf32>
    %1276 = math.exp %1275 : vector<1x1x128xf32>
    %1277 = math.log1p %1276 : vector<1x1x128xf32>
    %1278 = arith.addf %1269, %1277 : vector<1x1x128xf32>
    %1279 = arith.select %1271, %1272, %1278 : vector<1x1x128xi1>, vector<1x1x128xf32>
    %1280 = arith.subf %1268, %1279 : vector<1x1x128xf32>
    %1281 = math.exp %1280 : vector<1x1x128xf32>
    %c0_i32_419 = arith.constant 0 : i32
    %1282 = vector.broadcast %c0_i32_419 : i32 to vector<1x1x128xi32>
    %1283 = arith.cmpi sgt, %1221, %1282 : vector<1x1x128xi32>
    %cst_420 = arith.constant 0.000000e+00 : f32
    %1284 = vector.broadcast %cst_420 : f32 to vector<1x1x128xf32>
    %1285 = arith.select %1283, %1281, %1284 : vector<1x1x128xi1>, vector<1x1x128xf32>
    %c0_421 = arith.constant 0 : index
    %c12_422 = arith.constant 12 : index
    %c0_423 = arith.constant 0 : index
    %1286 = vector.load %arg2[%c0_421, %c12_422, %c0_423] : memref<1x16x128xf32, #tpu.memory_space<vmem>>, vector<1x1x128xf32>
    %1287 = arith.cmpf olt, %1286, %1285 : vector<1x1x128xf32>
    %1288 = arith.extui %1287 : vector<1x1x128xi1> to vector<1x1x128xi32>
    %1289 = arith.sitofp %1288 : vector<1x1x128xi32> to vector<1x1x128xf32>
    %c0_424 = arith.constant 0 : index
    %c12_425 = arith.constant 12 : index
    %c0_426 = arith.constant 0 : index
    %1290 = vector.load %arg4[%c0_424, %c12_425, %c0_426] : memref<1x16x128xf32, #tpu.memory_space<vmem>>, vector<1x1x128xf32>
    tpu.vector_store %arg4[%c0_424, %c12_425, %c0_426], %1289 {strides = array<i32>} : memref<1x16x128xf32, #tpu.memory_space<vmem>>, vector<1x1x128xf32>,
    %1291 = arith.fptosi %1289 : vector<1x1x128xf32> to vector<1x1x128xi32>
    %1292 = arith.subi %1221, %1291 : vector<1x1x128xi32>
    %1293 = vector.broadcast %1235 : vector<1x128xf32> to vector<8x128xf32>
    %1294 = arith.addf %1293, %1239 : vector<8x128xf32>
    %1295 = arith.maximumf %1234, %1294 : vector<8x128xf32>
    %1296 = arith.subf %1234, %1294 : vector<8x128xf32>
    %1297 = arith.cmpf one, %1296, %1296 : vector<8x128xf32>
    %1298 = arith.addf %1234, %1294 : vector<8x128xf32>
    %1299 = math.absf %1296 : vector<8x128xf32>
    %cst_427 = arith.constant 0.000000e+00 : f32
    %1300 = vector.broadcast %cst_427 : f32 to vector<8x128xf32>
    %1301 = arith.subf %1300, %1299 : vector<8x128xf32>
    %1302 = math.exp %1301 : vector<8x128xf32>
    %1303 = math.log1p %1302 : vector<8x128xf32>
    %1304 = arith.addf %1295, %1303 : vector<8x128xf32>
    %1305 = arith.select %1297, %1298, %1304 : vector<8x128xi1>, vector<8x128xf32>
    %c13_428 = arith.constant 13 : index
    %c0_429 = arith.constant 0 : index
    %1306 = vector.load %arg1[%c13_428, %c0_429] : memref<16x128xf32, #tpu.memory_space<vmem>>, vector<1x128xf32>
    %c13_430 = arith.constant 13 : index
    %c0_431 = arith.constant 0 : index
    %c0_432 = arith.constant 0 : index
    %1307 = vector.load %arg5[%c13_430, %c0_431, %c0_432] : memref<16x8x128xf32, #tpu.memory_space<vmem>>, vector<1x8x128xf32>
    %1308 = vector.shape_cast %1307 : vector<1x8x128xf32> to vector<8x128xf32>
    %1309 = vector.extract_strided_slice %1305 {offsets = [0, 0], sizes = [7, 128], strides = [1, 1]} : vector<8x128xf32> to vector<7x128xf32>
    %1310 = tpu.concatenate %2, %1309 in 0 : vector<1x128xf32>, vector<7x128xf32> -> vector<8x128xf32>
    %1311 = arith.addf %1310, %1308 : vector<8x128xf32>
    %1312 = vector.broadcast %1306 : vector<1x128xf32> to vector<8x128xf32>
    %1313 = arith.addf %1311, %1312 : vector<8x128xf32>
    %1314 = vector.broadcast %376 : vector<1x128xf32> to vector<8x128xf32>
    %1315 = arith.subf %1313, %1314 : vector<8x128xf32>
    %1316 = math.exp %1315 : vector<8x128xf32>
    %cst_433 = arith.constant dense<0.000000e+00> : vector<128xf32>
    %1317 = vector.multi_reduction <add>, %1316, %cst_433 [0] : vector<8x128xf32> to vector<128xf32>
    %1318 = vector.shape_cast %1317 : vector<128xf32> to vector<1x128xf32>
    %c13_434 = arith.constant 13 : index
    %c0_435 = arith.constant 0 : index
    %1319 = vector.load %arg3[%c13_434, %c0_435] : memref<16x128xf32, #tpu.memory_space<vmem>>, vector<1x128xf32>
    tpu.vector_store %arg3[%c13_434, %c0_435], %1318 {strides = array<i32>} : memref<16x128xf32, #tpu.memory_space<vmem>>, vector<1x128xf32>,
    %c4_i32_436 = arith.constant 4 : i32
    %1320 = vector.broadcast %c4_i32_436 : i32 to vector<1x1x128xi32>
    %1321 = arith.subi %1320, %1292 : vector<1x1x128xi32>
    %1322 = vector.broadcast %1321 : vector<1x1x128xi32> to vector<1x8x128xi32>
    %1323 = arith.cmpi eq, %1, %1322 : vector<1x8x128xi32>
    %1324 = vector.shape_cast %1308 : vector<8x128xf32> to vector<1x8x128xf32>
    %cst_437 = arith.constant -1.000000e+30 : f32
    %1325 = vector.broadcast %cst_437 : f32 to vector<1x8x128xf32>
    %1326 = arith.select %1323, %1324, %1325 : vector<1x8x128xi1>, vector<1x8x128xf32>
    %cst_438 = arith.constant dense<0xFF800000> : vector<1x128xf32>
    %1327 = vector.multi_reduction <maximumf>, %1326, %cst_438 [1] : vector<1x8x128xf32> to vector<1x128xf32>
    %1328 = vector.shape_cast %1327 : vector<1x128xf32> to vector<1x1x128xf32>
    %c1_i32_439 = arith.constant 1 : i32
    %1329 = vector.broadcast %c1_i32_439 : i32 to vector<1x1x128xi32>
    %1330 = arith.addi %1321, %1329 : vector<1x1x128xi32>
    %1331 = vector.broadcast %1330 : vector<1x1x128xi32> to vector<1x8x128xi32>
    %1332 = arith.cmpi eq, %1, %1331 : vector<1x8x128xi32>
    %1333 = vector.shape_cast %1308 : vector<8x128xf32> to vector<1x8x128xf32>
    %cst_440 = arith.constant -1.000000e+30 : f32
    %1334 = vector.broadcast %cst_440 : f32 to vector<1x8x128xf32>
    %1335 = arith.select %1332, %1333, %1334 : vector<1x8x128xi1>, vector<1x8x128xf32>
    %cst_441 = arith.constant dense<0xFF800000> : vector<1x128xf32>
    %1336 = vector.multi_reduction <maximumf>, %1335, %cst_441 [1] : vector<1x8x128xf32> to vector<1x128xf32>
    %1337 = vector.shape_cast %1336 : vector<1x128xf32> to vector<1x1x128xf32>
    %1338 = vector.shape_cast %1306 : vector<1x128xf32> to vector<1x1x128xf32>
    %1339 = arith.addf %1338, %1337 : vector<1x1x128xf32>
    %1340 = arith.maximumf %1328, %1339 : vector<1x1x128xf32>
    %1341 = arith.subf %1328, %1339 : vector<1x1x128xf32>
    %1342 = arith.cmpf one, %1341, %1341 : vector<1x1x128xf32>
    %1343 = arith.addf %1328, %1339 : vector<1x1x128xf32>
    %1344 = math.absf %1341 : vector<1x1x128xf32>
    %cst_442 = arith.constant 0.000000e+00 : f32
    %1345 = vector.broadcast %cst_442 : f32 to vector<1x1x128xf32>
    %1346 = arith.subf %1345, %1344 : vector<1x1x128xf32>
    %1347 = math.exp %1346 : vector<1x1x128xf32>
    %1348 = math.log1p %1347 : vector<1x1x128xf32>
    %1349 = arith.addf %1340, %1348 : vector<1x1x128xf32>
    %1350 = arith.select %1342, %1343, %1349 : vector<1x1x128xi1>, vector<1x1x128xf32>
    %1351 = arith.subf %1339, %1350 : vector<1x1x128xf32>
    %1352 = math.exp %1351 : vector<1x1x128xf32>
    %c0_i32_443 = arith.constant 0 : i32
    %1353 = vector.broadcast %c0_i32_443 : i32 to vector<1x1x128xi32>
    %1354 = arith.cmpi sgt, %1292, %1353 : vector<1x1x128xi32>
    %cst_444 = arith.constant 0.000000e+00 : f32
    %1355 = vector.broadcast %cst_444 : f32 to vector<1x1x128xf32>
    %1356 = arith.select %1354, %1352, %1355 : vector<1x1x128xi1>, vector<1x1x128xf32>
    %c0_445 = arith.constant 0 : index
    %c13_446 = arith.constant 13 : index
    %c0_447 = arith.constant 0 : index
    %1357 = vector.load %arg2[%c0_445, %c13_446, %c0_447] : memref<1x16x128xf32, #tpu.memory_space<vmem>>, vector<1x1x128xf32>
    %1358 = arith.cmpf olt, %1357, %1356 : vector<1x1x128xf32>
    %1359 = arith.extui %1358 : vector<1x1x128xi1> to vector<1x1x128xi32>
    %1360 = arith.sitofp %1359 : vector<1x1x128xi32> to vector<1x1x128xf32>
    %c0_448 = arith.constant 0 : index
    %c13_449 = arith.constant 13 : index
    %c0_450 = arith.constant 0 : index
    %1361 = vector.load %arg4[%c0_448, %c13_449, %c0_450] : memref<1x16x128xf32, #tpu.memory_space<vmem>>, vector<1x1x128xf32>
    tpu.vector_store %arg4[%c0_448, %c13_449, %c0_450], %1360 {strides = array<i32>} : memref<1x16x128xf32, #tpu.memory_space<vmem>>, vector<1x1x128xf32>,
    %1362 = arith.fptosi %1360 : vector<1x1x128xf32> to vector<1x1x128xi32>
    %1363 = arith.subi %1292, %1362 : vector<1x1x128xi32>
    %1364 = vector.broadcast %1306 : vector<1x128xf32> to vector<8x128xf32>
    %1365 = arith.addf %1364, %1310 : vector<8x128xf32>
    %1366 = arith.maximumf %1305, %1365 : vector<8x128xf32>
    %1367 = arith.subf %1305, %1365 : vector<8x128xf32>
    %1368 = arith.cmpf one, %1367, %1367 : vector<8x128xf32>
    %1369 = arith.addf %1305, %1365 : vector<8x128xf32>
    %1370 = math.absf %1367 : vector<8x128xf32>
    %cst_451 = arith.constant 0.000000e+00 : f32
    %1371 = vector.broadcast %cst_451 : f32 to vector<8x128xf32>
    %1372 = arith.subf %1371, %1370 : vector<8x128xf32>
    %1373 = math.exp %1372 : vector<8x128xf32>
    %1374 = math.log1p %1373 : vector<8x128xf32>
    %1375 = arith.addf %1366, %1374 : vector<8x128xf32>
    %1376 = arith.select %1368, %1369, %1375 : vector<8x128xi1>, vector<8x128xf32>
    %c14_452 = arith.constant 14 : index
    %c0_453 = arith.constant 0 : index
    %1377 = vector.load %arg1[%c14_452, %c0_453] : memref<16x128xf32, #tpu.memory_space<vmem>>, vector<1x128xf32>
    %c14_454 = arith.constant 14 : index
    %c0_455 = arith.constant 0 : index
    %c0_456 = arith.constant 0 : index
    %1378 = vector.load %arg5[%c14_454, %c0_455, %c0_456] : memref<16x8x128xf32, #tpu.memory_space<vmem>>, vector<1x8x128xf32>
    %1379 = vector.shape_cast %1378 : vector<1x8x128xf32> to vector<8x128xf32>
    %1380 = vector.extract_strided_slice %1376 {offsets = [0, 0], sizes = [7, 128], strides = [1, 1]} : vector<8x128xf32> to vector<7x128xf32>
    %1381 = tpu.concatenate %2, %1380 in 0 : vector<1x128xf32>, vector<7x128xf32> -> vector<8x128xf32>
    %1382 = arith.addf %1381, %1379 : vector<8x128xf32>
    %1383 = vector.broadcast %1377 : vector<1x128xf32> to vector<8x128xf32>
    %1384 = arith.addf %1382, %1383 : vector<8x128xf32>
    %1385 = vector.broadcast %376 : vector<1x128xf32> to vector<8x128xf32>
    %1386 = arith.subf %1384, %1385 : vector<8x128xf32>
    %1387 = math.exp %1386 : vector<8x128xf32>
    %cst_457 = arith.constant dense<0.000000e+00> : vector<128xf32>
    %1388 = vector.multi_reduction <add>, %1387, %cst_457 [0] : vector<8x128xf32> to vector<128xf32>
    %1389 = vector.shape_cast %1388 : vector<128xf32> to vector<1x128xf32>
    %c14_458 = arith.constant 14 : index
    %c0_459 = arith.constant 0 : index
    %1390 = vector.load %arg3[%c14_458, %c0_459] : memref<16x128xf32, #tpu.memory_space<vmem>>, vector<1x128xf32>
    tpu.vector_store %arg3[%c14_458, %c0_459], %1389 {strides = array<i32>} : memref<16x128xf32, #tpu.memory_space<vmem>>, vector<1x128xf32>,
    %c4_i32_460 = arith.constant 4 : i32
    %1391 = vector.broadcast %c4_i32_460 : i32 to vector<1x1x128xi32>
    %1392 = arith.subi %1391, %1363 : vector<1x1x128xi32>
    %1393 = vector.broadcast %1392 : vector<1x1x128xi32> to vector<1x8x128xi32>
    %1394 = arith.cmpi eq, %1, %1393 : vector<1x8x128xi32>
    %1395 = vector.shape_cast %1379 : vector<8x128xf32> to vector<1x8x128xf32>
    %cst_461 = arith.constant -1.000000e+30 : f32
    %1396 = vector.broadcast %cst_461 : f32 to vector<1x8x128xf32>
    %1397 = arith.select %1394, %1395, %1396 : vector<1x8x128xi1>, vector<1x8x128xf32>
    %cst_462 = arith.constant dense<0xFF800000> : vector<1x128xf32>
    %1398 = vector.multi_reduction <maximumf>, %1397, %cst_462 [1] : vector<1x8x128xf32> to vector<1x128xf32>
    %1399 = vector.shape_cast %1398 : vector<1x128xf32> to vector<1x1x128xf32>
    %c1_i32_463 = arith.constant 1 : i32
    %1400 = vector.broadcast %c1_i32_463 : i32 to vector<1x1x128xi32>
    %1401 = arith.addi %1392, %1400 : vector<1x1x128xi32>
    %1402 = vector.broadcast %1401 : vector<1x1x128xi32> to vector<1x8x128xi32>
    %1403 = arith.cmpi eq, %1, %1402 : vector<1x8x128xi32>
    %1404 = vector.shape_cast %1379 : vector<8x128xf32> to vector<1x8x128xf32>
    %cst_464 = arith.constant -1.000000e+30 : f32
    %1405 = vector.broadcast %cst_464 : f32 to vector<1x8x128xf32>
    %1406 = arith.select %1403, %1404, %1405 : vector<1x8x128xi1>, vector<1x8x128xf32>
    %cst_465 = arith.constant dense<0xFF800000> : vector<1x128xf32>
    %1407 = vector.multi_reduction <maximumf>, %1406, %cst_465 [1] : vector<1x8x128xf32> to vector<1x128xf32>
    %1408 = vector.shape_cast %1407 : vector<1x128xf32> to vector<1x1x128xf32>
    %1409 = vector.shape_cast %1377 : vector<1x128xf32> to vector<1x1x128xf32>
    %1410 = arith.addf %1409, %1408 : vector<1x1x128xf32>
    %1411 = arith.maximumf %1399, %1410 : vector<1x1x128xf32>
    %1412 = arith.subf %1399, %1410 : vector<1x1x128xf32>
    %1413 = arith.cmpf one, %1412, %1412 : vector<1x1x128xf32>
    %1414 = arith.addf %1399, %1410 : vector<1x1x128xf32>
    %1415 = math.absf %1412 : vector<1x1x128xf32>
    %cst_466 = arith.constant 0.000000e+00 : f32
    %1416 = vector.broadcast %cst_466 : f32 to vector<1x1x128xf32>
    %1417 = arith.subf %1416, %1415 : vector<1x1x128xf32>
    %1418 = math.exp %1417 : vector<1x1x128xf32>
    %1419 = math.log1p %1418 : vector<1x1x128xf32>
    %1420 = arith.addf %1411, %1419 : vector<1x1x128xf32>
    %1421 = arith.select %1413, %1414, %1420 : vector<1x1x128xi1>, vector<1x1x128xf32>
    %1422 = arith.subf %1410, %1421 : vector<1x1x128xf32>
    %1423 = math.exp %1422 : vector<1x1x128xf32>
    %c0_i32_467 = arith.constant 0 : i32
    %1424 = vector.broadcast %c0_i32_467 : i32 to vector<1x1x128xi32>
    %1425 = arith.cmpi sgt, %1363, %1424 : vector<1x1x128xi32>
    %cst_468 = arith.constant 0.000000e+00 : f32
    %1426 = vector.broadcast %cst_468 : f32 to vector<1x1x128xf32>
    %1427 = arith.select %1425, %1423, %1426 : vector<1x1x128xi1>, vector<1x1x128xf32>
    %c0_469 = arith.constant 0 : index
    %c14_470 = arith.constant 14 : index
    %c0_471 = arith.constant 0 : index
    %1428 = vector.load %arg2[%c0_469, %c14_470, %c0_471] : memref<1x16x128xf32, #tpu.memory_space<vmem>>, vector<1x1x128xf32>
    %1429 = arith.cmpf olt, %1428, %1427 : vector<1x1x128xf32>
    %1430 = arith.extui %1429 : vector<1x1x128xi1> to vector<1x1x128xi32>
    %1431 = arith.sitofp %1430 : vector<1x1x128xi32> to vector<1x1x128xf32>
    %c0_472 = arith.constant 0 : index
    %c14_473 = arith.constant 14 : index
    %c0_474 = arith.constant 0 : index
    %1432 = vector.load %arg4[%c0_472, %c14_473, %c0_474] : memref<1x16x128xf32, #tpu.memory_space<vmem>>, vector<1x1x128xf32>
    tpu.vector_store %arg4[%c0_472, %c14_473, %c0_474], %1431 {strides = array<i32>} : memref<1x16x128xf32, #tpu.memory_space<vmem>>, vector<1x1x128xf32>,
    %1433 = arith.fptosi %1431 : vector<1x1x128xf32> to vector<1x1x128xi32>
    %1434 = arith.subi %1363, %1433 : vector<1x1x128xi32>
    %1435 = vector.broadcast %1377 : vector<1x128xf32> to vector<8x128xf32>
    %1436 = arith.addf %1435, %1381 : vector<8x128xf32>
    %1437 = arith.maximumf %1376, %1436 : vector<8x128xf32>
    %1438 = arith.subf %1376, %1436 : vector<8x128xf32>
    %1439 = arith.cmpf one, %1438, %1438 : vector<8x128xf32>
    %1440 = arith.addf %1376, %1436 : vector<8x128xf32>
    %1441 = math.absf %1438 : vector<8x128xf32>
    %cst_475 = arith.constant 0.000000e+00 : f32
    %1442 = vector.broadcast %cst_475 : f32 to vector<8x128xf32>
    %1443 = arith.subf %1442, %1441 : vector<8x128xf32>
    %1444 = math.exp %1443 : vector<8x128xf32>
    %1445 = math.log1p %1444 : vector<8x128xf32>
    %1446 = arith.addf %1437, %1445 : vector<8x128xf32>
    %1447 = arith.select %1439, %1440, %1446 : vector<8x128xi1>, vector<8x128xf32>
    %c15_476 = arith.constant 15 : index
    %c0_477 = arith.constant 0 : index
    %1448 = vector.load %arg1[%c15_476, %c0_477] : memref<16x128xf32, #tpu.memory_space<vmem>>, vector<1x128xf32>
    %c15_478 = arith.constant 15 : index
    %c0_479 = arith.constant 0 : index
    %c0_480 = arith.constant 0 : index
    %1449 = vector.load %arg5[%c15_478, %c0_479, %c0_480] : memref<16x8x128xf32, #tpu.memory_space<vmem>>, vector<1x8x128xf32>
    %1450 = vector.shape_cast %1449 : vector<1x8x128xf32> to vector<8x128xf32>
    %1451 = vector.extract_strided_slice %1447 {offsets = [0, 0], sizes = [7, 128], strides = [1, 1]} : vector<8x128xf32> to vector<7x128xf32>
    %1452 = tpu.concatenate %2, %1451 in 0 : vector<1x128xf32>, vector<7x128xf32> -> vector<8x128xf32>
    %1453 = arith.addf %1452, %1450 : vector<8x128xf32>
    %1454 = vector.broadcast %1448 : vector<1x128xf32> to vector<8x128xf32>
    %1455 = arith.addf %1453, %1454 : vector<8x128xf32>
    %1456 = vector.broadcast %376 : vector<1x128xf32> to vector<8x128xf32>
    %1457 = arith.subf %1455, %1456 : vector<8x128xf32>
    %1458 = math.exp %1457 : vector<8x128xf32>
    %cst_481 = arith.constant dense<0.000000e+00> : vector<128xf32>
    %1459 = vector.multi_reduction <add>, %1458, %cst_481 [0] : vector<8x128xf32> to vector<128xf32>
    %1460 = vector.shape_cast %1459 : vector<128xf32> to vector<1x128xf32>
    %c15_482 = arith.constant 15 : index
    %c0_483 = arith.constant 0 : index
    %1461 = vector.load %arg3[%c15_482, %c0_483] : memref<16x128xf32, #tpu.memory_space<vmem>>, vector<1x128xf32>
    tpu.vector_store %arg3[%c15_482, %c0_483], %1460 {strides = array<i32>} : memref<16x128xf32, #tpu.memory_space<vmem>>, vector<1x128xf32>,
    %c4_i32_484 = arith.constant 4 : i32
    %1462 = vector.broadcast %c4_i32_484 : i32 to vector<1x1x128xi32>
    %1463 = arith.subi %1462, %1434 : vector<1x1x128xi32>
    %1464 = vector.broadcast %1463 : vector<1x1x128xi32> to vector<1x8x128xi32>
    %1465 = arith.cmpi eq, %1, %1464 : vector<1x8x128xi32>
    %1466 = vector.shape_cast %1450 : vector<8x128xf32> to vector<1x8x128xf32>
    %cst_485 = arith.constant -1.000000e+30 : f32
    %1467 = vector.broadcast %cst_485 : f32 to vector<1x8x128xf32>
    %1468 = arith.select %1465, %1466, %1467 : vector<1x8x128xi1>, vector<1x8x128xf32>
    %cst_486 = arith.constant dense<0xFF800000> : vector<1x128xf32>
    %1469 = vector.multi_reduction <maximumf>, %1468, %cst_486 [1] : vector<1x8x128xf32> to vector<1x128xf32>
    %1470 = vector.shape_cast %1469 : vector<1x128xf32> to vector<1x1x128xf32>
    %c1_i32_487 = arith.constant 1 : i32
    %1471 = vector.broadcast %c1_i32_487 : i32 to vector<1x1x128xi32>
    %1472 = arith.addi %1463, %1471 : vector<1x1x128xi32>
    %1473 = vector.broadcast %1472 : vector<1x1x128xi32> to vector<1x8x128xi32>
    %1474 = arith.cmpi eq, %1, %1473 : vector<1x8x128xi32>
    %1475 = vector.shape_cast %1450 : vector<8x128xf32> to vector<1x8x128xf32>
    %cst_488 = arith.constant -1.000000e+30 : f32
    %1476 = vector.broadcast %cst_488 : f32 to vector<1x8x128xf32>
    %1477 = arith.select %1474, %1475, %1476 : vector<1x8x128xi1>, vector<1x8x128xf32>
    %cst_489 = arith.constant dense<0xFF800000> : vector<1x128xf32>
    %1478 = vector.multi_reduction <maximumf>, %1477, %cst_489 [1] : vector<1x8x128xf32> to vector<1x128xf32>
    %1479 = vector.shape_cast %1478 : vector<1x128xf32> to vector<1x1x128xf32>
    %1480 = vector.shape_cast %1448 : vector<1x128xf32> to vector<1x1x128xf32>
    %1481 = arith.addf %1480, %1479 : vector<1x1x128xf32>
    %1482 = arith.maximumf %1470, %1481 : vector<1x1x128xf32>
    %1483 = arith.subf %1470, %1481 : vector<1x1x128xf32>
    %1484 = arith.cmpf one, %1483, %1483 : vector<1x1x128xf32>
    %1485 = arith.addf %1470, %1481 : vector<1x1x128xf32>
    %1486 = math.absf %1483 : vector<1x1x128xf32>
    %cst_490 = arith.constant 0.000000e+00 : f32
    %1487 = vector.broadcast %cst_490 : f32 to vector<1x1x128xf32>
    %1488 = arith.subf %1487, %1486 : vector<1x1x128xf32>
    %1489 = math.exp %1488 : vector<1x1x128xf32>
    %1490 = math.log1p %1489 : vector<1x1x128xf32>
    %1491 = arith.addf %1482, %1490 : vector<1x1x128xf32>
    %1492 = arith.select %1484, %1485, %1491 : vector<1x1x128xi1>, vector<1x1x128xf32>
    %1493 = arith.subf %1481, %1492 : vector<1x1x128xf32>
    %1494 = math.exp %1493 : vector<1x1x128xf32>
    %c0_i32_491 = arith.constant 0 : i32
    %1495 = vector.broadcast %c0_i32_491 : i32 to vector<1x1x128xi32>
    %1496 = arith.cmpi sgt, %1434, %1495 : vector<1x1x128xi32>
    %cst_492 = arith.constant 0.000000e+00 : f32
    %1497 = vector.broadcast %cst_492 : f32 to vector<1x1x128xf32>
    %1498 = arith.select %1496, %1494, %1497 : vector<1x1x128xi1>, vector<1x1x128xf32>
    %c0_493 = arith.constant 0 : index
    %c15_494 = arith.constant 15 : index
    %c0_495 = arith.constant 0 : index
    %1499 = vector.load %arg2[%c0_493, %c15_494, %c0_495] : memref<1x16x128xf32, #tpu.memory_space<vmem>>, vector<1x1x128xf32>
    %1500 = arith.cmpf olt, %1499, %1498 : vector<1x1x128xf32>
    %1501 = arith.extui %1500 : vector<1x1x128xi1> to vector<1x1x128xi32>
    %1502 = arith.sitofp %1501 : vector<1x1x128xi32> to vector<1x1x128xf32>
    %c0_496 = arith.constant 0 : index
    %c15_497 = arith.constant 15 : index
    %c0_498 = arith.constant 0 : index
    %1503 = vector.load %arg4[%c0_496, %c15_497, %c0_498] : memref<1x16x128xf32, #tpu.memory_space<vmem>>, vector<1x1x128xf32>
    tpu.vector_store %arg4[%c0_496, %c15_497, %c0_498], %1502 {strides = array<i32>} : memref<1x16x128xf32, #tpu.memory_space<vmem>>, vector<1x1x128xf32>,
    return
  }
  func.func @transform_0(%arg0: i32) -> (i32, i32) {
    %c0_i32 = arith.constant 0 : i32
    %c0_i32_0 = arith.constant 0 : i32
    return %c0_i32, %arg0 : i32, i32
  }
  func.func @transform_1(%arg0: i32) -> (i32, i32, i32) {
    %c0_i32 = arith.constant 0 : i32
    %c0_i32_0 = arith.constant 0 : i32
    %c0_i32_1 = arith.constant 0 : i32
    return %c0_i32, %c0_i32_0, %arg0 : i32, i32, i32
  }
  func.func @transform_2(%arg0: i32) -> (i32, i32) {
    %c0_i32 = arith.constant 0 : i32
    %c0_i32_0 = arith.constant 0 : i32
    return %c0_i32, %arg0 : i32, i32
  }
  func.func @transform_3(%arg0: i32) -> (i32, i32, i32) {
    %c0_i32 = arith.constant 0 : i32
    %c0_i32_0 = arith.constant 0 : i32
    %c0_i32_1 = arith.constant 0 : i32
    return %c0_i32, %c0_i32_0, %arg0 : i32, i32, i32
  }
}

</mosaic_0001>

<bundles_post_ra>
// kernel: tpu_custom_call.1
= control target key start
LH: loop header
LB: loop body
LE: loop exit
PB: predicated region body
PF: predicated region fallthrough
CT: control target
= control target key end

     0   :  { %9 = vsyncpa [#allocation4], 0  ;;  %s3286_s0 = inlined_call_operand.hbm [shape: f32[16,128], index: 0, kind: input, shape index: {}]   ;;  %s3287_s1 = inlined_call_operand.hbm [shape: f32[1,16,128], index: 1, kind: input, shape index: {}]   ;;  %s3288_s2 = inlined_call_operand.hbm [shape: f32[16,128], index: 2, kind: output, shape index: {0}]   ;;  %s3289_s3 = inlined_call_operand.hbm [shape: f32[1,16,128], index: 3, kind: output, shape index: {1}]  }
   0x1   :  { %10 = vsyncpa [#allocation7], 0 }
   0x2   :  { %11 = vsyncpa [#allocation5], 0 }
   0x3   :  { %12 = vsyncpa [#allocation10], 0  ;;  %s2570_s12 = smov [#allocation3]  }
   0x4   :  { %s18_s13 = sshll.u32 %s2570_s12, 4  ;;  %s19_s13 = int_to_ptr.vmem [resolvable:$true] %s18_s13 }
   0x5   :  { %s2490_s14 = scalar_lea.vmem %s19_s13, 256  ;;  %p2495_p1 = scmp.lt.s32.totalorder %s19_s13, %s19_s13 }
   0x6   :  { %p2491_p0 = scmp.ne.s32.totalorder %s19_s13, %s2490_s14  ;;  %p2496_p2 = scmp.lt.s32.totalorder %s2490_s14, %s2490_s14 }
   0x8   :  { %p2497_p3 = por %p2496_p2, %p2495_p1 }
   0xa   :  { %p2498_p4 = pnand %p2497_p3, %p2491_p0 }
   0xc   :  { %2501 = shalt.err (!%p2498_p4)
}
   0xd   :  { %s2571_s15 = smov 128   ;;  %s2572_s16 = smov 8  }
   0xe   :  { %24 = dma.hbm_to_vmem [thread:$0]  %s3286_s0, 256, %s19_s13, [#allocation4], %s2571_s15, %s2571_s15, %s2572_s16  }
   0xf   :  { %s2573_s19 = smov [#allocation6]  }
  0x10   :  { %s30_s20 = sshll.u32 %s2573_s19, 4  ;;  %s31_s20 = int_to_ptr.vmem [resolvable:$true] %s30_s20 }
  0x11   :  { %s2510_s21 = scalar_lea.vmem %s31_s20, 256  ;;  %p2515_p6 = scmp.lt.s32.totalorder %s31_s20, %s31_s20 }
  0x12   :  { %p2511_p5 = scmp.ne.s32.totalorder %s31_s20, %s2510_s21  ;;  %p2516_p7 = scmp.lt.s32.totalorder %s2510_s21, %s2510_s21 }
  0x14   :  { %p2517_p8 = por %p2516_p7, %p2515_p6 }
  0x16   :  { %p2518_p9 = pnand %p2517_p8, %p2511_p5 }
  0x18   :  { %2521 = shalt.err (!%p2518_p9)
}
  0x19   :  { %36 = dma.hbm_to_vmem [thread:$0]  %s3287_s1, 256, %s31_s20, [#allocation7], %s2571_s15, %s2571_s15, %s2572_s16  }
  0x1a   :  { %2562 = dma.done.wait [#allocation4], 256  }
  0x1b   :  { %2563 = vsyncadd [#allocation4], 4294967040 }
  0x1c   :  { %2564 = dma.done.wait [#allocation7], 256  }
  0x1d   :  { %2565 = vsyncadd [#allocation7], 4294967040  ;;  %v43_v0 = vlaneseq  ;;  %v2574_v2 = vmov -1e+30   ;;  %vm53_vm1 = vcmask 1046528   ;;  %s2576_s0 = smov [#allocation8]  }
  0x1e   :  { %v2161_v5 = vld [vmem:[#allocation3 + $0xf] ss:$0 sm:$0xff]  ;;  %v2162_v27 = vld [vmem:[#allocation3 + $0xe] ss:$0 sm:$0xff]  ;;  %v2163_v49 = vld [vmem:[#allocation3 + $0xd] ss:$0 sm:$0xff] }
  0x1f   :  { %v2610_v1 = vshrl.u32 %v43_v0, 7  ;;  %s2132_s1 = sshll.u32 %s2576_s0, 4  ;;  %s2133_s1 = int_to_ptr.vmem [resolvable:$true] %s2132_s1 }
  0x20   :  { %s2522_s24 = scalar_lea.vmem %s2133_s1, 256  ;;  %p2527_p11 = scmp.lt.s32.totalorder %s2133_s1, %s2133_s1 }
  0x21   :  { %vm45_vm0 = vcmp.eq.s32.totalorder %v2610_v1, 4  ;;  %vm55_vm2 = vcmp.ge.s32.totalorder %v2610_v1, 4  ;;  %p2523_p10 = scmp.ne.s32.totalorder %s2133_s1, %s2522_s24  ;;  %p2528_p12 = scmp.lt.s32.totalorder %s2522_s24, %s2522_s24 }
  0x22   :  { %v2614_v3 = vsel %vm45_vm0, 0.0, %v2574_v2 }
  0x23   :  { %v51_v4 = vrot.slane %v2614_v3, 1  ;;  %p2529_p13 = por %p2528_p12, %p2527_p11 }
  0x25   :  { %v54_v6 = vsel %vm53_vm1, %v51_v4, -1e+30  ;;  %p2530_p0 = pnand %p2529_p13, %p2523_p10 }
  0x26   :  { %v56_v7 = vsel %vm55_vm2, -1e+30, %v54_v6 }
  0x27   :  { %v61_v8 = vadd.f32 %v2161_v5, %v56_v7 }
  0x29   :  { %v63_v9 = vsub.f32 %v2614_v3, %v61_v8  ;;  %v62_v20 = vmax.f32 %v2614_v3, %v61_v8  ;;  %v65_v22 = vadd.f32 %v61_v8, %v2614_v3 }
  0x2b   :  { %v66_v10 = vand.u32 2147483647, %v63_v9  ;;  %vm64_vm4 = vcmp.ne.f32.partialorder %v63_v9, %v63_v9 }
  0x2d   :  { %v67_v11 = vsub.f32 0.0, %v66_v10  ;;  %v2164_v10 = vld [vmem:[#allocation3 + $0xc] ss:$0 sm:$0xff] }
  0x2f   :  { %v68_v12 = vmul.f32 1.442695, %v67_v11 }
  0x31   :  { %2230 = vpow2.f32 %v68_v12 }
  0x3e   :  { %v2231_v13 = vpop.eup %2230 }
  0x3f   :  { %v70_v14 = vadd.f32 1.0, %v2231_v13  ;;  %v73_v15 = vmul.f32 -0.5, %v2231_v13  ;;  %v76_v17 = vand.u32 2147483647, %v2231_v13 }
  0x41   :  { %2232 = vlog2.f32 %v70_v14  ;;  %v74_v16 = vadd.f32 1.0, %v73_v15  ;;  %vm77_vm3 = vcmp.lt.f32.partialorder %v76_v17, 0.0004427343 }
  0x43   :  { %v75_v18 = vmul.f32 %v2231_v13, %v74_v16 }
  0x4e   :  { %v2233_v19 = vpop.eup %2232 }
  0x4f   :  { %v72_v21 = vmul.f32 0.6931472, %v2233_v19 }
  0x51   :  { %v78_v23 = vsel %vm77_vm3, %v75_v18, %v72_v21 }
  0x52   :  { %v79_v24 = vadd.f32 %v78_v23, %v62_v20 }
  0x54   :  { %v2624_v25 = vsel %vm64_vm4, %v65_v22, %v79_v24 }
  0x55   :  { %v85_v26 = vrot.slane %v2624_v25, 1 }
  0x57   :  { %v87_v28 = vsel %vm53_vm1, %v85_v26, -1e+30 }
  0x58   :  { %v88_v29 = vsel %vm55_vm2, -1e+30, %v87_v28 }
  0x59   :  { %v93_v30 = vadd.f32 %v2162_v27, %v88_v29 }
  0x5b   :  { %v95_v31 = vsub.f32 %v2624_v25, %v93_v30  ;;  %v94_v42 = vmax.f32 %v2624_v25, %v93_v30  ;;  %v97_v44 = vadd.f32 %v93_v30, %v2624_v25 }
  0x5d   :  { %v98_v32 = vand.u32 2147483647, %v95_v31  ;;  %vm96_vm6 = vcmp.ne.f32.partialorder %v95_v31, %v95_v31 }
  0x5f   :  { %v99_v33 = vsub.f32 0.0, %v98_v32 }
  0x61   :  { %v100_v34 = vmul.f32 1.442695, %v99_v33  ;;  %v2165_v33 = vld [vmem:[#allocation3 + $0xb] ss:$0 sm:$0xff] }
  0x63   :  { %2234 = vpow2.f32 %v100_v34 }
  0x70   :  { %v2235_v35 = vpop.eup %2234 }
  0x71   :  { %v102_v36 = vadd.f32 1.0, %v2235_v35  ;;  %v105_v37 = vmul.f32 -0.5, %v2235_v35  ;;  %v108_v39 = vand.u32 2147483647, %v2235_v35 }
  0x73   :  { %2236 = vlog2.f32 %v102_v36  ;;  %v106_v38 = vadd.f32 1.0, %v105_v37  ;;  %vm109_vm5 = vcmp.lt.f32.partialorder %v108_v39, 0.0004427343 }
  0x75   :  { %v107_v40 = vmul.f32 %v2235_v35, %v106_v38 }
  0x80   :  { %v2237_v41 = vpop.eup %2236 }
  0x81   :  { %v104_v43 = vmul.f32 0.6931472, %v2237_v41 }
  0x83   :  { %v110_v45 = vsel %vm109_vm5, %v107_v40, %v104_v43 }
  0x84   :  { %v111_v46 = vadd.f32 %v110_v45, %v94_v42 }
  0x86   :  { %v2633_v47 = vsel %vm96_vm6, %v97_v44, %v111_v46 }
  0x87   :  { %v117_v48 = vrot.slane %v2633_v47, 1 }
  0x89   :  { %v119_v50 = vsel %vm53_vm1, %v117_v48, -1e+30 }
  0x8a   :  { %v120_v51 = vsel %vm55_vm2, -1e+30, %v119_v50 }
  0x8b   :  { %v125_v52 = vadd.f32 %v2163_v49, %v120_v51 }
  0x8d   :  { %v127_v53 = vsub.f32 %v2633_v47, %v125_v52  ;;  %v126_v0 = vmax.f32 %v2633_v47, %v125_v52  ;;  %v129_v5 = vadd.f32 %v125_v52, %v2633_v47 }
  0x8f   :  { %v130_v54 = vand.u32 2147483647, %v127_v53  ;;  %vm128_vm8 = vcmp.ne.f32.partialorder %v127_v53, %v127_v53 }
  0x91   :  { %v131_v55 = vsub.f32 0.0, %v130_v54 }
  0x93   :  { %v132_v56 = vmul.f32 1.442695, %v131_v55 }
  0x95   :  { %2238 = vpow2.f32 %v132_v56  ;;  %v2166_v56 = vld [vmem:[#allocation3 + $0xa] ss:$0 sm:$0xff] }
  0xa2   :  { %v2239_v57 = vpop.eup %2238 }
  0xa3   :  { %v134_v58 = vadd.f32 1.0, %v2239_v57  ;;  %v137_v59 = vmul.f32 -0.5, %v2239_v57  ;;  %v140_v61 = vand.u32 2147483647, %v2239_v57 }
  0xa5   :  { %2240 = vlog2.f32 %v134_v58  ;;  %v138_v60 = vadd.f32 1.0, %v137_v59  ;;  %vm141_vm7 = vcmp.lt.f32.partialorder %v140_v61, 0.0004427343 }
  0xa7   :  { %v139_v62 = vmul.f32 %v2239_v57, %v138_v60 }
  0xb2   :  { %v2241_v63 = vpop.eup %2240 }
  0xb3   :  { %v136_v4 = vmul.f32 0.6931472, %v2241_v63 }
  0xb5   :  { %v142_v6 = vsel %vm141_vm7, %v139_v62, %v136_v4 }
  0xb6   :  { %v143_v7 = vadd.f32 %v142_v6, %v126_v0 }
  0xb8   :  { %v2642_v8 = vsel %vm128_vm8, %v129_v5, %v143_v7 }
  0xb9   :  { %v149_v9 = vrot.slane %v2642_v8, 1 }
  0xbb   :  { %v151_v11 = vsel %vm53_vm1, %v149_v9, -1e+30 }
  0xbc   :  { %v152_v12 = vsel %vm55_vm2, -1e+30, %v151_v11 }
  0xbd   :  { %v157_v13 = vadd.f32 %v2164_v10, %v152_v12 }
  0xbf   :  { %v159_v14 = vsub.f32 %v2642_v8, %v157_v13  ;;  %v158_v26 = vmax.f32 %v2642_v8, %v157_v13  ;;  %v161_v28 = vadd.f32 %v157_v13, %v2642_v8 }
  0xc1   :  { %v162_v15 = vand.u32 2147483647, %v159_v14  ;;  %vm160_vm10 = vcmp.ne.f32.partialorder %v159_v14, %v159_v14 }
  0xc3   :  { %v163_v16 = vsub.f32 0.0, %v162_v15 }
  0xc5   :  { %v164_v17 = vmul.f32 1.442695, %v163_v16 }
  0xc7   :  { %2242 = vpow2.f32 %v164_v17 }
  0xd4   :  { %v2243_v18 = vpop.eup %2242 }
  0xd5   :  { %v166_v19 = vadd.f32 1.0, %v2243_v18  ;;  %v169_v20 = vmul.f32 -0.5, %v2243_v18  ;;  %v172_v22 = vand.u32 2147483647, %v2243_v18 }
  0xd7   :  { %2244 = vlog2.f32 %v166_v19  ;;  %v170_v21 = vadd.f32 1.0, %v169_v20  ;;  %vm173_vm9 = vcmp.lt.f32.partialorder %v172_v22, 0.0004427343 }
  0xd9   :  { %v171_v23 = vmul.f32 %v2243_v18, %v170_v21  ;;  %v2167_v18 = vld [vmem:[#allocation3 + $0x9] ss:$0 sm:$0xff] }
  0xe4   :  { %v2245_v24 = vpop.eup %2244 }
  0xe5   :  { %v168_v27 = vmul.f32 0.6931472, %v2245_v24 }
  0xe7   :  { %v174_v29 = vsel %vm173_vm9, %v171_v23, %v168_v27 }
  0xe8   :  { %v175_v30 = vadd.f32 %v174_v29, %v158_v26 }
  0xea   :  { %v2651_v31 = vsel %vm160_vm10, %v161_v28, %v175_v30 }
  0xeb   :  { %v181_v32 = vrot.slane %v2651_v31, 1 }
  0xed   :  { %v183_v34 = vsel %vm53_vm1, %v181_v32, -1e+30 }
  0xee   :  { %v184_v35 = vsel %vm55_vm2, -1e+30, %v183_v34 }
  0xef   :  { %v189_v36 = vadd.f32 %v2165_v33, %v184_v35 }
  0xf1   :  { %v191_v37 = vsub.f32 %v2651_v31, %v189_v36  ;;  %v190_v49 = vmax.f32 %v2651_v31, %v189_v36  ;;  %v193_v51 = vadd.f32 %v189_v36, %v2651_v31 }
  0xf3   :  { %v194_v38 = vand.u32 2147483647, %v191_v37  ;;  %vm192_vm12 = vcmp.ne.f32.partialorder %v191_v37, %v191_v37 }
  0xf5   :  { %v195_v39 = vsub.f32 0.0, %v194_v38 }
  0xf7   :  { %v196_v40 = vmul.f32 1.442695, %v195_v39 }
  0xf9   :  { %2246 = vpow2.f32 %v196_v40 }
 0x106   :  { %v2247_v41 = vpop.eup %2246 }
 0x107   :  { %v198_v42 = vadd.f32 1.0, %v2247_v41  ;;  %v201_v43 = vmul.f32 -0.5, %v2247_v41  ;;  %v204_v45 = vand.u32 2147483647, %v2247_v41 }
 0x109   :  { %2248 = vlog2.f32 %v198_v42  ;;  %v202_v44 = vadd.f32 1.0, %v201_v43  ;;  %vm205_vm11 = vcmp.lt.f32.partialorder %v204_v45, 0.0004427343  ;;  %v2168_v42 = vld [vmem:[#allocation3 + $0x8] ss:$0 sm:$0xff] }
 0x10b   :  { %v203_v46 = vmul.f32 %v2247_v41, %v202_v44 }
 0x116   :  { %v2249_v48 = vpop.eup %2248 }
 0x117   :  { %v200_v50 = vmul.f32 0.6931472, %v2249_v48 }
 0x119   :  { %v206_v52 = vsel %vm205_vm11, %v203_v46, %v200_v50 }
 0x11a   :  { %v207_v53 = vadd.f32 %v206_v52, %v190_v49 }
 0x11c   :  { %v2660_v54 = vsel %vm192_vm12, %v193_v51, %v207_v53 }
 0x11d   :  { %v213_v55 = vrot.slane %v2660_v54, 1 }
 0x11f   :  { %v215_v57 = vsel %vm53_vm1, %v213_v55, -1e+30 }
 0x120   :  { %v216_v58 = vsel %vm55_vm2, -1e+30, %v215_v57 }
 0x121   :  { %v221_v59 = vadd.f32 %v2166_v56, %v216_v58 }
 0x123   :  { %v223_v60 = vsub.f32 %v2660_v54, %v221_v59  ;;  %v222_v11 = vmax.f32 %v2660_v54, %v221_v59  ;;  %v225_v13 = vadd.f32 %v221_v59, %v2660_v54 }
 0x125   :  { %v226_v61 = vand.u32 2147483647, %v223_v60  ;;  %vm224_vm14 = vcmp.ne.f32.partialorder %v223_v60, %v223_v60 }
 0x127   :  { %v227_v62 = vsub.f32 0.0, %v226_v61 }
 0x129   :  { %v228_v63 = vmul.f32 1.442695, %v227_v62 }
 0x12b   :  { %2250 = vpow2.f32 %v228_v63 }
 0x138   :  { %v2251_v0 = vpop.eup %2250 }
 0x139   :  { %v230_v4 = vadd.f32 1.0, %v2251_v0  ;;  %v233_v5 = vmul.f32 -0.5, %v2251_v0  ;;  %v236_v7 = vand.u32 2147483647, %v2251_v0 }
 0x13b   :  { %2252 = vlog2.f32 %v230_v4  ;;  %v234_v6 = vadd.f32 1.0, %v233_v5  ;;  %vm237_vm13 = vcmp.lt.f32.partialorder %v236_v7, 0.0004427343  ;;  %v2169_v5 = vld [vmem:[#allocation3 + $0x7] ss:$0 sm:$0xff] }
 0x13d   :  { %v235_v9 = vmul.f32 %v2251_v0, %v234_v6 }
 0x148   :  { %v2253_v10 = vpop.eup %2252 }
 0x149   :  { %v232_v12 = vmul.f32 0.6931472, %v2253_v10 }
 0x14b   :  { %v238_v14 = vsel %vm237_vm13, %v235_v9, %v232_v12 }
 0x14c   :  { %v239_v15 = vadd.f32 %v238_v14, %v222_v11 }
 0x14e   :  { %v2669_v16 = vsel %vm224_vm14, %v225_v13, %v239_v15 }
 0x14f   :  { %v245_v17 = vrot.slane %v2669_v16, 1 }
 0x151   :  { %v247_v19 = vsel %vm53_vm1, %v245_v17, -1e+30 }
 0x152   :  { %v248_v20 = vsel %vm55_vm2, -1e+30, %v247_v19 }
 0x153   :  { %v253_v21 = vadd.f32 %v2167_v18, %v248_v20 }
 0x155   :  { %v255_v22 = vsub.f32 %v2669_v16, %v253_v21  ;;  %v254_v35 = vmax.f32 %v2669_v16, %v253_v21  ;;  %v257_v37 = vadd.f32 %v253_v21, %v2669_v16 }
 0x157   :  { %v258_v23 = vand.u32 2147483647, %v255_v22  ;;  %vm256_vm0 = vcmp.ne.f32.partialorder %v255_v22, %v255_v22 }
 0x159   :  { %v259_v24 = vsub.f32 0.0, %v258_v23 }
 0x15b   :  { %v260_v26 = vmul.f32 1.442695, %v259_v24 }
 0x15d   :  { %2254 = vpow2.f32 %v260_v26 }
 0x16a   :  { %v2255_v27 = vpop.eup %2254 }
 0x16b   :  { %v262_v28 = vadd.f32 1.0, %v2255_v27  ;;  %v265_v29 = vmul.f32 -0.5, %v2255_v27  ;;  %v268_v32 = vand.u32 2147483647, %v2255_v27 }
 0x16d   :  { %2256 = vlog2.f32 %v262_v28  ;;  %v266_v30 = vadd.f32 1.0, %v265_v29  ;;  %vm269_vm15 = vcmp.lt.f32.partialorder %v268_v32, 0.0004427343 }
 0x16f   :  { %v267_v33 = vmul.f32 %v2255_v27, %v266_v30  ;;  %v2170_v30 = vld [vmem:[#allocation3 + $0x6] ss:$0 sm:$0xff] }
 0x17a   :  { %v2257_v34 = vpop.eup %2256 }
 0x17b   :  { %v264_v36 = vmul.f32 0.6931472, %v2257_v34 }
 0x17d   :  { %v270_v38 = vsel %vm269_vm15, %v267_v33, %v264_v36 }
 0x17e   :  { %v271_v39 = vadd.f32 %v270_v38, %v254_v35 }
 0x180   :  { %v2678_v40 = vsel %vm256_vm0, %v257_v37, %v271_v39  ;;  %vm560_vm0 = vcmp.eq.s32.totalorder %v2610_v1, 0 }
 0x181   :  { %v277_v41 = vrot.slane %v2678_v40, 1 }
 0x183   :  { %v279_v43 = vsel %vm53_vm1, %v277_v41, -1e+30 }
 0x184   :  { %v280_v44 = vsel %vm55_vm2, -1e+30, %v279_v43 }
 0x185   :  { %v285_v45 = vadd.f32 %v2168_v42, %v280_v44 }
 0x187   :  { %v287_v46 = vsub.f32 %v2678_v40, %v285_v45  ;;  %v286_v59 = vmax.f32 %v2678_v40, %v285_v45  ;;  %v289_v61 = vadd.f32 %v285_v45, %v2678_v40 }
 0x189   :  { %v290_v48 = vand.u32 2147483647, %v287_v46  ;;  %vm288_vm4 = vcmp.ne.f32.partialorder %v287_v46, %v287_v46 }
 0x18b   :  { %v291_v49 = vsub.f32 0.0, %v290_v48 }
 0x18d   :  { %v292_v50 = vmul.f32 1.442695, %v291_v49 }
 0x18f   :  { %2258 = vpow2.f32 %v292_v50 }
 0x19c   :  { %v2259_v51 = vpop.eup %2258 }
 0x19d   :  { %v294_v52 = vadd.f32 1.0, %v2259_v51  ;;  %v297_v53 = vmul.f32 -0.5, %v2259_v51  ;;  %v300_v56 = vand.u32 2147483647, %v2259_v51 }
 0x19f   :  { %2260 = vlog2.f32 %v294_v52  ;;  %v298_v55 = vadd.f32 1.0, %v297_v53  ;;  %vm301_vm3 = vcmp.lt.f32.partialorder %v300_v56, 0.0004427343  ;;  %v2171_v56 = vld [vmem:[#allocation3 + $0x5] ss:$0 sm:$0xff] }
 0x1a1   :  { %v299_v57 = vmul.f32 %v2259_v51, %v298_v55 }
 0x1ac   :  { %v2261_v58 = vpop.eup %2260 }
 0x1ad   :  { %v296_v60 = vmul.f32 0.6931472, %v2261_v58 }
 0x1af   :  { %v302_v62 = vsel %vm301_vm3, %v299_v57, %v296_v60 }
 0x1b0   :  { %v303_v63 = vadd.f32 %v302_v62, %v286_v59 }
 0x1b2   :  { %v2687_v0 = vsel %vm288_vm4, %v289_v61, %v303_v63  ;;  %vm566_vm4 = vcmask 1040384  }
 0x1b3   :  { %v309_v4 = vrot.slane %v2687_v0, 1 }
 0x1b5   :  { %v311_v6 = vsel %vm53_vm1, %v309_v4, -1e+30 }
 0x1b6   :  { %v312_v7 = vsel %vm55_vm2, -1e+30, %v311_v6 }
 0x1b7   :  { %v317_v9 = vadd.f32 %v2169_v5, %v312_v7 }
 0x1b9   :  { %v319_v10 = vsub.f32 %v2687_v0, %v317_v9  ;;  %v318_v22 = vmax.f32 %v2687_v0, %v317_v9  ;;  %v321_v24 = vadd.f32 %v317_v9, %v2687_v0 }
 0x1bb   :  { %v322_v11 = vand.u32 2147483647, %v319_v10  ;;  %vm320_vm6 = vcmp.ne.f32.partialorder %v319_v10, %v319_v10 }
 0x1bd   :  { %v323_v12 = vsub.f32 0.0, %v322_v11 }
 0x1bf   :  { %v324_v13 = vmul.f32 1.442695, %v323_v12 }
 0x1c1   :  { %2262 = vpow2.f32 %v324_v13 }
 0x1ce   :  { %v2263_v14 = vpop.eup %2262 }
 0x1cf   :  { %v326_v15 = vadd.f32 1.0, %v2263_v14  ;;  %v329_v17 = vmul.f32 -0.5, %v2263_v14  ;;  %v332_v19 = vand.u32 2147483647, %v2263_v14 }
 0x1d1   :  { %2264 = vlog2.f32 %v326_v15  ;;  %v330_v18 = vadd.f32 1.0, %v329_v17  ;;  %vm333_vm5 = vcmp.lt.f32.partialorder %v332_v19, 0.0004427343 }
 0x1d3   :  { %v331_v20 = vmul.f32 %v2263_v14, %v330_v18 }
 0x1de   :  { %v2265_v21 = vpop.eup %2264 }
 0x1df   :  { %v328_v23 = vmul.f32 0.6931472, %v2265_v21 }
 0x1e1   :  { %v334_v26 = vsel %vm333_vm5, %v331_v20, %v328_v23  ;;  %v2172_v20 = vld [vmem:[#allocation3 + $0x4] ss:$0 sm:$0xff] }
 0x1e2   :  { %v335_v27 = vadd.f32 %v334_v26, %v318_v22 }
 0x1e4   :  { %v2696_v28 = vsel %vm320_vm6, %v321_v24, %v335_v27 }
 0x1e5   :  { %v341_v29 = vrot.slane %v2696_v28, 1 }
 0x1e7   :  { %v343_v32 = vsel %vm53_vm1, %v341_v29, -1e+30 }
 0x1e8   :  { %v344_v33 = vsel %vm55_vm2, -1e+30, %v343_v32 }
 0x1e9   :  { %v349_v34 = vadd.f32 %v2170_v30, %v344_v33 }
 0x1eb   :  { %v351_v35 = vsub.f32 %v2696_v28, %v349_v34  ;;  %v350_v48 = vmax.f32 %v2696_v28, %v349_v34  ;;  %v353_v50 = vadd.f32 %v349_v34, %v2696_v28 }
 0x1ed   :  { %v354_v36 = vand.u32 2147483647, %v351_v35  ;;  %vm352_vm8 = vcmp.ne.f32.partialorder %v351_v35, %v351_v35 }
 0x1ef   :  { %v355_v37 = vsub.f32 0.0, %v354_v36 }
 0x1f1   :  { %v356_v38 = vmul.f32 1.442695, %v355_v37 }
 0x1f3   :  { %2266 = vpow2.f32 %v356_v38 }
 0x200   :  { %v2267_v39 = vpop.eup %2266 }
 0x201   :  { %v358_v41 = vadd.f32 1.0, %v2267_v39  ;;  %v361_v42 = vmul.f32 -0.5, %v2267_v39  ;;  %v364_v44 = vand.u32 2147483647, %v2267_v39 }
 0x203   :  { %2268 = vlog2.f32 %v358_v41  ;;  %v362_v43 = vadd.f32 1.0, %v361_v42  ;;  %vm365_vm7 = vcmp.lt.f32.partialorder %v364_v44, 0.0004427343 }
 0x205   :  { %v363_v45 = vmul.f32 %v2267_v39, %v362_v43 }
 0x210   :  { %v2269_v46 = vpop.eup %2268 }
 0x211   :  { %v360_v49 = vmul.f32 0.6931472, %v2269_v46  ;;  %v2173_v46 = vld [vmem:[#allocation3 + $0x3] ss:$0 sm:$0xff] }
 0x213   :  { %v366_v51 = vsel %vm365_vm7, %v363_v45, %v360_v49 }
 0x214   :  { %v367_v52 = vadd.f32 %v366_v51, %v350_v48 }
 0x216   :  { %v2705_v53 = vsel %vm352_vm8, %v353_v50, %v367_v52  ;;  %vm591_vm8 = vcmp.eq.s32.totalorder %v2610_v1, 1 }
 0x217   :  { %v373_v55 = vrot.slane %v2705_v53, 1 }
 0x219   :  { %v375_v57 = vsel %vm53_vm1, %v373_v55, -1e+30 }
 0x21a   :  { %v376_v58 = vsel %vm55_vm2, -1e+30, %v375_v57 }
 0x21b   :  { %v381_v59 = vadd.f32 %v2171_v56, %v376_v58 }
 0x21d   :  { %v383_v60 = vsub.f32 %v2705_v53, %v381_v59  ;;  %v382_v12 = vmax.f32 %v2705_v53, %v381_v59  ;;  %v385_v14 = vadd.f32 %v381_v59, %v2705_v53 }
 0x21f   :  { %v386_v61 = vand.u32 2147483647, %v383_v60  ;;  %vm384_vm10 = vcmp.ne.f32.partialorder %v383_v60, %v383_v60 }
 0x221   :  { %v387_v62 = vsub.f32 0.0, %v386_v61 }
 0x223   :  { %v388_v63 = vmul.f32 1.442695, %v387_v62 }
 0x225   :  { %2270 = vpow2.f32 %v388_v63 }
 0x232   :  { %v2271_v4 = vpop.eup %2270 }
 0x233   :  { %v390_v5 = vadd.f32 1.0, %v2271_v4  ;;  %v393_v6 = vmul.f32 -0.5, %v2271_v4  ;;  %v396_v9 = vand.u32 2147483647, %v2271_v4 }
 0x235   :  { %2272 = vlog2.f32 %v390_v5  ;;  %v394_v7 = vadd.f32 1.0, %v393_v6  ;;  %vm397_vm9 = vcmp.lt.f32.partialorder %v396_v9, 0.0004427343 }
 0x237   :  { %v395_v10 = vmul.f32 %v2271_v4, %v394_v7 }
 0x242   :  { %v2273_v11 = vpop.eup %2272 }
 0x243   :  { %v392_v13 = vmul.f32 0.6931472, %v2273_v11 }
 0x245   :  { %v398_v15 = vsel %vm397_vm9, %v395_v10, %v392_v13 }
 0x246   :  { %v399_v17 = vadd.f32 %v398_v15, %v382_v12  ;;  %v2174_v12 = vld [vmem:[#allocation3 + $0x2] ss:$0 sm:$0xff] }
 0x248   :  { %v2714_v18 = vsel %vm384_vm10, %v385_v14, %v399_v17 }
 0x249   :  { %v405_v19 = vrot.slane %v2714_v18, 1 }
 0x24b   :  { %v407_v21 = vsel %vm53_vm1, %v405_v19, -1e+30 }
 0x24c   :  { %v408_v22 = vsel %vm55_vm2, -1e+30, %v407_v21 }
 0x24d   :  { %v413_v23 = vadd.f32 %v2172_v20, %v408_v22 }
 0x24f   :  { %v415_v24 = vsub.f32 %v2714_v18, %v413_v23  ;;  %v414_v38 = vmax.f32 %v2714_v18, %v413_v23  ;;  %v417_v41 = vadd.f32 %v413_v23, %v2714_v18 }
 0x251   :  { %v418_v26 = vand.u32 2147483647, %v415_v24  ;;  %vm416_vm12 = vcmp.ne.f32.partialorder %v415_v24, %v415_v24 }
 0x253   :  { %v419_v27 = vsub.f32 0.0, %v418_v26 }
 0x255   :  { %v420_v29 = vmul.f32 1.442695, %v419_v27 }
 0x257   :  { %2274 = vpow2.f32 %v420_v29 }
 0x264   :  { %v2275_v30 = vpop.eup %2274 }
 0x265   :  { %v422_v32 = vadd.f32 1.0, %v2275_v30  ;;  %v425_v33 = vmul.f32 -0.5, %v2275_v30  ;;  %v428_v35 = vand.u32 2147483647, %v2275_v30 }
 0x267   :  { %2276 = vlog2.f32 %v422_v32  ;;  %v426_v34 = vadd.f32 1.0, %v425_v33  ;;  %vm429_vm11 = vcmp.lt.f32.partialorder %v428_v35, 0.0004427343 }
 0x269   :  { %v427_v36 = vmul.f32 %v2275_v30, %v426_v34  ;;  %v561_v34 = vsel %vm560_vm0, 0.0, %v2574_v2  ;;  %v2175_v2 = vld [vmem:[#allocation3 + $0x1] ss:$0 sm:$0xff] }
 0x274   :  { %v2277_v37 = vpop.eup %2276 }
 0x275   :  { %v424_v39 = vmul.f32 0.6931472, %v2277_v37 }
 0x277   :  { %v430_v42 = vsel %vm429_vm11, %v427_v36, %v424_v39  ;;  %v2746_v39 = vsub.s32 0, %v2610_v1 }
 0x278   :  { %v431_v43 = vadd.f32 %v430_v42, %v414_v38  ;;  %v564_v38 = vrot.slane %v561_v34, 7  ;;  %v2750_v42 = vld [vmem:[#allocation3] sm:$0x1] }
 0x27a   :  { %v2723_v44 = vsel %vm416_vm12, %v417_v41, %v431_v43 }
 0x27b   :  { %v437_v45 = vrot.slane %v2723_v44, 1 }
 0x27d   :  { %v439_v48 = vsel %vm53_vm1, %v437_v45, -1e+30  ;;  %v2755_v45 = vrot.slane %v2750_v42, %v2746_v39 }
 0x27e   :  { %v440_v49 = vsel %vm55_vm2, -1e+30, %v439_v48 }
 0x27f   :  { %v445_v50 = vadd.f32 %v2173_v46, %v440_v49  ;;  %v567_v46 = vsel %vm566_vm4, -1e+30, %v564_v38 }
 0x281   :  { %v447_v51 = vsub.f32 %v2723_v44, %v445_v50  ;;  %v446_v4 = vmax.f32 %v2723_v44, %v445_v50  ;;  %v449_v6 = vadd.f32 %v445_v50, %v2723_v44 }
 0x283   :  { %v450_v52 = vand.u32 2147483647, %v447_v51  ;;  %vm448_vm14 = vcmp.ne.f32.partialorder %v447_v51, %v447_v51  ;;  %v629_v51 = vadd.f32 %v567_v46, %v2755_v45 }
 0x285   :  { %v451_v55 = vsub.f32 0.0, %v450_v52 }
 0x287   :  { %v452_v56 = vmul.f32 1.442695, %v451_v55  ;;  %v631_v55 = vsub.f32 %v561_v34, %v629_v51 }
 0x289   :  { %2278 = vpow2.f32 %v452_v56  ;;  %vm632_vm9 = vcmp.ne.f32.partialorder %v631_v55, %v631_v55 }
 0x296   :  { %v2279_v57 = vpop.eup %2278 }
 0x297   :  { %v454_v58 = vadd.f32 1.0, %v2279_v57  ;;  %v457_v59 = vmul.f32 -0.5, %v2279_v57  ;;  %v460_v61 = vand.u32 2147483647, %v2279_v57 }
 0x299   :  { %2280 = vlog2.f32 %v454_v58  ;;  %v458_v60 = vadd.f32 1.0, %v457_v59  ;;  %vm461_vm13 = vcmp.lt.f32.partialorder %v460_v61, 0.0004427343 }
 0x29b   :  { %v459_v62 = vmul.f32 %v2279_v57, %v458_v60  ;;  %v634_v57 = vand.u32 2147483647, %v631_v55 }
 0x29d   :  { %v635_v59 = vsub.f32 0.0, %v634_v57 }
 0x29f   :  { %v636_v61 = vmul.f32 1.442695, %v635_v59 }
 0x2a6   :  { %v2281_v63 = vpop.eup %2280 }
 0x2a7   :  { %v456_v5 = vmul.f32 0.6931472, %v2281_v63 }
 0x2a9   :  { %v462_v7 = vsel %vm461_vm13, %v459_v62, %v456_v5 }
 0x2aa   :  { %v463_v9 = vadd.f32 %v462_v7, %v446_v4 }
 0x2ac   :  { %v2732_v10 = vsel %vm448_vm14, %v449_v6, %v463_v9 }
 0x2ad   :  { %v469_v11 = vrot.slane %v2732_v10, 1 }
 0x2af   :  { %v471_v13 = vsel %vm53_vm1, %v469_v11, -1e+30 }
 0x2b0   :  { %v472_v14 = vsel %vm55_vm2, -1e+30, %v471_v13 }
 0x2b1   :  { %v477_v15 = vadd.f32 %v2174_v12, %v472_v14 }
 0x2b3   :  { %v479_v17 = vsub.f32 %v2732_v10, %v477_v15  ;;  %v478_v32 = vmax.f32 %v2732_v10, %v477_v15  ;;  %v481_v35 = vadd.f32 %v477_v15, %v2732_v10 }
 0x2b5   :  { %v482_v19 = vand.u32 2147483647, %v479_v17  ;;  %vm480_vm3 = vcmp.ne.f32.partialorder %v479_v17, %v479_v17 }
 0x2b7   :  { %v483_v20 = vsub.f32 0.0, %v482_v19 }
 0x2b9   :  { %v484_v21 = vmul.f32 1.442695, %v483_v20 }
 0x2bb   :  { %2282 = vpow2.f32 %v484_v21 }
 0x2c8   :  { %v2283_v22 = vpop.eup %2282 }
 0x2c9   :  { %v486_v23 = vadd.f32 1.0, %v2283_v22  ;;  %v489_v24 = vmul.f32 -0.5, %v2283_v22  ;;  %v492_v27 = vand.u32 2147483647, %v2283_v22 }
 0x2cb   :  { %2284 = vlog2.f32 %v486_v23  ;;  %v490_v26 = vadd.f32 1.0, %v489_v24  ;;  %vm493_vm15 = vcmp.lt.f32.partialorder %v492_v27, 0.0004427343 }
 0x2cd   :  { %v491_v29 = vmul.f32 %v2283_v22, %v490_v26  ;;  %v630_v22 = vmax.f32 %v561_v34, %v629_v51 }
 0x2d8   :  { %v2285_v30 = vpop.eup %2284 }
 0x2d9   :  { %v488_v33 = vmul.f32 0.6931472, %v2285_v30 }
 0x2db   :  { %v494_v36 = vsel %vm493_vm15, %v491_v29, %v488_v33  ;;  %v633_v29 = vadd.f32 %v629_v51, %v561_v34 }
 0x2dc   :  { %v495_v37 = vadd.f32 %v494_v36, %v478_v32 }
 0x2de   :  { %v2748_v41 = vsel %vm480_vm3, %v481_v35, %v495_v37  ;;  %v2768_v35 = vld [vmem:[#allocation3 + $0x1] sm:$0x1] }
 0x2df   :  { %v501_v43 = vrot.slane %v2748_v41, 1 }
 0x2e1   :  { %v503_v48 = vsel %vm53_vm1, %v501_v43, -1e+30 }
 0x2e2   :  { %v504_v49 = vsel %vm55_vm2, -1e+30, %v503_v48 }
 0x2e3   :  { %v509_v50 = vadd.f32 %v2175_v2, %v504_v49  ;;  %v659_v49 = vrot.slane %v2768_v35, %v2746_v39 }
 0x2e5   :  { %v511_v52 = vsub.f32 %v2748_v41, %v509_v50  ;;  %v510_v17 = vmax.f32 %v2748_v41, %v509_v50  ;;  %v513_v23 = vadd.f32 %v509_v50, %v2748_v41 }
 0x2e7   :  { %v514_v56 = vand.u32 2147483647, %v511_v52  ;;  %vm512_vm7 = vcmp.ne.f32.partialorder %v511_v52, %v511_v52 }
 0x2e9   :  { %v515_v58 = vsub.f32 0.0, %v514_v56 }
 0x2eb   :  { %v516_v60 = vmul.f32 1.442695, %v515_v58 }
 0x2ed   :  { %2286 = vpow2.f32 %v516_v60 }
 0x2ee   :  { %2288 = vpow2.f32 %v636_v61 }
 0x2fa   :  { %v2287_v62 = vpop.eup %2286 }
 0x2fb   :  { %v2289_v63 = vpop.eup %2288  ;;  %v518_v4 = vadd.f32 1.0, %v2287_v62  ;;  %v521_v6 = vmul.f32 -0.5, %v2287_v62  ;;  %v524_v11 = vand.u32 2147483647, %v2287_v62 }
 0x2fc   :  { %v638_v5 = vadd.f32 1.0, %v2289_v63  ;;  %v641_v7 = vmul.f32 -0.5, %v2289_v63  ;;  %v644_v13 = vand.u32 2147483647, %v2289_v63 }
 0x2fd   :  { %2290 = vlog2.f32 %v518_v4  ;;  %v522_v9 = vadd.f32 1.0, %v521_v6  ;;  %vm525_vm5 = vcmp.lt.f32.partialorder %v524_v11, 0.0004427343 }
 0x2fe   :  { %2292 = vlog2.f32 %v638_v5  ;;  %v642_v12 = vadd.f32 1.0, %v641_v7  ;;  %vm645_vm6 = vcmp.lt.f32.partialorder %v644_v13, 0.0004427343 }
 0x2ff   :  { %v523_v14 = vmul.f32 %v2287_v62, %v522_v9 }
 0x300   :  { %v643_v19 = vmul.f32 %v2289_v63, %v642_v12 }
 0x30a   :  { %v2291_v15 = vpop.eup %2290 }
 0x30b   :  { %v2293_v20 = vpop.eup %2292  ;;  %v520_v21 = vmul.f32 0.6931472, %v2291_v15 }
 0x30c   :  { %v640_v24 = vmul.f32 0.6931472, %v2293_v20 }
 0x30d   :  { %v526_v26 = vsel %vm525_vm5, %v523_v14, %v520_v21 }
 0x30e   :  { %v527_v27 = vadd.f32 %v526_v26, %v510_v17  ;;  %v646_v30 = vsel %vm645_vm6, %v643_v19, %v640_v24 }
 0x30f   :  { %v647_v32 = vadd.f32 %v646_v30, %v630_v22 }
 0x310   :  { %v2766_v33 = vsel %vm512_vm7, %v513_v23, %v527_v27 }
 0x311   :  { %v532_v36 = vrot.slane %v2766_v33, 1  ;;  %v568_v37 = vadd.f32 %v567_v46, %v2766_v33  ;;  %v584_v38 = vsel %vm560_vm0, %v2766_v33, -1e+30  ;;  %v592_v43 = vsel %vm591_vm8, %v2766_v33, -1e+30 }
 0x312   :  { %v585_v34 = vrot.slane %v584_v38, 4  ;;  %v593_v2 = vrot.slane %v592_v43, 4  ;;  %v2776_v48 = vsel %vm632_vm9, %v633_v29, %v647_v32 }
 0x313   :  { %v534_v50 = vsel %vm53_vm1, %v532_v36, -1e+30  ;;  %v2782_v51 = vadd.f32 %v568_v37, %v2755_v45  ;;  %v652_v46 = vrot.slane %v2776_v48, 7 }
 0x314   :  { %v535_v52 = vsel %vm55_vm2, -1e+30, %v534_v50  ;;  %v586_v55 = vmax.f32 %v584_v38, %v585_v34  ;;  %v594_v56 = vmax.f32 %v592_v43, %v593_v2 }
 0x315   :  { %v540_v57 = vadd.f32 %v2755_v45, %v535_v52  ;;  %v654_v58 = vsel %vm566_vm4, -1e+30, %v652_v46 }
 0x316   :  { %v587_v59 = vrot.slane %v586_v55, 2  ;;  %v595_v60 = vrot.slane %v594_v56, 2  ;;  %v2789_v61 = vadd.f32 %v659_v49, %v654_v58  ;;  %v655_v46 = vadd.f32 %v654_v58, %v2748_v41 }
 0x317   :  { %v542_v62 = vsub.f32 %v2766_v33, %v540_v57  ;;  %v541_v34 = vmax.f32 %v2766_v33, %v540_v57  ;;  %v544_v52 = vadd.f32 %v540_v57, %v2766_v33 }
 0x318   :  { %v588_v63 = vmax.f32 %v586_v55, %v587_v59  ;;  %v596_v4 = vmax.f32 %v594_v56, %v595_v60  ;;  %v2794_v9 = vsub.f32 %v2776_v48, %v2789_v61 }
 0x319   :  { %v545_v5 = vand.u32 2147483647, %v542_v62  ;;  %vm543_vm2 = vcmp.ne.f32.partialorder %v542_v62, %v542_v62 }
 0x31a   :  { %v589_v6 = vrot.slane %v588_v63, 1  ;;  %v597_v7 = vrot.slane %v596_v4, 1  ;;  %v734_v15 = vand.u32 2147483647, %v2794_v9  ;;  %vm732_vm13 = vcmp.ne.f32.partialorder %v2794_v9, %v2794_v9 }
 0x31b   :  { %v546_v11 = vsub.f32 0.0, %v545_v5 }
 0x31c   :  { %v590_v12 = vmax.f32 %v588_v63, %v589_v6  ;;  %v598_v45 = vmax.f32 %v596_v4, %v597_v7  ;;  %v735_v20 = vsub.f32 0.0, %v734_v15  ;;  %v660_v63 = vadd.f32 %v659_v49, %v655_v46 }
 0x31d   :  { %v547_v13 = vmul.f32 1.442695, %v546_v11 }
 0x31e   :  { %v599_v14 = vadd.f32 %v598_v45, %v2750_v42  ;;  %v736_v23 = vmul.f32 1.442695, %v735_v20 }
 0x31f   :  { %2294 = vpow2.f32 %v547_v13 }
 0x320   :  { %v601_v17 = vsub.f32 %v590_v12, %v599_v14  ;;  %v600_v45 = vmax.f32 %v590_v12, %v599_v14  ;;  %v603_v13 = vadd.f32 %v599_v14, %v590_v12 }
 0x322   :  { %v604_v19 = vand.u32 2147483647, %v601_v17  ;;  %vm602_vm11 = vcmp.ne.f32.partialorder %v601_v17, %v601_v17  ;;  %v733_v17 = vadd.f32 %v2789_v61, %v2776_v48 }
 0x324   :  { %v605_v21 = vsub.f32 0.0, %v604_v19 }
 0x326   :  { %v606_v22 = vmul.f32 1.442695, %v605_v21 }
 0x328   :  { %2296 = vpow2.f32 %v606_v22 }
 0x329   :  { %2298 = vpow2.f32 %v736_v23 }
 0x32c   :  { %v2295_v24 = vpop.eup %2294 }
 0x32d   :  { %v549_v26 = vadd.f32 1.0, %v2295_v24  ;;  %v552_v27 = vmul.f32 -0.5, %v2295_v24  ;;  %v555_v42 = vand.u32 2147483647, %v2295_v24 }
 0x32f   :  { %2300 = vlog2.f32 %v549_v26  ;;  %v553_v36 = vadd.f32 1.0, %v552_v27  ;;  %vm556_vm1 = vcmp.lt.f32.partialorder %v555_v42, 0.0004427343 }
 0x331   :  { %v554_v38 = vmul.f32 %v2295_v24, %v553_v36 }
 0x335   :  { %v2297_v29 = vpop.eup %2296 }
 0x336   :  { %v608_v30 = vadd.f32 1.0, %v2297_v29  ;;  %v2299_v32 = vpop.eup %2298  ;;  %v611_v2 = vmul.f32 -0.5, %v2297_v29  ;;  %v614_v60 = vand.u32 2147483647, %v2297_v29 }
 0x337   :  { %v738_v37 = vadd.f32 1.0, %v2299_v32  ;;  %v741_v58 = vmul.f32 -0.5, %v2299_v32  ;;  %v744_v23 = vand.u32 2147483647, %v2299_v32 }
 0x338   :  { %2302 = vlog2.f32 %v608_v30  ;;  %v612_v59 = vadd.f32 1.0, %v611_v2  ;;  %vm615_vm10 = vcmp.lt.f32.partialorder %v614_v60, 0.0004427343 }
 0x339   :  { %2304 = vlog2.f32 %v738_v37  ;;  %v742_v20 = vadd.f32 1.0, %v741_v58  ;;  %vm745_vm12 = vcmp.lt.f32.partialorder %v744_v23, 0.0004427343 }
 0x33a   :  { %v613_v6 = vmul.f32 %v2297_v29, %v612_v59  ;;  %v730_v29 = vmax.f32 %v2776_v48, %v2789_v61 }
 0x33b   :  { %v743_v27 = vmul.f32 %v2299_v32, %v742_v20 }
 0x33c   :  { %v2301_v43 = vpop.eup %2300 }
 0x33d   :  { %v551_v50 = vmul.f32 0.6931472, %v2301_v43 }
 0x33f   :  { %v557_v55 = vsel %vm556_vm1, %v554_v38, %v551_v50  ;;  %v622_v50 = vld [vmem:[#allocation6] sm:$0x1] }
 0x340   :  { %v558_v56 = vadd.f32 %v557_v55, %v541_v34 }
 0x342   :  { %v559_v4 = vsel %vm543_vm2, %v544_v52, %v558_v56  ;;  %v2816_v52 = vld [vmem:[#allocation3 + $0x2] sm:$0x1] }
 0x343   :  { %v2802_v5 = vrot.slane %v559_v4, %v2746_v39  ;;  %v759_v56 = vrot.slane %v2816_v52, %v2746_v39 }
 0x345   :  { %v2303_v7 = vpop.eup %2302  ;;  %v574_v11 = vsub.f32 %v2782_v51, %v2802_v5  ;;  %v661_v33 = vsub.f32 %v660_v63, %v2802_v5  ;;  %v2575_v63 = vmov 0.0  }
 0x346   :  { %v610_v57 = vmul.f32 0.6931472, %v2303_v7  ;;  %v2305_v21 = vpop.eup %2304 }
 0x347   :  { %v575_v62 = vmul.f32 1.442695, %v574_v11  ;;  %v662_v15 = vmul.f32 1.442695, %v661_v33  ;;  %v740_v26 = vmul.f32 0.6931472, %v2305_v21 }
 0x348   :  { %v616_v49 = vsel %vm615_vm10, %v613_v6, %v610_v57 }
 0x349   :  { %2306 = vpow2.f32 %v575_v62  ;;  %v617_v19 = vadd.f32 %v616_v49, %v600_v45  ;;  %v746_v12 = vsel %vm745_vm12, %v743_v27, %v740_v26 }
 0x34a   :  { %2308 = vpow2.f32 %v662_v15  ;;  %v747_v30 = vadd.f32 %v746_v12, %v730_v29 }
 0x34b   :  { %v618_v22 = vsel %vm602_vm11, %v603_v13, %v617_v19 }
 0x34c   :  { %v619_v24 = vsub.f32 %v599_v14, %v618_v22  ;;  %v2813_v43 = vsel %vm732_vm13, %v733_v17, %v747_v30 }
 0x34d   :  { %v752_v34 = vrot.slane %v2813_v43, 7 }
 0x34e   :  { %v620_v51 = vmul.f32 1.442695, %v619_v24 }
 0x34f   :  { %v754_v48 = vsel %vm566_vm4, -1e+30, %v752_v34 }
 0x350   :  { %2310 = vpow2.f32 %v620_v51  ;;  %v755_v9 = vadd.f32 %v754_v48, %v2732_v10 }
 0x352   :  { %v760_v6 = vadd.f32 %v759_v56, %v755_v9 }
 0x354   :  { %v761_v33 = vsub.f32 %v760_v6, %v2802_v5 }
 0x356   :  { %v2307_v36 = vpop.eup %2306  ;;  %v762_v62 = vmul.f32 1.442695, %v761_v33 }
 0x357   :  { %v2309_v42 = vpop.eup %2308  ;;  %v577_v37 = vrot.slane %v2307_v36, 4 }
 0x358   :  { %v664_v14 = vrot.slane %v2309_v42, 4  ;;  %2312 = vpow2.f32 %v762_v62 }
 0x359   :  { %v578_v38 = vadd.f32 %v2307_v36, %v577_v37  ;;  %v829_v36 = vadd.f32 %v759_v56, %v754_v48 }
 0x35a   :  { %v665_v32 = vadd.f32 %v2309_v42, %v664_v14 }
 0x35b   :  { %v579_v2 = vrot.slane %v578_v38, 2  ;;  %v831_v34 = vsub.f32 %v2813_v43, %v829_v36 }
 0x35c   :  { %v666_v46 = vrot.slane %v665_v32, 2 }
 0x35d   :  { %v2311_v61 = vpop.eup %2310  ;;  %v580_v55 = vadd.f32 %v579_v2, %v578_v38  ;;  %vm832_vm7 = vcmp.ne.f32.partialorder %v831_v34, %v831_v34 }
 0x35e   :  { %vm623_vm14 = vcmp.lt.f32.partialorder %v622_v50, %v2311_v61  ;;  %v667_v59 = vadd.f32 %v666_v46, %v665_v32 }
 0x35f   :  { %v581_v60 = vrot.slane %v580_v55, 1  ;;  %v2176_v4 = vsel %vm623_vm14, 1.0, %v2575_v63 }
 0x360   :  { %626 = vst [vmem:[#allocation9] sm:$0x1] %v2176_v4  ;;  %v2192_v7 = vtrunc.f32 %v2176_v4  ;;  %v668_v11 = vrot.slane %v667_v59, 1 }
 0x361   :  { %v582_v45 = vadd.f32 %v581_v60, %v580_v55  ;;  %v834_v55 = vand.u32 2147483647, %v831_v34 }
 0x362   :  { %v2193_v57 = vcvt.f32.s32 %v2192_v7  ;;  %v669_v58 = vadd.f32 %v668_v11, %v667_v59 }
 0x363   :  { %583 = vst [vmem:[#allocation8] sm:$0x1] %v582_v45  ;;  %v835_v4 = vsub.f32 0.0, %v834_v55 }
 0x364   :  { %v2824_v13 = vsub.s32 4, %v2193_v57  ;;  %670 = vst [vmem:[#allocation8 + $0x1] sm:$0x1] %v669_v58 }
 0x365   :  { %v2313_v29 = vpop.eup %2312  ;;  %v836_v6 = vmul.f32 1.442695, %v835_v4 }
 0x366   :  { %v671_v15 = vsub.s32 4, %v2824_v13  ;;  %v764_v30 = vrot.slane %v2313_v29, 4  ;;  %vm720_vm8 = vcmp.gt.s32.totalorder %v2824_v13, 0 }
 0x368   :  { %v675_v49 = vrot.slane %v671_v15, %v2746_v39  ;;  %v684_v19 = vadd.s32 1, %v671_v15  ;;  %v765_v14 = vadd.f32 %v2313_v29, %v764_v30 }
 0x36a   :  { %vm676_vm15 = vcmp.eq.s32.totalorder %v2610_v1, %v675_v49  ;;  %v688_v20 = vrot.slane %v684_v19, %v2746_v39  ;;  %v766_v32 = vrot.slane %v765_v14, 2 }
 0x36b   :  { %v677_v21 = vsel %vm676_vm15, %v2748_v41, -1e+30 }
 0x36c   :  { %v678_v22 = vrot.slane %v677_v21, 4  ;;  %vm689_vm0 = vcmp.eq.s32.totalorder %v2610_v1, %v688_v20  ;;  %v767_v46 = vadd.f32 %v766_v32, %v765_v14  ;;  %v833_v14 = vadd.f32 %v829_v36, %v2813_v43  ;;  %v2837_v32 = vld [vmem:[#allocation3 + $0x3] sm:$0x1] }
 0x36d   :  { %v690_v23 = vsel %vm689_vm0, %v2748_v41, -1e+30 }
 0x36e   :  { %v679_v24 = vmax.f32 %v677_v21, %v678_v22  ;;  %v691_v51 = vrot.slane %v690_v23, 4  ;;  %v768_v61 = vrot.slane %v767_v46, 1 }
 0x370   :  { %v680_v26 = vrot.slane %v679_v24, 2  ;;  %v692_v27 = vmax.f32 %v690_v23, %v691_v51  ;;  %v769_v59 = vadd.f32 %v768_v61, %v767_v46 }
 0x372   :  { %v681_v12 = vmax.f32 %v679_v24, %v680_v26  ;;  %v693_v17 = vrot.slane %v692_v27, 2  ;;  %770 = vst [vmem:[#allocation8 + $0x2] sm:$0x1] %v769_v59 }
 0x374   :  { %v682_v42 = vrot.slane %v681_v12, 1  ;;  %v694_v37 = vmax.f32 %v692_v27, %v693_v17 }
 0x376   :  { %v695_v38 = vrot.slane %v694_v37, 1  ;;  %v683_v2 = vmax.f32 %v681_v12, %v682_v42  ;;  %v830_v42 = vmax.f32 %v2813_v43, %v829_v36 }
 0x378   :  { %v696_v50 = vmax.f32 %v694_v37, %v695_v38 }
 0x37a   :  { %v697_v41 = vadd.f32 %v696_v50, %v2768_v35  ;;  %v859_v50 = vrot.slane %v2837_v32, %v2746_v39 }
 0x37c   :  { %v699_v9 = vsub.f32 %v683_v2, %v697_v41  ;;  %v698_v49 = vmax.f32 %v683_v2, %v697_v41  ;;  %v701_v20 = vadd.f32 %v697_v41, %v683_v2 }
 0x37e   :  { %v702_v60 = vand.u32 2147483647, %v699_v9  ;;  %vm700_vm5 = vcmp.ne.f32.partialorder %v699_v9, %v699_v9 }
 0x380   :  { %v703_v48 = vsub.f32 0.0, %v702_v60 }
 0x382   :  { %v704_v56 = vmul.f32 1.442695, %v703_v48 }
 0x384   :  { %2314 = vpow2.f32 %v704_v56 }
 0x385   :  { %2316 = vpow2.f32 %v836_v6 }
 0x391   :  { %v2315_v7 = vpop.eup %2314 }
 0x392   :  { %v706_v11 = vadd.f32 1.0, %v2315_v7  ;;  %v2317_v45 = vpop.eup %2316  ;;  %v709_v57 = vmul.f32 -0.5, %v2315_v7  ;;  %v712_v58 = vand.u32 2147483647, %v2315_v7 }
 0x393   :  { %v838_v33 = vadd.f32 1.0, %v2317_v45  ;;  %v841_v21 = vmul.f32 -0.5, %v2317_v45  ;;  %v844_v29 = vand.u32 2147483647, %v2317_v45 }
 0x394   :  { %2318 = vlog2.f32 %v706_v11  ;;  %v710_v35 = vadd.f32 1.0, %v709_v57  ;;  %vm713_vm3 = vcmp.lt.f32.partialorder %v712_v58, 0.0004427343 }
 0x395   :  { %2320 = vlog2.f32 %v838_v33  ;;  %v842_v51 = vadd.f32 1.0, %v841_v21  ;;  %vm845_vm6 = vcmp.lt.f32.partialorder %v844_v29, 0.0004427343 }
 0x396   :  { %v711_v62 = vmul.f32 %v2315_v7, %v710_v35 }
 0x397   :  { %v843_v30 = vmul.f32 %v2317_v45, %v842_v51 }
 0x3a1   :  { %v2319_v15 = vpop.eup %2318 }
 0x3a2   :  { %v708_v19 = vmul.f32 0.6931472, %v2319_v15  ;;  %v2321_v26 = vpop.eup %2320 }
 0x3a3   :  { %v840_v17 = vmul.f32 0.6931472, %v2321_v26 }
 0x3a4   :  { %v714_v22 = vsel %vm713_vm3, %v711_v62, %v708_v19 }
 0x3a5   :  { %v715_v23 = vadd.f32 %v714_v22, %v698_v49  ;;  %v846_v37 = vsel %vm845_vm6, %v843_v30, %v840_v17 }
 0x3a6   :  { %v847_v38 = vadd.f32 %v846_v37, %v830_v42 }
 0x3a7   :  { %v716_v24 = vsel %vm700_vm5, %v701_v20, %v715_v23 }
 0x3a8   :  { %v717_v27 = vsub.f32 %v697_v41, %v716_v24  ;;  %v2839_v2 = vsel %vm832_vm7, %v833_v14, %v847_v38  ;;  %v722_v41 = vld [vmem:[#allocation6 + $0x1] sm:$0x1] }
 0x3a9   :  { %v852_v46 = vrot.slane %v2839_v2, 7 }
 0x3aa   :  { %v718_v12 = vmul.f32 1.442695, %v717_v27 }
 0x3ab   :  { %v854_v55 = vsel %vm566_vm4, -1e+30, %v852_v46 }
 0x3ac   :  { %2322 = vpow2.f32 %v718_v12  ;;  %v855_v43 = vadd.f32 %v854_v55, %v2723_v44  ;;  %v2847_v36 = vadd.f32 %v859_v50, %v854_v55 }
 0x3ae   :  { %v860_v59 = vadd.f32 %v859_v50, %v855_v43  ;;  %v930_v60 = vmax.f32 %v2839_v2, %v2847_v36  ;;  %v2854_v4 = vsub.f32 %v2839_v2, %v2847_v36  ;;  %v2858_v56 = vadd.f32 %v2847_v36, %v2839_v2 }
 0x3b0   :  { %v861_v6 = vsub.f32 %v860_v59, %v2802_v5  ;;  %v934_v7 = vand.u32 2147483647, %v2854_v4  ;;  %vm932_vm13 = vcmp.ne.f32.partialorder %v2854_v4, %v2854_v4 }
 0x3b2   :  { %v862_v45 = vmul.f32 1.442695, %v861_v6  ;;  %v935_v33 = vsub.f32 0.0, %v934_v7 }
 0x3b4   :  { %2324 = vpow2.f32 %v862_v45  ;;  %v936_v35 = vmul.f32 1.442695, %v935_v33 }
 0x3b6   :  { %2326 = vpow2.f32 %v936_v35 }
 0x3b9   :  { %v2323_v61 = vpop.eup %2322 }
 0x3ba   :  { %v721_v9 = vsel %vm720_vm8, %v2323_v61, 0.0 }
 0x3bb   :  { %vm723_vm9 = vcmp.lt.f32.partialorder %v722_v41, %v721_v9 }
 0x3bc   :  { %v2177_v34 = vsel %vm723_vm9, 1.0, %v2575_v63 }
 0x3bd   :  { %726 = vst [vmem:[#allocation9 + $0x1] sm:$0x1] %v2177_v34  ;;  %v2194_v48 = vtrunc.f32 %v2177_v34 }
 0x3bf   :  { %v2195_v11 = vcvt.f32.s32 %v2194_v48 }
 0x3c1   :  { %v2863_v57 = vsub.s32 %v2824_v13, %v2195_v11  ;;  %v2325_v51 = vpop.eup %2324 }
 0x3c2   :  { %v864_v29 = vrot.slane %v2325_v51, 4 }
 0x3c3   :  { %v771_v58 = vsub.s32 4, %v2863_v57  ;;  %v2327_v12 = vpop.eup %2326  ;;  %vm820_vm14 = vcmp.gt.s32.totalorder %v2863_v57, 0 }
 0x3c4   :  { %v865_v42 = vadd.f32 %v2325_v51, %v864_v29  ;;  %v938_v37 = vadd.f32 1.0, %v2327_v12  ;;  %v941_v61 = vmul.f32 -0.5, %v2327_v12  ;;  %v944_v59 = vand.u32 2147483647, %v2327_v12  ;;  %v822_v29 = vld [vmem:[#allocation6 + $0x2] sm:$0x1] }
 0x3c5   :  { %v775_v62 = vrot.slane %v771_v58, %v2746_v39  ;;  %v784_v15 = vadd.s32 1, %v771_v58 }
 0x3c6   :  { %v866_v38 = vrot.slane %v865_v42, 2  ;;  %2328 = vlog2.f32 %v938_v37  ;;  %v942_v36 = vadd.f32 1.0, %v941_v61  ;;  %vm945_vm10 = vcmp.lt.f32.partialorder %v944_v59, 0.0004427343 }
 0x3c7   :  { %vm776_vm1 = vcmp.eq.s32.totalorder %v2610_v1, %v775_v62  ;;  %v788_v49 = vrot.slane %v784_v15, %v2746_v39 }
 0x3c8   :  { %v777_v19 = vsel %vm776_vm1, %v2732_v10, -1e+30  ;;  %v867_v46 = vadd.f32 %v866_v38, %v865_v42  ;;  %v943_v6 = vmul.f32 %v2327_v12, %v942_v36 }
 0x3c9   :  { %v778_v20 = vrot.slane %v777_v19, 4  ;;  %vm789_vm2 = vcmp.eq.s32.totalorder %v2610_v1, %v788_v49 }
 0x3ca   :  { %v790_v13 = vsel %vm789_vm2, %v2732_v10, -1e+30  ;;  %v868_v41 = vrot.slane %v867_v46, 1 }
 0x3cb   :  { %v779_v21 = vmax.f32 %v777_v19, %v778_v20  ;;  %v791_v22 = vrot.slane %v790_v13, 4 }
 0x3cc   :  { %v869_v9 = vadd.f32 %v868_v41, %v867_v46 }
 0x3cd   :  { %v780_v23 = vrot.slane %v779_v21, 2  ;;  %v792_v24 = vmax.f32 %v790_v13, %v791_v22 }
 0x3ce   :  { %870 = vst [vmem:[#allocation8 + $0x3] sm:$0x1] %v869_v9 }
 0x3cf   :  { %v781_v26 = vmax.f32 %v779_v21, %v780_v23  ;;  %v793_v27 = vrot.slane %v792_v24, 2 }
 0x3d1   :  { %v782_v17 = vrot.slane %v781_v26, 1  ;;  %v794_v30 = vmax.f32 %v792_v24, %v793_v27 }
 0x3d3   :  { %v795_v14 = vrot.slane %v794_v30, 1  ;;  %v783_v2 = vmax.f32 %v781_v26, %v782_v17  ;;  %v2329_v7 = vpop.eup %2328  ;;  %v2880_v17 = vld [vmem:[#allocation3 + $0x4] sm:$0x1] }
 0x3d4   :  { %v940_v11 = vmul.f32 0.6931472, %v2329_v7 }
 0x3d5   :  { %v796_v50 = vmax.f32 %v794_v30, %v795_v14  ;;  %v959_v14 = vrot.slane %v2880_v17, %v2746_v39 }
 0x3d6   :  { %v946_v45 = vsel %vm945_vm10, %v943_v6, %v940_v11 }
 0x3d7   :  { %v797_v10 = vadd.f32 %v796_v50, %v2816_v52  ;;  %v947_v33 = vadd.f32 %v946_v45, %v930_v60 }
 0x3d9   :  { %v799_v55 = vsub.f32 %v783_v2, %v797_v10  ;;  %v798_v20 = vmax.f32 %v783_v2, %v797_v10  ;;  %v801_v21 = vadd.f32 %v797_v10, %v783_v2  ;;  %v2876_v60 = vsel %vm932_vm13, %v2858_v56, %v947_v33 }
 0x3da   :  { %v952_v27 = vrot.slane %v2876_v60, 7 }
 0x3db   :  { %v802_v43 = vand.u32 2147483647, %v799_v55  ;;  %vm800_vm12 = vcmp.ne.f32.partialorder %v799_v55, %v799_v55 }
 0x3dc   :  { %v954_v30 = vsel %vm566_vm4, -1e+30, %v952_v27 }
 0x3dd   :  { %v803_v34 = vsub.f32 0.0, %v802_v43  ;;  %v955_v37 = vadd.f32 %v954_v30, %v2714_v18 }
 0x3df   :  { %v804_v48 = vmul.f32 1.442695, %v803_v34  ;;  %v960_v56 = vadd.f32 %v959_v14, %v955_v37 }
 0x3e1   :  { %2330 = vpow2.f32 %v804_v48  ;;  %v961_v2 = vsub.f32 %v960_v56, %v2802_v5 }
 0x3e3   :  { %v962_v46 = vmul.f32 1.442695, %v961_v2 }
 0x3ee   :  { %v2331_v35 = vpop.eup %2330 }
 0x3ef   :  { %v806_v58 = vadd.f32 1.0, %v2331_v35  ;;  %v809_v52 = vmul.f32 -0.5, %v2331_v35  ;;  %v812_v15 = vand.u32 2147483647, %v2331_v35 }
 0x3f1   :  { %2332 = vlog2.f32 %v806_v58  ;;  %v810_v62 = vadd.f32 1.0, %v809_v52  ;;  %vm813_vm11 = vcmp.lt.f32.partialorder %v812_v15, 0.0004427343 }
 0x3f3   :  { %v811_v49 = vmul.f32 %v2331_v35, %v810_v62  ;;  %v1029_v35 = vadd.f32 %v959_v14, %v954_v30 }
 0x3fe   :  { %v2333_v19 = vpop.eup %2332 }
 0x3ff   :  { %v808_v13 = vmul.f32 0.6931472, %v2333_v19  ;;  %v1031_v19 = vsub.f32 %v2876_v60, %v1029_v35 }
 0x401   :  { %v814_v22 = vsel %vm813_vm11, %v811_v49, %v808_v13  ;;  %vm1032_vm8 = vcmp.ne.f32.partialorder %v1031_v19, %v1031_v19 }
 0x402   :  { %v815_v23 = vadd.f32 %v814_v22, %v798_v20 }
 0x404   :  { %v816_v24 = vsel %vm800_vm12, %v801_v21, %v815_v23  ;;  %v1034_v23 = vand.u32 2147483647, %v1031_v19 }
 0x405   :  { %v817_v51 = vsub.f32 %v797_v10, %v816_v24 }
 0x406   :  { %v1035_v27 = vsub.f32 0.0, %v1034_v23 }
 0x407   :  { %v818_v26 = vmul.f32 1.442695, %v817_v51 }
 0x408   :  { %v1036_v30 = vmul.f32 1.442695, %v1035_v27 }
 0x409   :  { %2334 = vpow2.f32 %v818_v26 }
 0x40a   :  { %2336 = vpow2.f32 %v962_v46 }
 0x416   :  { %v2335_v12 = vpop.eup %2334 }
 0x417   :  { %v821_v42 = vsel %vm820_vm14, %v2335_v12, 0.0  ;;  %v2337_v7 = vpop.eup %2336 }
 0x418   :  { %vm823_vm15 = vcmp.lt.f32.partialorder %v822_v29, %v821_v42  ;;  %v964_v33 = vrot.slane %v2337_v7, 4 }
 0x419   :  { %v2178_v4 = vsel %vm823_vm15, 1.0, %v2575_v63 }
 0x41a   :  { %826 = vst [vmem:[#allocation9 + $0x2] sm:$0x1] %v2178_v4  ;;  %v2196_v38 = vtrunc.f32 %v2178_v4  ;;  %v965_v62 = vadd.f32 %v2337_v7, %v964_v33 }
 0x41c   :  { %v2197_v50 = vcvt.f32.s32 %v2196_v38  ;;  %v966_v49 = vrot.slane %v965_v62, 2 }
 0x41e   :  { %v2889_v10 = vsub.s32 %v2863_v57, %v2197_v50  ;;  %v967_v21 = vadd.f32 %v966_v49, %v965_v62  ;;  %v2902_v62 = vld [vmem:[#allocation3 + $0x5] sm:$0x1] }
 0x41f   :  { %v1059_v49 = vrot.slane %v2902_v62, %v2746_v39 }
 0x420   :  { %v871_v41 = vsub.s32 4, %v2889_v10  ;;  %v968_v22 = vrot.slane %v967_v21, 1  ;;  %vm920_vm9 = vcmp.gt.s32.totalorder %v2889_v10, 0 }
 0x422   :  { %v875_v61 = vrot.slane %v871_v41, %v2746_v39  ;;  %v884_v55 = vadd.s32 1, %v871_v41  ;;  %v969_v51 = vadd.f32 %v968_v22, %v967_v21 }
 0x424   :  { %vm876_vm0 = vcmp.eq.s32.totalorder %v2610_v1, %v875_v61  ;;  %v888_v9 = vrot.slane %v884_v55, %v2746_v39  ;;  %970 = vst [vmem:[#allocation8 + $0x4] sm:$0x1] %v969_v51 }
 0x425   :  { %v877_v43 = vsel %vm876_vm0, %v2723_v44, -1e+30 }
 0x426   :  { %v878_v36 = vrot.slane %v877_v43, 4  ;;  %vm889_vm3 = vcmp.eq.s32.totalorder %v2610_v1, %v888_v9 }
 0x427   :  { %v890_v34 = vsel %vm889_vm3, %v2723_v44, -1e+30 }
 0x428   :  { %v879_v59 = vmax.f32 %v877_v43, %v878_v36  ;;  %v891_v57 = vrot.slane %v890_v34, 4 }
 0x42a   :  { %v880_v48 = vrot.slane %v879_v59, 2  ;;  %v892_v6 = vmax.f32 %v890_v34, %v891_v57 }
 0x42c   :  { %v881_v11 = vmax.f32 %v879_v59, %v880_v48  ;;  %v893_v45 = vrot.slane %v892_v6, 2 }
 0x42e   :  { %v882_v58 = vrot.slane %v881_v11, 1  ;;  %v894_v52 = vmax.f32 %v892_v6, %v893_v45  ;;  %v1030_v45 = vmax.f32 %v2876_v60, %v1029_v35 }
 0x430   :  { %v895_v15 = vrot.slane %v894_v52, 1  ;;  %v883_v20 = vmax.f32 %v881_v11, %v882_v58  ;;  %v1033_v58 = vadd.f32 %v1029_v35, %v2876_v60 }
 0x432   :  { %v896_v13 = vmax.f32 %v894_v52, %v895_v15 }
 0x434   :  { %v897_v44 = vadd.f32 %v896_v13, %v2837_v32  ;;  %v922_v13 = vld [vmem:[#allocation6 + $0x3] sm:$0x1] }
 0x436   :  { %v899_v24 = vsub.f32 %v883_v20, %v897_v44  ;;  %v898_v46 = vmax.f32 %v883_v20, %v897_v44  ;;  %v901_v61 = vadd.f32 %v897_v44, %v883_v20 }
 0x438   :  { %v902_v26 = vand.u32 2147483647, %v899_v24  ;;  %vm900_vm6 = vcmp.ne.f32.partialorder %v899_v24, %v899_v24 }
 0x43a   :  { %v903_v29 = vsub.f32 0.0, %v902_v26 }
 0x43c   :  { %v904_v12 = vmul.f32 1.442695, %v903_v29 }
 0x43e   :  { %2338 = vpow2.f32 %v904_v12 }
 0x43f   :  { %2340 = vpow2.f32 %v1036_v30 }
 0x44b   :  { %v2339_v42 = vpop.eup %2338 }
 0x44c   :  { %v906_v37 = vadd.f32 1.0, %v2339_v42  ;;  %v2341_v14 = vpop.eup %2340  ;;  %v909_v56 = vmul.f32 -0.5, %v2339_v42  ;;  %v912_v38 = vand.u32 2147483647, %v2339_v42 }
 0x44d   :  { %v1038_v4 = vadd.f32 1.0, %v2341_v14  ;;  %v1041_v55 = vmul.f32 -0.5, %v2341_v14  ;;  %v1044_v48 = vand.u32 2147483647, %v2341_v14 }
 0x44e   :  { %2342 = vlog2.f32 %v906_v37  ;;  %v910_v32 = vadd.f32 1.0, %v909_v56  ;;  %vm913_vm5 = vcmp.lt.f32.partialorder %v912_v38, 0.0004427343 }
 0x44f   :  { %2344 = vlog2.f32 %v1038_v4  ;;  %v1042_v34 = vadd.f32 1.0, %v1041_v55  ;;  %vm1045_vm7 = vcmp.lt.f32.partialorder %v1044_v48, 0.0004427343 }
 0x450   :  { %v911_v2 = vmul.f32 %v2339_v42, %v910_v32 }
 0x451   :  { %v1043_v11 = vmul.f32 %v2341_v14, %v1042_v34 }
 0x45b   :  { %v2343_v50 = vpop.eup %2342 }
 0x45c   :  { %v908_v41 = vmul.f32 0.6931472, %v2343_v50  ;;  %v2345_v59 = vpop.eup %2344 }
 0x45d   :  { %v1040_v7 = vmul.f32 0.6931472, %v2345_v59 }
 0x45e   :  { %v914_v9 = vsel %vm913_vm5, %v911_v2, %v908_v41 }
 0x45f   :  { %v915_v43 = vadd.f32 %v914_v9, %v898_v46  ;;  %v1046_v33 = vsel %vm1045_vm7, %v1043_v11, %v1040_v7 }
 0x460   :  { %v1047_v52 = vadd.f32 %v1046_v33, %v1030_v45 }
 0x461   :  { %v916_v36 = vsel %vm900_vm6, %v901_v61, %v915_v43 }
 0x462   :  { %v917_v57 = vsub.f32 %v897_v44, %v916_v36  ;;  %v2904_v15 = vsel %vm1032_vm8, %v1033_v58, %v1047_v52 }
 0x463   :  { %v1052_v20 = vrot.slane %v2904_v15, 7 }
 0x464   :  { %v918_v6 = vmul.f32 1.442695, %v917_v57 }
 0x465   :  { %v1054_v44 = vsel %vm566_vm4, -1e+30, %v1052_v20 }
 0x466   :  { %2346 = vpow2.f32 %v918_v6  ;;  %v1055_v60 = vadd.f32 %v1054_v44, %v2705_v53  ;;  %v2912_v35 = vadd.f32 %v1059_v49, %v1054_v44 }
 0x468   :  { %v1060_v23 = vadd.f32 %v1059_v49, %v1055_v60  ;;  %v1130_v24 = vmax.f32 %v2904_v15, %v2912_v35  ;;  %v2919_v51 = vsub.f32 %v2904_v15, %v2912_v35  ;;  %v2923_v27 = vadd.f32 %v2912_v35, %v2904_v15 }
 0x46a   :  { %v1061_v29 = vsub.f32 %v1060_v23, %v2802_v5  ;;  %v1134_v12 = vand.u32 2147483647, %v2919_v51  ;;  %vm1132_vm14 = vcmp.ne.f32.partialorder %v2919_v51, %v2919_v51 }
 0x46c   :  { %v1062_v42 = vmul.f32 1.442695, %v1061_v29  ;;  %v1135_v37 = vsub.f32 0.0, %v1134_v12 }
 0x46e   :  { %2348 = vpow2.f32 %v1062_v42  ;;  %v1136_v4 = vmul.f32 1.442695, %v1135_v37 }
 0x470   :  { %2350 = vpow2.f32 %v1136_v4 }
 0x473   :  { %v2347_v21 = vpop.eup %2346 }
 0x474   :  { %v921_v22 = vsel %vm920_vm9, %v2347_v21, 0.0 }
 0x475   :  { %vm923_vm1 = vcmp.lt.f32.partialorder %v922_v13, %v921_v22 }
 0x476   :  { %v2179_v19 = vsel %vm923_vm1, 1.0, %v2575_v63 }
 0x477   :  { %926 = vst [vmem:[#allocation9 + $0x3] sm:$0x1] %v2179_v19  ;;  %v2198_v26 = vtrunc.f32 %v2179_v19 }
 0x479   :  { %v2199_v30 = vcvt.f32.s32 %v2198_v26 }
 0x47b   :  { %v2928_v14 = vsub.s32 %v2889_v10, %v2199_v30  ;;  %v2349_v43 = vpop.eup %2348 }
 0x47c   :  { %v1064_v59 = vrot.slane %v2349_v43, 4 }
 0x47d   :  { %v971_v56 = vsub.s32 4, %v2928_v14  ;;  %v2351_v57 = vpop.eup %2350  ;;  %vm1020_vm15 = vcmp.gt.s32.totalorder %v2928_v14, 0 }
 0x47e   :  { %v1065_v7 = vadd.f32 %v2349_v43, %v1064_v59  ;;  %v1138_v11 = vadd.f32 1.0, %v2351_v57  ;;  %v1141_v20 = vmul.f32 -0.5, %v2351_v57  ;;  %v1144_v35 = vand.u32 2147483647, %v2351_v57  ;;  %v2945_v59 = vld [vmem:[#allocation3 + $0x6] sm:$0x1] }
 0x47f   :  { %v975_v32 = vrot.slane %v971_v56, %v2746_v39  ;;  %v984_v38 = vadd.s32 1, %v971_v56 }
 0x480   :  { %v1066_v33 = vrot.slane %v1065_v7, 2  ;;  %2352 = vlog2.f32 %v1138_v11  ;;  %v1142_v22 = vadd.f32 1.0, %v1141_v20  ;;  %vm1145_vm11 = vcmp.lt.f32.partialorder %v1144_v35, 0.0004427343 }
 0x481   :  { %vm976_vm2 = vcmp.eq.s32.totalorder %v2610_v1, %v975_v32  ;;  %v988_v2 = vrot.slane %v984_v38, %v2746_v39 }
 0x482   :  { %v977_v50 = vsel %vm976_vm2, %v2714_v18, -1e+30  ;;  %v1067_v15 = vadd.f32 %v1066_v33, %v1065_v7  ;;  %v1143_v23 = vmul.f32 %v2351_v57, %v1142_v22  ;;  %v1159_v7 = vrot.slane %v2945_v59, %v2746_v39 }
 0x483   :  { %v978_v46 = vrot.slane %v977_v50, 4  ;;  %vm989_vm10 = vcmp.eq.s32.totalorder %v2610_v1, %v988_v2 }
 0x484   :  { %v990_v10 = vsel %vm989_vm10, %v2714_v18, -1e+30  ;;  %v1068_v49 = vrot.slane %v1067_v15, 1 }
 0x485   :  { %v979_v41 = vmax.f32 %v977_v50, %v978_v46  ;;  %v991_v61 = vrot.slane %v990_v10, 4 }
 0x486   :  { %v1069_v21 = vadd.f32 %v1068_v49, %v1067_v15 }
 0x487   :  { %v980_v55 = vrot.slane %v979_v41, 2  ;;  %v992_v9 = vmax.f32 %v990_v10, %v991_v61 }
 0x488   :  { %1070 = vst [vmem:[#allocation8 + $0x5] sm:$0x1] %v1069_v21 }
 0x489   :  { %v981_v36 = vmax.f32 %v979_v41, %v980_v55  ;;  %v993_v34 = vrot.slane %v992_v9, 2 }
 0x48b   :  { %v982_v48 = vrot.slane %v981_v36, 1  ;;  %v994_v6 = vmax.f32 %v992_v9, %v993_v34 }
 0x48d   :  { %v995_v45 = vrot.slane %v994_v6, 1  ;;  %v983_v58 = vmax.f32 %v981_v36, %v982_v48  ;;  %v2353_v26 = vpop.eup %2352  ;;  %v1022_v36 = vld [vmem:[#allocation6 + $0x4] sm:$0x1] }
 0x48e   :  { %v1140_v29 = vmul.f32 0.6931472, %v2353_v26 }
 0x48f   :  { %v996_v52 = vmax.f32 %v994_v6, %v995_v45 }
 0x490   :  { %v1146_v12 = vsel %vm1145_vm11, %v1143_v23, %v1140_v29 }
 0x491   :  { %v997_v18 = vadd.f32 %v996_v52, %v2880_v17  ;;  %v1147_v30 = vadd.f32 %v1146_v12, %v1130_v24 }
 0x493   :  { %v999_v13 = vsub.f32 %v983_v58, %v997_v18  ;;  %v998_v2 = vmax.f32 %v983_v58, %v997_v18  ;;  %v1001_v46 = vadd.f32 %v997_v18, %v983_v58  ;;  %v2941_v24 = vsel %vm1132_vm14, %v2923_v27, %v1147_v30 }
 0x494   :  { %v1152_v43 = vrot.slane %v2941_v24, 7 }
 0x495   :  { %v1002_v44 = vand.u32 2147483647, %v999_v13  ;;  %vm1000_vm13 = vcmp.ne.f32.partialorder %v999_v13, %v999_v13 }
 0x496   :  { %v1154_v57 = vsel %vm566_vm4, -1e+30, %v1152_v43 }
 0x497   :  { %v1003_v60 = vsub.f32 0.0, %v1002_v44  ;;  %v1155_v6 = vadd.f32 %v1154_v57, %v2696_v28  ;;  %v1229_v12 = vadd.f32 %v1159_v7, %v1154_v57 }
 0x499   :  { %v1004_v19 = vmul.f32 1.442695, %v1003_v60  ;;  %v1160_v27 = vadd.f32 %v1159_v7, %v1155_v6 }
 0x49b   :  { %2354 = vpow2.f32 %v1004_v19  ;;  %v1161_v45 = vsub.f32 %v1160_v27, %v2802_v5 }
 0x49d   :  { %v1162_v58 = vmul.f32 1.442695, %v1161_v45 }
 0x4a8   :  { %v2355_v42 = vpop.eup %2354 }
 0x4a9   :  { %v1006_v37 = vadd.f32 1.0, %v2355_v42  ;;  %v1009_v17 = vmul.f32 -0.5, %v2355_v42  ;;  %v1012_v56 = vand.u32 2147483647, %v2355_v42 }
 0x4ab   :  { %2356 = vlog2.f32 %v1006_v37  ;;  %v1010_v4 = vadd.f32 1.0, %v1009_v17  ;;  %vm1013_vm12 = vcmp.lt.f32.partialorder %v1012_v56, 0.0004427343  ;;  %v1231_v56 = vsub.f32 %v2941_v24, %v1229_v12 }
 0x4ad   :  { %v1011_v32 = vmul.f32 %v2355_v42, %v1010_v4  ;;  %vm1232_vm9 = vcmp.ne.f32.partialorder %v1231_v56, %v1231_v56 }
 0x4b8   :  { %v2357_v38 = vpop.eup %2356 }
 0x4b9   :  { %v1008_v50 = vmul.f32 0.6931472, %v2357_v38 }
 0x4bb   :  { %v1014_v10 = vsel %vm1013_vm12, %v1011_v32, %v1008_v50 }
 0x4bc   :  { %v1015_v41 = vadd.f32 %v1014_v10, %v998_v2 }
 0x4be   :  { %v1016_v61 = vsel %vm1000_vm13, %v1001_v46, %v1015_v41  ;;  %v1234_v46 = vand.u32 2147483647, %v1231_v56 }
 0x4bf   :  { %v1017_v55 = vsub.f32 %v997_v18, %v1016_v61 }
 0x4c1   :  { %v1018_v9 = vmul.f32 1.442695, %v1017_v55  ;;  %v1235_v55 = vsub.f32 0.0, %v1234_v46 }
 0x4c3   :  { %2358 = vpow2.f32 %v1018_v9 }
 0x4c4   :  { %2360 = vpow2.f32 %v1162_v58 }
 0x4d0   :  { %v2359_v34 = vpop.eup %2358 }
 0x4d1   :  { %v1021_v48 = vsel %vm1020_vm15, %v2359_v34, 0.0  ;;  %v2361_v19 = vpop.eup %2360 }
 0x4d2   :  { %vm1023_vm0 = vcmp.lt.f32.partialorder %v1022_v36, %v1021_v48  ;;  %v1164_v29 = vrot.slane %v2361_v19, 4  ;;  %v1236_v36 = vmul.f32 1.442695, %v1235_v55 }
 0x4d3   :  { %v2180_v51 = vsel %vm1023_vm0, 1.0, %v2575_v63 }
 0x4d4   :  { %1026 = vst [vmem:[#allocation9 + $0x4] sm:$0x1] %v2180_v51  ;;  %v2200_v11 = vtrunc.f32 %v2180_v51  ;;  %v1165_v37 = vadd.f32 %v2361_v19, %v1164_v29  ;;  %v1230_v19 = vmax.f32 %v2941_v24, %v1229_v12 }
 0x4d6   :  { %v2201_v33 = vcvt.f32.s32 %v2200_v11  ;;  %v1166_v4 = vrot.slane %v1165_v37, 2 }
 0x4d8   :  { %v2954_v52 = vsub.s32 %v2928_v14, %v2201_v33  ;;  %v1167_v2 = vadd.f32 %v1166_v4, %v1165_v37  ;;  %v1122_v4 = vld [vmem:[#allocation6 + $0x5] sm:$0x1] }
 0x4da   :  { %v1071_v15 = vsub.s32 4, %v2954_v52  ;;  %v1168_v50 = vrot.slane %v1167_v2, 1  ;;  %vm1120_vm1 = vcmp.gt.s32.totalorder %v2954_v52, 0 }
 0x4dc   :  { %v1075_v18 = vrot.slane %v1071_v15, %v2746_v39  ;;  %v1084_v49 = vadd.s32 1, %v1071_v15  ;;  %v1169_v41 = vadd.f32 %v1168_v50, %v1167_v2 }
 0x4de   :  { %vm1076_vm3 = vcmp.eq.s32.totalorder %v2610_v1, %v1075_v18  ;;  %v1088_v20 = vrot.slane %v1084_v49, %v2746_v39  ;;  %1170 = vst [vmem:[#allocation8 + $0x6] sm:$0x1] %v1169_v41 }
 0x4df   :  { %v1077_v13 = vsel %vm1076_vm3, %v2705_v53, -1e+30 }
 0x4e0   :  { %v1078_v21 = vrot.slane %v1077_v13, 4  ;;  %vm1089_vm5 = vcmp.eq.s32.totalorder %v2610_v1, %v1088_v20 }
 0x4e1   :  { %v1090_v44 = vsel %vm1089_vm5, %v2705_v53, -1e+30 }
 0x4e2   :  { %v1079_v22 = vmax.f32 %v1077_v13, %v1078_v21  ;;  %v1091_v14 = vrot.slane %v1090_v44, 4 }
 0x4e4   :  { %v1080_v60 = vrot.slane %v1079_v22, 2  ;;  %v1092_v35 = vmax.f32 %v1090_v44, %v1091_v14 }
 0x4e6   :  { %v1081_v23 = vmax.f32 %v1079_v22, %v1080_v60  ;;  %v1093_v26 = vrot.slane %v1092_v35, 2 }
 0x4e8   :  { %v1082_v30 = vrot.slane %v1081_v23, 1  ;;  %v1094_v42 = vmax.f32 %v1092_v35, %v1093_v26  ;;  %v1233_v26 = vadd.f32 %v1229_v12, %v2941_v24 }
 0x4ea   :  { %v1095_v17 = vrot.slane %v1094_v42, 1  ;;  %v1083_v32 = vmax.f32 %v1081_v23, %v1082_v30  ;;  %v2967_v30 = vld [vmem:[#allocation3 + $0x7] sm:$0x1] }
 0x4eb   :  { %v1259_v37 = vrot.slane %v2967_v30, %v2746_v39 }
 0x4ec   :  { %v1096_v38 = vmax.f32 %v1094_v42, %v1095_v17 }
 0x4ee   :  { %v1097_v53 = vadd.f32 %v1096_v38, %v2902_v62 }
 0x4f0   :  { %v1099_v10 = vsub.f32 %v1083_v32, %v1097_v53  ;;  %v1098_v45 = vmax.f32 %v1083_v32, %v1097_v53  ;;  %v1101_v58 = vadd.f32 %v1097_v53, %v1083_v32 }
 0x4f2   :  { %v1102_v61 = vand.u32 2147483647, %v1099_v10  ;;  %vm1100_vm7 = vcmp.ne.f32.partialorder %v1099_v10, %v1099_v10 }
 0x4f4   :  { %v1103_v9 = vsub.f32 0.0, %v1102_v61 }
 0x4f6   :  { %v1104_v43 = vmul.f32 1.442695, %v1103_v9 }
 0x4f8   :  { %2362 = vpow2.f32 %v1104_v43 }
 0x4f9   :  { %2364 = vpow2.f32 %v1236_v36 }
 0x505   :  { %v2363_v34 = vpop.eup %2362 }
 0x506   :  { %v1106_v57 = vadd.f32 1.0, %v2363_v34  ;;  %v2365_v48 = vpop.eup %2364  ;;  %v1109_v7 = vmul.f32 -0.5, %v2363_v34  ;;  %v1112_v51 = vand.u32 2147483647, %v2363_v34 }
 0x507   :  { %v1238_v6 = vadd.f32 1.0, %v2365_v48  ;;  %v1241_v15 = vmul.f32 -0.5, %v2365_v48  ;;  %v1244_v22 = vand.u32 2147483647, %v2365_v48 }
 0x508   :  { %2366 = vlog2.f32 %v1106_v57  ;;  %v1110_v62 = vadd.f32 1.0, %v1109_v7  ;;  %vm1113_vm6 = vcmp.lt.f32.partialorder %v1112_v51, 0.0004427343 }
 0x509   :  { %2368 = vlog2.f32 %v1238_v6  ;;  %v1242_v13 = vadd.f32 1.0, %v1241_v15  ;;  %vm1245_vm8 = vcmp.lt.f32.partialorder %v1244_v22, 0.0004427343 }
 0x50a   :  { %v1111_v27 = vmul.f32 %v2363_v34, %v1110_v62 }
 0x50b   :  { %v1243_v35 = vmul.f32 %v2365_v48, %v1242_v13 }
 0x515   :  { %v2367_v11 = vpop.eup %2366 }
 0x516   :  { %v1108_v33 = vmul.f32 0.6931472, %v2367_v11  ;;  %v2369_v21 = vpop.eup %2368 }
 0x517   :  { %v1240_v60 = vmul.f32 0.6931472, %v2369_v21 }
 0x518   :  { %v1114_v18 = vsel %vm1113_vm6, %v1111_v27, %v1108_v33 }
 0x519   :  { %v1115_v49 = vadd.f32 %v1114_v18, %v1098_v45  ;;  %v1246_v23 = vsel %vm1245_vm8, %v1243_v35, %v1240_v60 }
 0x51a   :  { %v1247_v29 = vadd.f32 %v1246_v23, %v1230_v19 }
 0x51b   :  { %v1116_v20 = vsel %vm1100_vm7, %v1101_v58, %v1115_v49 }
 0x51c   :  { %v1117_v44 = vsub.f32 %v1097_v53, %v1116_v20  ;;  %v2969_v42 = vsel %vm1232_vm9, %v1233_v26, %v1247_v29 }
 0x51d   :  { %v1252_v17 = vrot.slane %v2969_v42, 7 }
 0x51e   :  { %v1118_v14 = vmul.f32 1.442695, %v1117_v44 }
 0x51f   :  { %v1254_v38 = vsel %vm566_vm4, -1e+30, %v1252_v17 }
 0x520   :  { %2370 = vpow2.f32 %v1118_v14  ;;  %v1255_v24 = vadd.f32 %v1254_v38, %v2687_v0  ;;  %v2977_v12 = vadd.f32 %v1259_v37, %v1254_v38 }
 0x522   :  { %v1260_v53 = vadd.f32 %v1259_v37, %v1255_v24  ;;  %v1330_v50 = vmax.f32 %v2969_v42, %v2977_v12  ;;  %v2984_v46 = vsub.f32 %v2969_v42, %v2977_v12  ;;  %v2988_v41 = vadd.f32 %v2977_v12, %v2969_v42 }
 0x524   :  { %v1261_v61 = vsub.f32 %v1260_v53, %v2802_v5  ;;  %v1334_v55 = vand.u32 2147483647, %v2984_v46  ;;  %vm1332_vm15 = vcmp.ne.f32.partialorder %v2984_v46, %v2984_v46 }
 0x526   :  { %v1262_v43 = vmul.f32 1.442695, %v1261_v61  ;;  %v1335_v36 = vsub.f32 0.0, %v1334_v55 }
 0x528   :  { %2372 = vpow2.f32 %v1262_v43  ;;  %v1336_v57 = vmul.f32 1.442695, %v1335_v36 }
 0x52a   :  { %2374 = vpow2.f32 %v1336_v57 }
 0x52d   :  { %v2371_v32 = vpop.eup %2370 }
 0x52e   :  { %v1121_v2 = vsel %vm1120_vm1, %v2371_v32, 0.0 }
 0x52f   :  { %vm1123_vm2 = vcmp.lt.f32.partialorder %v1122_v4, %v1121_v2 }
 0x530   :  { %v2181_v56 = vsel %vm1123_vm2, 1.0, %v2575_v63 }
 0x531   :  { %1126 = vst [vmem:[#allocation9 + $0x5] sm:$0x1] %v2181_v56  ;;  %v2202_v10 = vtrunc.f32 %v2181_v56 }
 0x533   :  { %v2203_v9 = vcvt.f32.s32 %v2202_v10 }
 0x535   :  { %v2993_v34 = vsub.s32 %v2954_v52, %v2203_v9  ;;  %v2373_v15 = vpop.eup %2372 }
 0x536   :  { %v1264_v20 = vrot.slane %v2373_v15, 4 }
 0x537   :  { %v1171_v48 = vsub.s32 4, %v2993_v34  ;;  %v2375_v13 = vpop.eup %2374  ;;  %vm1220_vm0 = vcmp.gt.s32.totalorder %v2993_v34, 0 }
 0x538   :  { %v1265_v22 = vadd.f32 %v2373_v15, %v1264_v20  ;;  %v1338_v14 = vadd.f32 1.0, %v2375_v13  ;;  %v1341_v42 = vmul.f32 -0.5, %v2375_v13  ;;  %v1344_v2 = vand.u32 2147483647, %v2375_v13 }
 0x539   :  { %v1175_v6 = vrot.slane %v1171_v48, %v2746_v39  ;;  %v1184_v7 = vadd.s32 1, %v1171_v48 }
 0x53a   :  { %v1266_v35 = vrot.slane %v1265_v22, 2  ;;  %2376 = vlog2.f32 %v1338_v14  ;;  %v1342_v32 = vadd.f32 1.0, %v1341_v42  ;;  %vm1345_vm12 = vcmp.lt.f32.partialorder %v1344_v2, 0.0004427343 }
 0x53b   :  { %vm1176_vm10 = vcmp.eq.s32.totalorder %v2610_v1, %v1175_v6  ;;  %v1188_v62 = vrot.slane %v1184_v7, %v2746_v39 }
 0x53c   :  { %v1177_v51 = vsel %vm1176_vm10, %v2696_v28, -1e+30  ;;  %v1267_v26 = vadd.f32 %v1266_v35, %v1265_v22  ;;  %v1343_v12 = vmul.f32 %v2375_v13, %v1342_v32 }
 0x53d   :  { %v1178_v27 = vrot.slane %v1177_v51, 4  ;;  %vm1189_vm11 = vcmp.eq.s32.totalorder %v2610_v1, %v1188_v62 }
 0x53e   :  { %v1190_v52 = vsel %vm1189_vm11, %v2696_v28, -1e+30  ;;  %v1268_v29 = vrot.slane %v1267_v26, 1 }
 0x53f   :  { %v1179_v11 = vmax.f32 %v1177_v51, %v1178_v27  ;;  %v1191_v45 = vrot.slane %v1190_v52, 4 }
 0x540   :  { %v1269_v17 = vadd.f32 %v1268_v29, %v1267_v26 }
 0x541   :  { %v1180_v33 = vrot.slane %v1179_v11, 2  ;;  %v1192_v58 = vmax.f32 %v1190_v52, %v1191_v45 }
 0x542   :  { %1270 = vst [vmem:[#allocation8 + $0x7] sm:$0x1] %v1269_v17 }
 0x543   :  { %v1181_v18 = vmax.f32 %v1179_v11, %v1180_v33  ;;  %v1193_v49 = vrot.slane %v1192_v58, 2 }
 0x545   :  { %v1182_v21 = vrot.slane %v1181_v18, 1  ;;  %v1194_v44 = vmax.f32 %v1192_v58, %v1193_v49  ;;  %v1222_v58 = vld [vmem:[#allocation6 + $0x6] sm:$0x1] }
 0x547   :  { %v1195_v60 = vrot.slane %v1194_v44, 1  ;;  %v1183_v19 = vmax.f32 %v1181_v18, %v1182_v21  ;;  %v2377_v56 = vpop.eup %2376  ;;  %v3010_v18 = vld [vmem:[#allocation3 + $0x8] sm:$0x1] }
 0x548   :  { %v1340_v53 = vmul.f32 0.6931472, %v2377_v56  ;;  %v1359_v21 = vrot.slane %v3010_v18, %v2746_v39 }
 0x549   :  { %v1196_v23 = vmax.f32 %v1194_v44, %v1195_v60 }
 0x54a   :  { %v1346_v10 = vsel %vm1345_vm12, %v1343_v12, %v1340_v53 }
 0x54b   :  { %v1197_v28 = vadd.f32 %v1196_v23, %v2945_v59  ;;  %v1347_v61 = vadd.f32 %v1346_v10, %v1330_v50 }
 0x54d   :  { %v1199_v37 = vsub.f32 %v1183_v19, %v1197_v28  ;;  %v1198_v6 = vmax.f32 %v1183_v19, %v1197_v28  ;;  %v1201_v62 = vadd.f32 %v1197_v28, %v1183_v19  ;;  %v3006_v50 = vsel %vm1332_vm15, %v2988_v41, %v1347_v61 }
 0x54e   :  { %v1352_v33 = vrot.slane %v3006_v50, 7 }
 0x54f   :  { %v1202_v4 = vand.u32 2147483647, %v1199_v37  ;;  %vm1200_vm14 = vcmp.ne.f32.partialorder %v1199_v37, %v1199_v37 }
 0x550   :  { %v1354_v49 = vsel %vm566_vm4, -1e+30, %v1352_v33 }
 0x551   :  { %v1203_v38 = vsub.f32 0.0, %v1202_v4  ;;  %v1355_v13 = vadd.f32 %v1354_v49, %v2678_v40  ;;  %v1429_v56 = vadd.f32 %v1359_v21, %v1354_v49 }
 0x553   :  { %v1204_v24 = vmul.f32 1.442695, %v1203_v38  ;;  %v1360_v41 = vadd.f32 %v1359_v21, %v1355_v13 }
 0x555   :  { %2378 = vpow2.f32 %v1204_v24  ;;  %v1361_v22 = vsub.f32 %v1360_v41, %v2802_v5 }
 0x557   :  { %v1362_v60 = vmul.f32 1.442695, %v1361_v22 }
 0x562   :  { %v2379_v55 = vpop.eup %2378 }
 0x563   :  { %v1206_v9 = vadd.f32 1.0, %v2379_v55  ;;  %v1209_v59 = vmul.f32 -0.5, %v2379_v55  ;;  %v1212_v36 = vand.u32 2147483647, %v2379_v55 }
 0x565   :  { %2380 = vlog2.f32 %v1206_v9  ;;  %v1210_v43 = vadd.f32 1.0, %v1209_v59  ;;  %vm1213_vm13 = vcmp.lt.f32.partialorder %v1212_v36, 0.0004427343  ;;  %v1431_v59 = vsub.f32 %v3006_v50, %v1429_v56 }
 0x567   :  { %v1211_v57 = vmul.f32 %v2379_v55, %v1210_v43  ;;  %vm1432_vm1 = vcmp.ne.f32.partialorder %v1431_v59, %v1431_v59 }
 0x572   :  { %v2381_v48 = vpop.eup %2380 }
 0x573   :  { %v1208_v7 = vmul.f32 0.6931472, %v2381_v48 }
 0x575   :  { %v1214_v51 = vsel %vm1213_vm13, %v1211_v57, %v1208_v7 }
 0x576   :  { %v1215_v27 = vadd.f32 %v1214_v51, %v1198_v6  ;;  %v1434_v6 = vand.u32 2147483647, %v1431_v59 }
 0x578   :  { %v1216_v52 = vsel %vm1200_vm14, %v1201_v62, %v1215_v27  ;;  %v1435_v27 = vsub.f32 0.0, %v1434_v6 }
 0x579   :  { %v1217_v11 = vsub.f32 %v1197_v28, %v1216_v52 }
 0x57b   :  { %v1218_v45 = vmul.f32 1.442695, %v1217_v11 }
 0x57d   :  { %2382 = vpow2.f32 %v1218_v45  ;;  %v1436_v45 = vmul.f32 1.442695, %v1435_v27 }
 0x57e   :  { %2384 = vpow2.f32 %v1362_v60 }
 0x58a   :  { %v2383_v15 = vpop.eup %2382 }
 0x58b   :  { %v1221_v20 = vsel %vm1220_vm0, %v2383_v15, 0.0  ;;  %v2385_v38 = vpop.eup %2384 }
 0x58c   :  { %vm1223_vm3 = vcmp.lt.f32.partialorder %v1222_v58, %v1221_v20  ;;  %v1364_v12 = vrot.slane %v2385_v38, 4 }
 0x58d   :  { %v2182_v46 = vsel %vm1223_vm3, 1.0, %v2575_v63 }
 0x58e   :  { %1226 = vst [vmem:[#allocation9 + $0x6] sm:$0x1] %v2182_v46  ;;  %v2204_v44 = vtrunc.f32 %v2182_v46  ;;  %v1365_v61 = vadd.f32 %v2385_v38, %v1364_v12  ;;  %v1433_v38 = vadd.f32 %v1429_v56, %v3006_v50 }
 0x590   :  { %v2205_v14 = vcvt.f32.s32 %v2204_v44  ;;  %v1366_v9 = vrot.slane %v1365_v61, 2 }
 0x592   :  { %v3019_v35 = vsub.s32 %v2993_v34, %v2205_v14  ;;  %v1367_v57 = vadd.f32 %v1366_v9, %v1365_v61  ;;  %v1322_v61 = vld [vmem:[#allocation6 + $0x7] sm:$0x1] }
 0x594   :  { %v1271_v19 = vsub.s32 4, %v3019_v35  ;;  %v1368_v48 = vrot.slane %v1367_v57, 1  ;;  %vm1320_vm2 = vcmp.gt.s32.totalorder %v3019_v35, 0 }
 0x596   :  { %v1275_v23 = vrot.slane %v1271_v19, %v2746_v39  ;;  %v1284_v26 = vadd.s32 1, %v1271_v19  ;;  %v1369_v62 = vadd.f32 %v1368_v48, %v1367_v57 }
 0x598   :  { %vm1276_vm5 = vcmp.eq.s32.totalorder %v2610_v1, %v1275_v23  ;;  %v1288_v28 = vrot.slane %v1284_v26, %v2746_v39  ;;  %1370 = vst [vmem:[#allocation8 + $0x8] sm:$0x1] %v1369_v62 }
 0x599   :  { %v1277_v29 = vsel %vm1276_vm5, %v2687_v0, -1e+30 }
 0x59a   :  { %v1278_v42 = vrot.slane %v1277_v29, 4  ;;  %vm1289_vm6 = vcmp.eq.s32.totalorder %v2610_v1, %v1288_v28 }
 0x59b   :  { %v1290_v37 = vsel %vm1289_vm6, %v2687_v0, -1e+30 }
 0x59c   :  { %v1279_v17 = vmax.f32 %v1277_v29, %v1278_v42  ;;  %v1291_v34 = vrot.slane %v1290_v37, 4 }
 0x59e   :  { %v1280_v4 = vrot.slane %v1279_v17, 2  ;;  %v1292_v32 = vmax.f32 %v1290_v37, %v1291_v34 }
 0x5a0   :  { %v1281_v2 = vmax.f32 %v1279_v17, %v1280_v4  ;;  %v1293_v24 = vrot.slane %v1292_v32, 2  ;;  %v1430_v4 = vmax.f32 %v3006_v50, %v1429_v56 }
 0x5a2   :  { %v1282_v53 = vrot.slane %v1281_v2, 1  ;;  %v1294_v10 = vmax.f32 %v1292_v32, %v1293_v24  ;;  %v3032_v24 = vld [vmem:[#allocation3 + $0x9] sm:$0x1] }
 0x5a4   :  { %v1295_v55 = vrot.slane %v1294_v10, 1  ;;  %v1283_v43 = vmax.f32 %v1281_v2, %v1282_v53  ;;  %v1459_v53 = vrot.slane %v3032_v24, %v2746_v39 }
 0x5a6   :  { %v1296_v36 = vmax.f32 %v1294_v10, %v1295_v55 }
 0x5a8   :  { %v1297_v0 = vadd.f32 %v1296_v36, %v2967_v30 }
 0x5aa   :  { %v1299_v7 = vsub.f32 %v1283_v43, %v1297_v0  ;;  %v1298_v41 = vmax.f32 %v1283_v43, %v1297_v0  ;;  %v1301_v22 = vadd.f32 %v1297_v0, %v1283_v43 }
 0x5ac   :  { %v1302_v51 = vand.u32 2147483647, %v1299_v7  ;;  %vm1300_vm8 = vcmp.ne.f32.partialorder %v1299_v7, %v1299_v7 }
 0x5ae   :  { %v1303_v52 = vsub.f32 0.0, %v1302_v51 }
 0x5b0   :  { %v1304_v11 = vmul.f32 1.442695, %v1303_v52 }
 0x5b2   :  { %2386 = vpow2.f32 %v1304_v11 }
 0x5b3   :  { %2388 = vpow2.f32 %v1436_v45 }
 0x5bf   :  { %v2387_v33 = vpop.eup %2386 }
 0x5c0   :  { %v1306_v58 = vadd.f32 1.0, %v2387_v33  ;;  %v2389_v15 = vpop.eup %2388  ;;  %v1309_v20 = vmul.f32 -0.5, %v2387_v33  ;;  %v1312_v13 = vand.u32 2147483647, %v2387_v33 }
 0x5c1   :  { %v1438_v49 = vadd.f32 1.0, %v2389_v15  ;;  %v1441_v14 = vmul.f32 -0.5, %v2389_v15  ;;  %v1444_v42 = vand.u32 2147483647, %v2389_v15 }
 0x5c2   :  { %2390 = vlog2.f32 %v1306_v58  ;;  %v1310_v30 = vadd.f32 1.0, %v1309_v20  ;;  %vm1313_vm7 = vcmp.lt.f32.partialorder %v1312_v13, 0.0004427343 }
 0x5c3   :  { %2392 = vlog2.f32 %v1438_v49  ;;  %v1442_v26 = vadd.f32 1.0, %v1441_v14  ;;  %vm1445_vm9 = vcmp.lt.f32.partialorder %v1444_v42, 0.0004427343 }
 0x5c4   :  { %v1311_v21 = vmul.f32 %v2387_v33, %v1310_v30 }
 0x5c5   :  { %v1443_v34 = vmul.f32 %v2389_v15, %v1442_v26 }
 0x5cf   :  { %v2391_v46 = vpop.eup %2390 }
 0x5d0   :  { %v1308_v44 = vmul.f32 0.6931472, %v2391_v46  ;;  %v2393_v28 = vpop.eup %2392 }
 0x5d1   :  { %v1440_v17 = vmul.f32 0.6931472, %v2393_v28 }
 0x5d2   :  { %v1314_v60 = vsel %vm1313_vm7, %v1311_v21, %v1308_v44 }
 0x5d3   :  { %v1315_v19 = vadd.f32 %v1314_v60, %v1298_v41  ;;  %v1446_v32 = vsel %vm1445_vm9, %v1443_v34, %v1440_v17 }
 0x5d4   :  { %v1447_v2 = vadd.f32 %v1446_v32, %v1430_v4 }
 0x5d5   :  { %v1316_v23 = vsel %vm1300_vm8, %v1301_v22, %v1315_v19 }
 0x5d6   :  { %v1317_v29 = vsub.f32 %v1297_v0, %v1316_v23  ;;  %v3034_v12 = vsel %vm1432_vm1, %v1433_v38, %v1447_v2 }
 0x5d7   :  { %v1452_v10 = vrot.slane %v3034_v12, 7 }
 0x5d8   :  { %v1318_v37 = vmul.f32 1.442695, %v1317_v29 }
 0x5d9   :  { %v1454_v9 = vsel %vm566_vm4, -1e+30, %v1452_v10 }
 0x5da   :  { %2394 = vpow2.f32 %v1318_v37  ;;  %v1455_v50 = vadd.f32 %v1454_v9, %v2669_v16  ;;  %v3042_v56 = vadd.f32 %v1459_v53, %v1454_v9 }
 0x5dc   :  { %v1460_v36 = vadd.f32 %v1459_v53, %v1455_v50  ;;  %v1530_v57 = vmax.f32 %v3034_v12, %v3042_v56  ;;  %v3049_v0 = vsub.f32 %v3034_v12, %v3042_v56  ;;  %v3053_v6 = vadd.f32 %v3042_v56, %v3034_v12 }
 0x5de   :  { %v1461_v7 = vsub.f32 %v1460_v36, %v2802_v5  ;;  %v1534_v62 = vand.u32 2147483647, %v3049_v0  ;;  %vm1532_vm0 = vcmp.ne.f32.partialorder %v3049_v0, %v3049_v0 }
 0x5e0   :  { %v1462_v27 = vmul.f32 1.442695, %v1461_v7  ;;  %v1535_v52 = vsub.f32 0.0, %v1534_v62 }
 0x5e2   :  { %2396 = vpow2.f32 %v1462_v27  ;;  %v1536_v45 = vmul.f32 1.442695, %v1535_v52 }
 0x5e4   :  { %2398 = vpow2.f32 %v1536_v45 }
 0x5e7   :  { %v2395_v55 = vpop.eup %2394 }
 0x5e8   :  { %v1321_v43 = vsel %vm1320_vm2, %v2395_v55, 0.0 }
 0x5e9   :  { %vm1323_vm10 = vcmp.lt.f32.partialorder %v1322_v61, %v1321_v43 }
 0x5ea   :  { %v2183_v59 = vsel %vm1323_vm10, 1.0, %v2575_v63 }
 0x5eb   :  { %1326 = vst [vmem:[#allocation9 + $0x7] sm:$0x1] %v2183_v59  ;;  %v2206_v48 = vtrunc.f32 %v2183_v59 }
 0x5ed   :  { %v2207_v51 = vcvt.f32.s32 %v2206_v48 }
 0x5ef   :  { %v3058_v11 = vsub.s32 %v3019_v35, %v2207_v51  ;;  %v2397_v44 = vpop.eup %2396 }
 0x5f0   :  { %v1464_v60 = vrot.slane %v2397_v44, 4 }
 0x5f1   :  { %v1371_v33 = vsub.s32 4, %v3058_v11  ;;  %v2399_v19 = vpop.eup %2398  ;;  %vm1420_vm3 = vcmp.gt.s32.totalorder %v3058_v11, 0 }
 0x5f2   :  { %v1465_v28 = vadd.f32 %v2397_v44, %v1464_v60  ;;  %v1538_v29 = vadd.f32 1.0, %v2399_v19  ;;  %v1541_v38 = vmul.f32 -0.5, %v2399_v19  ;;  %v1544_v55 = vand.u32 2147483647, %v2399_v19 }
 0x5f3   :  { %v1375_v58 = vrot.slane %v1371_v33, %v2746_v39  ;;  %v1384_v15 = vadd.s32 1, %v1371_v33 }
 0x5f4   :  { %v1466_v37 = vrot.slane %v1465_v28, 2  ;;  %2400 = vlog2.f32 %v1538_v29  ;;  %v1542_v10 = vadd.f32 1.0, %v1541_v38  ;;  %vm1545_vm13 = vcmp.lt.f32.partialorder %v1544_v55, 0.0004427343 }
 0x5f5   :  { %vm1376_vm11 = vcmp.eq.s32.totalorder %v2610_v1, %v1375_v58  ;;  %v1388_v49 = vrot.slane %v1384_v15, %v2746_v39 }
 0x5f6   :  { %v1377_v20 = vsel %vm1376_vm11, %v2678_v40, -1e+30  ;;  %v1467_v4 = vadd.f32 %v1466_v37, %v1465_v28  ;;  %v1543_v43 = vmul.f32 %v2399_v19, %v1542_v10 }
 0x5f7   :  { %v1378_v30 = vrot.slane %v1377_v20, 4  ;;  %vm1389_vm12 = vcmp.eq.s32.totalorder %v2610_v1, %v1388_v49 }
 0x5f8   :  { %v1390_v35 = vsel %vm1389_vm12, %v2678_v40, -1e+30  ;;  %v1468_v32 = vrot.slane %v1467_v4, 1 }
 0x5f9   :  { %v1379_v13 = vmax.f32 %v1377_v20, %v1378_v30  ;;  %v1391_v21 = vrot.slane %v1390_v35, 4 }
 0x5fa   :  { %v1469_v12 = vadd.f32 %v1468_v32, %v1467_v4 }
 0x5fb   :  { %v1380_v46 = vrot.slane %v1379_v13, 2  ;;  %v1392_v41 = vmax.f32 %v1390_v35, %v1391_v21  ;;  %v1422_v21 = vld [vmem:[#allocation6 + $0x8] sm:$0x1] }
 0x5fc   :  { %1470 = vst [vmem:[#allocation8 + $0x9] sm:$0x1] %v1469_v12 }
 0x5fd   :  { %v1381_v22 = vmax.f32 %v1379_v13, %v1380_v46  ;;  %v1393_v14 = vrot.slane %v1392_v41, 2 }
 0x5ff   :  { %v1382_v23 = vrot.slane %v1381_v22, 1  ;;  %v1394_v26 = vmax.f32 %v1392_v41, %v1393_v14  ;;  %v3075_v41 = vld [vmem:[#allocation3 + $0xa] sm:$0x1] }
 0x600   :  { %v1559_v60 = vrot.slane %v3075_v41, %v2746_v39 }
 0x601   :  { %v1395_v42 = vrot.slane %v1394_v26, 1  ;;  %v1383_v17 = vmax.f32 %v1381_v22, %v1382_v23  ;;  %v2401_v50 = vpop.eup %2400 }
 0x602   :  { %v1540_v56 = vmul.f32 0.6931472, %v2401_v50 }
 0x603   :  { %v1396_v34 = vmax.f32 %v1394_v26, %v1395_v42 }
 0x604   :  { %v1546_v59 = vsel %vm1545_vm13, %v1543_v43, %v1540_v56 }
 0x605   :  { %v1397_v40 = vadd.f32 %v1396_v34, %v3010_v18  ;;  %v1547_v36 = vadd.f32 %v1546_v59, %v1530_v57 }
 0x607   :  { %v1399_v2 = vsub.f32 %v1383_v17, %v1397_v40  ;;  %v1398_v45 = vmax.f32 %v1383_v17, %v1397_v40  ;;  %v1401_v58 = vadd.f32 %v1397_v40, %v1383_v17  ;;  %v3071_v57 = vsel %vm1532_vm0, %v3053_v6, %v1547_v36 }
 0x608   :  { %v1552_v13 = vrot.slane %v3071_v57, 7 }
 0x609   :  { %v1402_v53 = vand.u32 2147483647, %v1399_v2  ;;  %vm1400_vm15 = vcmp.ne.f32.partialorder %v1399_v2, %v1399_v2 }
 0x60a   :  { %v1554_v44 = vsel %vm566_vm4, -1e+30, %v1552_v13 }
 0x60b   :  { %v1403_v61 = vsub.f32 0.0, %v1402_v53  ;;  %v1555_v14 = vadd.f32 %v1554_v44, %v2660_v54 }
 0x60d   :  { %v1404_v9 = vmul.f32 1.442695, %v1403_v61  ;;  %v1560_v6 = vadd.f32 %v1559_v60, %v1555_v14 }
 0x60f   :  { %2402 = vpow2.f32 %v1404_v9  ;;  %v1561_v23 = vsub.f32 %v1560_v6, %v2802_v5  ;;  %v1629_v9 = vadd.f32 %v1559_v60, %v1554_v44 }
 0x611   :  { %v1562_v28 = vmul.f32 1.442695, %v1561_v23 }
 0x61c   :  { %v2403_v48 = vpop.eup %2402 }
 0x61d   :  { %v1406_v7 = vadd.f32 1.0, %v2403_v48  ;;  %v1409_v18 = vmul.f32 -0.5, %v2403_v48  ;;  %v1412_v51 = vand.u32 2147483647, %v2403_v48 }
 0x61f   :  { %2404 = vlog2.f32 %v1406_v7  ;;  %v1410_v62 = vadd.f32 1.0, %v1409_v18  ;;  %vm1413_vm14 = vcmp.lt.f32.partialorder %v1412_v51, 0.0004427343 }
 0x621   :  { %v1411_v27 = vmul.f32 %v2403_v48, %v1410_v62  ;;  %v1631_v48 = vsub.f32 %v3071_v57, %v1629_v9 }
 0x623   :  { %vm1632_vm2 = vcmp.ne.f32.partialorder %v1631_v48, %v1631_v48 }
 0x62c   :  { %v2405_v52 = vpop.eup %2404 }
 0x62d   :  { %v1408_v33 = vmul.f32 0.6931472, %v2405_v52 }
 0x62f   :  { %v1414_v15 = vsel %vm1413_vm14, %v1411_v27, %v1408_v33  ;;  %v1634_v27 = vand.u32 2147483647, %v1631_v48 }
 0x630   :  { %v1415_v49 = vadd.f32 %v1414_v15, %v1398_v45 }
 0x632   :  { %v1416_v20 = vsel %vm1400_vm15, %v1401_v58, %v1415_v49  ;;  %v1635_v58 = vsub.f32 0.0, %v1634_v27 }
 0x633   :  { %v1417_v30 = vsub.f32 %v1397_v40, %v1416_v20 }
 0x634   :  { %v1636_v20 = vmul.f32 1.442695, %v1635_v58 }
 0x635   :  { %v1418_v35 = vmul.f32 1.442695, %v1417_v30 }
 0x637   :  { %2406 = vpow2.f32 %v1418_v35 }
 0x638   :  { %2408 = vpow2.f32 %v1562_v28 }
 0x644   :  { %v2407_v46 = vpop.eup %2406 }
 0x645   :  { %v1421_v22 = vsel %vm1420_vm3, %v2407_v46, 0.0  ;;  %v2409_v53 = vpop.eup %2408 }
 0x646   :  { %vm1423_vm5 = vcmp.lt.f32.partialorder %v1422_v21, %v1421_v22  ;;  %v1564_v55 = vrot.slane %v2409_v53, 4 }
 0x647   :  { %v2184_v0 = vsel %vm1423_vm5, 1.0, %v2575_v63 }
 0x648   :  { %1426 = vst [vmem:[#allocation9 + $0x8] sm:$0x1] %v2184_v0  ;;  %v2208_v19 = vtrunc.f32 %v2184_v0  ;;  %v1565_v56 = vadd.f32 %v2409_v53, %v1564_v55  ;;  %v3097_v53 = vld [vmem:[#allocation3 + $0xb] sm:$0x1] }
 0x64a   :  { %v2209_v26 = vcvt.f32.s32 %v2208_v19  ;;  %v1566_v36 = vrot.slane %v1565_v56, 2 }
 0x64c   :  { %v3084_v29 = vsub.s32 %v3058_v11, %v2209_v26  ;;  %v1567_v62 = vadd.f32 %v1566_v36, %v1565_v56 }
 0x64e   :  { %v1471_v42 = vsub.s32 4, %v3084_v29  ;;  %v1568_v51 = vrot.slane %v1567_v62, 1  ;;  %vm1520_vm10 = vcmp.gt.s32.totalorder %v3084_v29, 0 }
 0x650   :  { %v1475_v37 = vrot.slane %v1471_v42, %v2746_v39  ;;  %v1484_v17 = vadd.s32 1, %v1471_v42  ;;  %v1569_v45 = vadd.f32 %v1568_v51, %v1567_v62 }
 0x652   :  { %vm1476_vm6 = vcmp.eq.s32.totalorder %v2610_v1, %v1475_v37  ;;  %v1488_v34 = vrot.slane %v1484_v17, %v2746_v39  ;;  %1570 = vst [vmem:[#allocation8 + $0xa] sm:$0x1] %v1569_v45 }
 0x653   :  { %v1477_v4 = vsel %vm1476_vm6, %v2669_v16, -1e+30 }
 0x654   :  { %v1478_v40 = vrot.slane %v1477_v4, 4  ;;  %vm1489_vm7 = vcmp.eq.s32.totalorder %v2610_v1, %v1488_v34 }
 0x655   :  { %v1490_v32 = vsel %vm1489_vm7, %v2669_v16, -1e+30 }
 0x656   :  { %v1479_v38 = vmax.f32 %v1477_v4, %v1478_v40  ;;  %v1491_v11 = vrot.slane %v1490_v32, 4 }
 0x658   :  { %v1480_v2 = vrot.slane %v1479_v38, 2  ;;  %v1492_v12 = vmax.f32 %v1490_v32, %v1491_v11 }
 0x65a   :  { %v1481_v10 = vmax.f32 %v1479_v38, %v1480_v2  ;;  %v1493_v61 = vrot.slane %v1492_v12, 2  ;;  %v1630_v38 = vmax.f32 %v3071_v57, %v1629_v9  ;;  %v1633_v2 = vadd.f32 %v1629_v9, %v3071_v57 }
 0x65c   :  { %v1482_v43 = vrot.slane %v1481_v10, 1  ;;  %v1494_v50 = vmax.f32 %v1492_v12, %v1493_v61  ;;  %v1659_v61 = vrot.slane %v3097_v53, %v2746_v39 }
 0x65e   :  { %v1495_v59 = vrot.slane %v1494_v50, 1  ;;  %v1483_v7 = vmax.f32 %v1481_v10, %v1482_v43  ;;  %v1522_v43 = vld [vmem:[#allocation6 + $0x9] sm:$0x1] }
 0x660   :  { %v1496_v18 = vmax.f32 %v1494_v50, %v1495_v59 }
 0x662   :  { %v1497_v16 = vadd.f32 %v1496_v18, %v3032_v24 }
 0x664   :  { %v1499_v52 = vsub.f32 %v1483_v7, %v1497_v16  ;;  %v1498_v60 = vmax.f32 %v1483_v7, %v1497_v16  ;;  %v1501_v6 = vadd.f32 %v1497_v16, %v1483_v7 }
 0x666   :  { %v1502_v33 = vand.u32 2147483647, %v1499_v52  ;;  %vm1500_vm9 = vcmp.ne.f32.partialorder %v1499_v52, %v1499_v52 }
 0x668   :  { %v1503_v15 = vsub.f32 0.0, %v1502_v33 }
 0x66a   :  { %v1504_v49 = vmul.f32 1.442695, %v1503_v15 }
 0x66c   :  { %2410 = vpow2.f32 %v1504_v49 }
 0x66d   :  { %2412 = vpow2.f32 %v1636_v20 }
 0x679   :  { %v2411_v30 = vpop.eup %2410 }
 0x67a   :  { %v1506_v35 = vadd.f32 1.0, %v2411_v30  ;;  %v2413_v13 = vpop.eup %2412  ;;  %v1509_v46 = vmul.f32 -0.5, %v2411_v30  ;;  %v1512_v44 = vand.u32 2147483647, %v2411_v30 }
 0x67b   :  { %v1638_v21 = vadd.f32 1.0, %v2413_v13  ;;  %v1641_v19 = vmul.f32 -0.5, %v2413_v13  ;;  %v1644_v34 = vand.u32 2147483647, %v2413_v13 }
 0x67c   :  { %2414 = vlog2.f32 %v1506_v35  ;;  %v1510_v24 = vadd.f32 1.0, %v1509_v46  ;;  %vm1513_vm8 = vcmp.lt.f32.partialorder %v1512_v44, 0.0004427343 }
 0x67d   :  { %2416 = vlog2.f32 %v1638_v21  ;;  %v1642_v42 = vadd.f32 1.0, %v1641_v19  ;;  %vm1645_vm1 = vcmp.lt.f32.partialorder %v1644_v34, 0.0004427343 }
 0x67e   :  { %v1511_v22 = vmul.f32 %v2411_v30, %v1510_v24 }
 0x67f   :  { %v1643_v32 = vmul.f32 %v2413_v13, %v1642_v42 }
 0x689   :  { %v2415_v14 = vpop.eup %2414 }
 0x68a   :  { %v1508_v0 = vmul.f32 0.6931472, %v2415_v14  ;;  %v2417_v37 = vpop.eup %2416 }
 0x68b   :  { %v1640_v40 = vmul.f32 0.6931472, %v2417_v37 }
 0x68c   :  { %v1514_v23 = vsel %vm1513_vm8, %v1511_v22, %v1508_v0 }
 0x68d   :  { %v1515_v26 = vadd.f32 %v1514_v23, %v1498_v60  ;;  %v1646_v11 = vsel %vm1645_vm1, %v1643_v32, %v1640_v40 }
 0x68e   :  { %v1647_v12 = vadd.f32 %v1646_v11, %v1630_v38 }
 0x68f   :  { %v1516_v28 = vsel %vm1500_vm9, %v1501_v6, %v1515_v26 }
 0x690   :  { %v1517_v17 = vsub.f32 %v1497_v16, %v1516_v28  ;;  %v3099_v10 = vsel %vm1632_vm2, %v1633_v2, %v1647_v12 }
 0x691   :  { %v1652_v55 = vrot.slane %v3099_v10, 7 }
 0x692   :  { %v1518_v4 = vmul.f32 1.442695, %v1517_v17 }
 0x693   :  { %v1654_v56 = vsel %vm566_vm4, -1e+30, %v1652_v55 }
 0x694   :  { %2418 = vpow2.f32 %v1518_v4  ;;  %v1655_v57 = vadd.f32 %v1654_v56, %v2651_v31  ;;  %v3107_v9 = vadd.f32 %v1659_v61, %v1654_v56 }
 0x696   :  { %v1660_v48 = vadd.f32 %v1659_v61, %v1655_v57  ;;  %v1730_v7 = vmax.f32 %v3099_v10, %v3107_v9  ;;  %v3114_v18 = vsub.f32 %v3099_v10, %v3107_v9  ;;  %v3118_v16 = vadd.f32 %v3107_v9, %v3099_v10 }
 0x698   :  { %v1661_v51 = vsub.f32 %v1660_v48, %v2802_v5  ;;  %v1734_v27 = vand.u32 2147483647, %v3114_v18  ;;  %vm1732_vm3 = vcmp.ne.f32.partialorder %v3114_v18, %v3114_v18 }
 0x69a   :  { %v1662_v45 = vmul.f32 1.442695, %v1661_v51  ;;  %v1735_v33 = vsub.f32 0.0, %v1734_v27 }
 0x69c   :  { %2420 = vpow2.f32 %v1662_v45  ;;  %v1736_v15 = vmul.f32 1.442695, %v1735_v33 }
 0x69e   :  { %2422 = vpow2.f32 %v1736_v15 }
 0x6a1   :  { %v2419_v50 = vpop.eup %2418 }
 0x6a2   :  { %v1521_v59 = vsel %vm1520_vm10, %v2419_v50, 0.0 }
 0x6a3   :  { %vm1523_vm11 = vcmp.lt.f32.partialorder %v1522_v43, %v1521_v59 }
 0x6a4   :  { %v2185_v36 = vsel %vm1523_vm11, 1.0, %v2575_v63 }
 0x6a5   :  { %1526 = vst [vmem:[#allocation9 + $0x9] sm:$0x1] %v2185_v36  ;;  %v2210_v62 = vtrunc.f32 %v2185_v36 }
 0x6a7   :  { %v2211_v52 = vcvt.f32.s32 %v2210_v62 }
 0x6a9   :  { %v3123_v58 = vsub.s32 %v3084_v29, %v2211_v52  ;;  %v2421_v14 = vpop.eup %2420 }
 0x6aa   :  { %v1664_v6 = vrot.slane %v2421_v14, 4 }
 0x6ab   :  { %v1571_v49 = vsub.s32 4, %v3123_v58  ;;  %v2423_v19 = vpop.eup %2422  ;;  %vm1620_vm5 = vcmp.gt.s32.totalorder %v3123_v58, 0 }
 0x6ac   :  { %v1665_v28 = vadd.f32 %v2421_v14, %v1664_v6  ;;  %v1738_v42 = vadd.f32 1.0, %v2423_v19  ;;  %v1741_v38 = vmul.f32 -0.5, %v2423_v19  ;;  %v1744_v55 = vand.u32 2147483647, %v2423_v19 }
 0x6ad   :  { %v1575_v20 = vrot.slane %v1571_v49, %v2746_v39  ;;  %v1584_v30 = vadd.s32 1, %v1571_v49 }
 0x6ae   :  { %v1666_v17 = vrot.slane %v1665_v28, 2  ;;  %2424 = vlog2.f32 %v1738_v42  ;;  %v1742_v10 = vadd.f32 1.0, %v1741_v38  ;;  %vm1745_vm14 = vcmp.lt.f32.partialorder %v1744_v55, 0.0004427343 }
 0x6af   :  { %vm1576_vm12 = vcmp.eq.s32.totalorder %v2610_v1, %v1575_v20  ;;  %v1588_v35 = vrot.slane %v1584_v30, %v2746_v39 }
 0x6b0   :  { %v1577_v13 = vsel %vm1576_vm12, %v2660_v54, -1e+30  ;;  %v1667_v40 = vadd.f32 %v1666_v17, %v1665_v28  ;;  %v1743_v50 = vmul.f32 %v2423_v19, %v1742_v10 }
 0x6b1   :  { %v1578_v21 = vrot.slane %v1577_v13, 4  ;;  %vm1589_vm13 = vcmp.eq.s32.totalorder %v2610_v1, %v1588_v35 }
 0x6b2   :  { %v1590_v29 = vsel %vm1589_vm13, %v2660_v54, -1e+30  ;;  %v1668_v32 = vrot.slane %v1667_v40, 1 }
 0x6b3   :  { %v1579_v46 = vmax.f32 %v1577_v13, %v1578_v21  ;;  %v1591_v24 = vrot.slane %v1590_v29, 4 }
 0x6b4   :  { %v1669_v2 = vadd.f32 %v1668_v32, %v1667_v40 }
 0x6b5   :  { %v1580_v44 = vrot.slane %v1579_v46, 2  ;;  %v1592_v22 = vmax.f32 %v1590_v29, %v1591_v24  ;;  %v1622_v29 = vld [vmem:[#allocation6 + $0xa] sm:$0x1]  ;;  %v3140_v24 = vld [vmem:[#allocation3 + $0xc] sm:$0x1] }
 0x6b6   :  { %1670 = vst [vmem:[#allocation8 + $0xb] sm:$0x1] %v1669_v2 }
 0x6b7   :  { %v1581_v60 = vmax.f32 %v1579_v46, %v1580_v44  ;;  %v1593_v0 = vrot.slane %v1592_v22, 2 }
 0x6b9   :  { %v1582_v23 = vrot.slane %v1581_v60, 1  ;;  %v1594_v26 = vmax.f32 %v1592_v22, %v1593_v0 }
 0x6bb   :  { %v1595_v37 = vrot.slane %v1594_v26, 1  ;;  %v1583_v34 = vmax.f32 %v1581_v60, %v1582_v23  ;;  %v2425_v56 = vpop.eup %2424  ;;  %v1759_v60 = vrot.slane %v3140_v24, %v2746_v39 }
 0x6bc   :  { %v1740_v59 = vmul.f32 0.6931472, %v2425_v56 }
 0x6bd   :  { %v1596_v4 = vmax.f32 %v1594_v26, %v1595_v37 }
 0x6be   :  { %v1746_v57 = vsel %vm1745_vm14, %v1743_v50, %v1740_v59 }
 0x6bf   :  { %v1597_v54 = vadd.f32 %v1596_v4, %v3075_v41  ;;  %v1747_v9 = vadd.f32 %v1746_v57, %v1730_v7 }
 0x6c1   :  { %v1599_v11 = vsub.f32 %v1583_v34, %v1597_v54  ;;  %v1598_v45 = vmax.f32 %v1583_v34, %v1597_v54  ;;  %v1601_v15 = vadd.f32 %v1597_v54, %v1583_v34  ;;  %v3136_v7 = vsel %vm1732_vm3, %v3118_v16, %v1747_v9 }
 0x6c2   :  { %v1752_v21 = vrot.slane %v3136_v7, 7 }
 0x6c3   :  { %v1602_v12 = vand.u32 2147483647, %v1599_v11  ;;  %vm1600_vm0 = vcmp.ne.f32.partialorder %v1599_v11, %v1599_v11 }
 0x6c4   :  { %v1754_v44 = vsel %vm566_vm4, -1e+30, %v1752_v21 }
 0x6c5   :  { %v1603_v61 = vsub.f32 0.0, %v1602_v12  ;;  %v1755_v14 = vadd.f32 %v1754_v44, %v2642_v8 }
 0x6c7   :  { %v1604_v43 = vmul.f32 1.442695, %v1603_v61  ;;  %v1760_v16 = vadd.f32 %v1759_v60, %v1755_v14  ;;  %v1829_v61 = vadd.f32 %v1759_v60, %v1754_v44 }
 0x6c9   :  { %2426 = vpow2.f32 %v1604_v43  ;;  %v1761_v6 = vsub.f32 %v1760_v16, %v2802_v5  ;;  %v1831_v57 = vsub.f32 %v3136_v7, %v1829_v61 }
 0x6cb   :  { %v1762_v23 = vmul.f32 1.442695, %v1761_v6  ;;  %vm1832_vm10 = vcmp.ne.f32.partialorder %v1831_v57, %v1831_v57 }
 0x6d6   :  { %v2427_v36 = vpop.eup %2426 }
 0x6d7   :  { %v1606_v48 = vadd.f32 1.0, %v2427_v36  ;;  %v1609_v41 = vmul.f32 -0.5, %v2427_v36  ;;  %v1612_v51 = vand.u32 2147483647, %v2427_v36 }
 0x6d9   :  { %2428 = vlog2.f32 %v1606_v48  ;;  %v1610_v62 = vadd.f32 1.0, %v1609_v41  ;;  %vm1613_vm15 = vcmp.lt.f32.partialorder %v1612_v51, 0.0004427343 }
 0x6db   :  { %v1611_v27 = vmul.f32 %v2427_v36, %v1610_v62  ;;  %v1834_v62 = vand.u32 2147483647, %v1831_v57 }
 0x6e6   :  { %v2429_v52 = vpop.eup %2428 }
 0x6e7   :  { %v1608_v33 = vmul.f32 0.6931472, %v2429_v52 }
 0x6e9   :  { %v1614_v49 = vsel %vm1613_vm15, %v1611_v27, %v1608_v33 }
 0x6ea   :  { %v1615_v20 = vadd.f32 %v1614_v49, %v1598_v45  ;;  %v1835_v45 = vsub.f32 0.0, %v1834_v62 }
 0x6ec   :  { %v1616_v30 = vsel %vm1600_vm0, %v1601_v15, %v1615_v20  ;;  %v1836_v49 = vmul.f32 1.442695, %v1835_v45 }
 0x6ed   :  { %v1617_v35 = vsub.f32 %v1597_v54, %v1616_v30 }
 0x6ef   :  { %v1618_v13 = vmul.f32 1.442695, %v1617_v35 }
 0x6f1   :  { %2430 = vpow2.f32 %v1618_v13 }
 0x6f2   :  { %2432 = vpow2.f32 %v1762_v23 }
 0x6fe   :  { %v2431_v46 = vpop.eup %2430 }
 0x6ff   :  { %v1621_v22 = vsel %vm1620_vm5, %v2431_v46, 0.0  ;;  %v2433_v11 = vpop.eup %2432 }
 0x700   :  { %vm1623_vm6 = vcmp.lt.f32.partialorder %v1622_v29, %v1621_v22  ;;  %v1764_v10 = vrot.slane %v2433_v11, 4 }
 0x701   :  { %v2186_v18 = vsel %vm1623_vm6, 1.0, %v2575_v63 }
 0x702   :  { %1626 = vst [vmem:[#allocation9 + $0xa] sm:$0x1] %v2186_v18  ;;  %v2212_v0 = vtrunc.f32 %v2186_v18  ;;  %v1765_v50 = vadd.f32 %v2433_v11, %v1764_v10 }
 0x704   :  { %v2213_v19 = vcvt.f32.s32 %v2212_v0  ;;  %v1766_v59 = vrot.slane %v1765_v50, 2 }
 0x706   :  { %v3149_v26 = vsub.s32 %v3123_v58, %v2213_v19  ;;  %v1767_v48 = vadd.f32 %v1766_v59, %v1765_v50 }
 0x708   :  { %v1671_v28 = vsub.s32 4, %v3149_v26  ;;  %v1768_v41 = vrot.slane %v1767_v48, 1  ;;  %vm1720_vm11 = vcmp.gt.s32.totalorder %v3149_v26, 0 }
 0x70a   :  { %v1675_v42 = vrot.slane %v1671_v28, %v2746_v39  ;;  %v1684_v37 = vadd.s32 1, %v1671_v28  ;;  %v1769_v27 = vadd.f32 %v1768_v41, %v1767_v48 }
 0x70c   :  { %vm1676_vm7 = vcmp.eq.s32.totalorder %v2610_v1, %v1675_v42  ;;  %v1688_v17 = vrot.slane %v1684_v37, %v2746_v39  ;;  %1770 = vst [vmem:[#allocation8 + $0xc] sm:$0x1] %v1769_v27 }
 0x70d   :  { %v1677_v34 = vsel %vm1676_vm7, %v2651_v31, -1e+30 }
 0x70e   :  { %v1678_v4 = vrot.slane %v1677_v34, 4  ;;  %vm1689_vm8 = vcmp.eq.s32.totalorder %v2610_v1, %v1688_v17 }
 0x70f   :  { %v1690_v40 = vsel %vm1689_vm8, %v2651_v31, -1e+30 }
 0x710   :  { %v1679_v54 = vmax.f32 %v1677_v34, %v1678_v4  ;;  %v1691_v58 = vrot.slane %v1690_v40, 4  ;;  %v1830_v4 = vmax.f32 %v3136_v7, %v1829_v61 }
 0x712   :  { %v1680_v32 = vrot.slane %v1679_v54, 2  ;;  %v1692_v38 = vmax.f32 %v1690_v40, %v1691_v58 }
 0x714   :  { %v1681_v2 = vmax.f32 %v1679_v54, %v1680_v32  ;;  %v1693_v12 = vrot.slane %v1692_v38, 2  ;;  %v1833_v54 = vadd.f32 %v1829_v61, %v3136_v7  ;;  %v3162_v32 = vld [vmem:[#allocation3 + $0xd] sm:$0x1] }
 0x715   :  { %v1859_v11 = vrot.slane %v3162_v32, %v2746_v39 }
 0x716   :  { %v1682_v55 = vrot.slane %v1681_v2, 1  ;;  %v1694_v43 = vmax.f32 %v1692_v38, %v1693_v12  ;;  %v1722_v12 = vld [vmem:[#allocation6 + $0xb] sm:$0x1] }
 0x718   :  { %v1695_v56 = vrot.slane %v1694_v43, 1  ;;  %v1683_v9 = vmax.f32 %v1681_v2, %v1682_v55 }
 0x71a   :  { %v1696_v36 = vmax.f32 %v1694_v43, %v1695_v56 }
 0x71c   :  { %v1697_v31 = vadd.f32 %v1696_v36, %v3097_v53 }
 0x71e   :  { %v1699_v51 = vsub.f32 %v1683_v9, %v1697_v31  ;;  %v1698_v22 = vmax.f32 %v1683_v9, %v1697_v31  ;;  %v1701_v60 = vadd.f32 %v1697_v31, %v1683_v9 }
 0x720   :  { %v1702_v52 = vand.u32 2147483647, %v1699_v51  ;;  %vm1700_vm1 = vcmp.ne.f32.partialorder %v1699_v51, %v1699_v51 }
 0x722   :  { %v1703_v33 = vsub.f32 0.0, %v1702_v52 }
 0x724   :  { %v1704_v15 = vmul.f32 1.442695, %v1703_v33 }
 0x726   :  { %2434 = vpow2.f32 %v1704_v15 }
 0x727   :  { %2436 = vpow2.f32 %v1836_v49 }
 0x733   :  { %v2435_v20 = vpop.eup %2434 }
 0x734   :  { %v1706_v30 = vadd.f32 1.0, %v2435_v20  ;;  %v2437_v35 = vpop.eup %2436  ;;  %v1709_v21 = vmul.f32 -0.5, %v2435_v20  ;;  %v1712_v29 = vand.u32 2147483647, %v2435_v20 }
 0x735   :  { %v1838_v13 = vadd.f32 1.0, %v2437_v35  ;;  %v1841_v18 = vmul.f32 -0.5, %v2437_v35  ;;  %v1844_v42 = vand.u32 2147483647, %v2437_v35 }
 0x736   :  { %2438 = vlog2.f32 %v1706_v30  ;;  %v1710_v53 = vadd.f32 1.0, %v1709_v21  ;;  %vm1713_vm9 = vcmp.lt.f32.partialorder %v1712_v29, 0.0004427343 }
 0x737   :  { %2440 = vlog2.f32 %v1838_v13  ;;  %v1842_v19 = vadd.f32 1.0, %v1841_v18  ;;  %vm1845_vm2 = vcmp.lt.f32.partialorder %v1844_v42, 0.0004427343 }
 0x738   :  { %v1711_v46 = vmul.f32 %v2435_v20, %v1710_v53 }
 0x739   :  { %v1843_v34 = vmul.f32 %v2437_v35, %v1842_v19 }
 0x743   :  { %v2439_v44 = vpop.eup %2438 }
 0x744   :  { %v1708_v14 = vmul.f32 0.6931472, %v2439_v44  ;;  %v2441_v23 = vpop.eup %2440 }
 0x745   :  { %v1840_v17 = vmul.f32 0.6931472, %v2441_v23 }
 0x746   :  { %v1714_v16 = vsel %vm1713_vm9, %v1711_v46, %v1708_v14 }
 0x747   :  { %v1715_v0 = vadd.f32 %v1714_v16, %v1698_v22  ;;  %v1846_v40 = vsel %vm1845_vm2, %v1843_v34, %v1840_v17 }
 0x748   :  { %v1847_v58 = vadd.f32 %v1846_v40, %v1830_v4 }
 0x749   :  { %v1716_v6 = vsel %vm1700_vm1, %v1701_v60, %v1715_v0 }
 0x74a   :  { %v1717_v28 = vsub.f32 %v1697_v31, %v1716_v6  ;;  %v3164_v38 = vsel %vm1832_vm10, %v1833_v54, %v1847_v58 }
 0x74b   :  { %v1852_v2 = vrot.slane %v3164_v38, 7 }
 0x74c   :  { %v1718_v37 = vmul.f32 1.442695, %v1717_v28 }
 0x74d   :  { %v1854_v55 = vsel %vm566_vm4, -1e+30, %v1852_v2 }
 0x74e   :  { %2442 = vpow2.f32 %v1718_v37  ;;  %v1855_v7 = vadd.f32 %v1854_v55, %v2633_v47  ;;  %v3172_v61 = vadd.f32 %v1859_v11, %v1854_v55 }
 0x750   :  { %v1860_v56 = vadd.f32 %v1859_v11, %v1855_v7  ;;  %v1930_v59 = vmax.f32 %v3164_v38, %v3172_v61  ;;  %v3179_v57 = vsub.f32 %v3164_v38, %v3172_v61  ;;  %v3183_v36 = vadd.f32 %v3172_v61, %v3164_v38 }
 0x752   :  { %v1861_v48 = vsub.f32 %v1860_v56, %v2802_v5  ;;  %v1934_v31 = vand.u32 2147483647, %v3179_v57  ;;  %vm1932_vm5 = vcmp.ne.f32.partialorder %v3179_v57, %v3179_v57 }
 0x754   :  { %v1862_v62 = vmul.f32 1.442695, %v1861_v48  ;;  %v1935_v51 = vsub.f32 0.0, %v1934_v31 }
 0x756   :  { %2444 = vpow2.f32 %v1862_v62  ;;  %v1936_v52 = vmul.f32 1.442695, %v1935_v51 }
 0x758   :  { %2446 = vpow2.f32 %v1936_v52 }
 0x75b   :  { %v2443_v10 = vpop.eup %2442 }
 0x75c   :  { %v1721_v43 = vsel %vm1720_vm11, %v2443_v10, 0.0 }
 0x75d   :  { %vm1723_vm12 = vcmp.lt.f32.partialorder %v1722_v12, %v1721_v43 }
 0x75e   :  { %v2187_v50 = vsel %vm1723_vm12, 1.0, %v2575_v63 }
 0x75f   :  { %1726 = vst [vmem:[#allocation9 + $0xb] sm:$0x1] %v2187_v50  ;;  %v2214_v9 = vtrunc.f32 %v2187_v50 }
 0x761   :  { %v2215_v41 = vcvt.f32.s32 %v2214_v9 }
 0x763   :  { %v3188_v27 = vsub.s32 %v3149_v26, %v2215_v41  ;;  %v2445_v29 = vpop.eup %2444 }
 0x764   :  { %v1864_v22 = vrot.slane %v2445_v29, 4 }
 0x765   :  { %v1771_v45 = vsub.s32 4, %v3188_v27  ;;  %v2447_v14 = vpop.eup %2446  ;;  %vm1820_vm6 = vcmp.gt.s32.totalorder %v3188_v27, 0 }
 0x766   :  { %v1865_v16 = vadd.f32 %v2445_v29, %v1864_v22  ;;  %v1938_v0 = vadd.f32 1.0, %v2447_v14  ;;  %v1941_v17 = vmul.f32 -0.5, %v2447_v14  ;;  %v1944_v38 = vand.u32 2147483647, %v2447_v14 }
 0x767   :  { %v1775_v33 = vrot.slane %v1771_v45, %v2746_v39  ;;  %v1784_v15 = vadd.s32 1, %v1771_v45 }
 0x768   :  { %v1866_v19 = vrot.slane %v1865_v16, 2  ;;  %2448 = vlog2.f32 %v1938_v0  ;;  %v1942_v54 = vadd.f32 1.0, %v1941_v17  ;;  %vm1945_vm15 = vcmp.lt.f32.partialorder %v1944_v38, 0.0004427343 }
 0x769   :  { %vm1776_vm13 = vcmp.eq.s32.totalorder %v2610_v1, %v1775_v33  ;;  %v1788_v49 = vrot.slane %v1784_v15, %v2746_v39 }
 0x76a   :  { %v1777_v20 = vsel %vm1776_vm13, %v2642_v8, -1e+30  ;;  %v1867_v42 = vadd.f32 %v1866_v19, %v1865_v16  ;;  %v1943_v2 = vmul.f32 %v2447_v14, %v1942_v54 }
 0x76b   :  { %v1778_v30 = vrot.slane %v1777_v20, 4  ;;  %vm1789_vm14 = vcmp.eq.s32.totalorder %v2610_v1, %v1788_v49 }
 0x76c   :  { %v1790_v26 = vsel %vm1789_vm14, %v2642_v8, -1e+30  ;;  %v1868_v37 = vrot.slane %v1867_v42, 1 }
 0x76d   :  { %v1779_v35 = vmax.f32 %v1777_v20, %v1778_v30  ;;  %v1791_v13 = vrot.slane %v1790_v26, 4 }
 0x76e   :  { %v1869_v4 = vadd.f32 %v1868_v37, %v1867_v42 }
 0x76f   :  { %v1780_v21 = vrot.slane %v1779_v35, 2  ;;  %v1792_v53 = vmax.f32 %v1790_v26, %v1791_v13  ;;  %v1822_v26 = vld [vmem:[#allocation6 + $0xc] sm:$0x1] }
 0x770   :  { %1870 = vst [vmem:[#allocation8 + $0xd] sm:$0x1] %v1869_v4 }
 0x771   :  { %v1781_v46 = vmax.f32 %v1779_v35, %v1780_v21  ;;  %v1793_v44 = vrot.slane %v1792_v53, 2 }
 0x773   :  { %v1782_v60 = vrot.slane %v1781_v46, 1  ;;  %v1794_v18 = vmax.f32 %v1792_v53, %v1793_v44 }
 0x775   :  { %v1795_v6 = vrot.slane %v1794_v18, 1  ;;  %v1783_v23 = vmax.f32 %v1781_v46, %v1782_v60  ;;  %v2449_v12 = vpop.eup %2448 }
 0x776   :  { %v1940_v10 = vmul.f32 0.6931472, %v2449_v12 }
 0x777   :  { %v1796_v28 = vmax.f32 %v1794_v18, %v1795_v6 }
 0x778   :  { %v1946_v55 = vsel %vm1945_vm15, %v1943_v2, %v1940_v10 }
 0x779   :  { %v1797_v8 = vadd.f32 %v1796_v28, %v3140_v24  ;;  %v1947_v43 = vadd.f32 %v1946_v55, %v1930_v59  ;;  %v3200_v59 = vld [vmem:[#allocation3 + $0xe] sm:$0x1] }
 0x77a   :  { %v1959_v20 = vrot.slane %v3200_v59, %v2746_v39 }
 0x77b   :  { %v1799_v34 = vsub.f32 %v1783_v23, %v1797_v8  ;;  %v1798_v31 = vmax.f32 %v1783_v23, %v1797_v8  ;;  %v1801_v62 = vadd.f32 %v1797_v8, %v1783_v23  ;;  %v3203_v49 = vsel %vm1932_vm5, %v3183_v36, %v1947_v43 }
 0x77c   :  { %v1952_v30 = vrot.slane %v3203_v49, 7 }
 0x77d   :  { %v1802_v40 = vand.u32 2147483647, %v1799_v34  ;;  %vm1800_vm3 = vcmp.ne.f32.partialorder %v1799_v34, %v1799_v34 }
 0x77e   :  { %v1954_v13 = vsel %vm566_vm4, -1e+30, %v1952_v30 }
 0x77f   :  { %v1803_v58 = vsub.f32 0.0, %v1802_v40  ;;  %v1955_v53 = vadd.f32 %v1954_v13, %v2624_v25  ;;  %v3211_v57 = vadd.f32 %v1959_v20, %v1954_v13 }
 0x781   :  { %v1804_v11 = vmul.f32 1.442695, %v1803_v58  ;;  %v1960_v29 = vadd.f32 %v1959_v20, %v1955_v53  ;;  %v2030_v46 = vmax.f32 %v3203_v49, %v3211_v57  ;;  %v3218_v44 = vsub.f32 %v3203_v49, %v3211_v57 }
 0x782   :  { %v3222_v14 = vadd.f32 %v3211_v57, %v3203_v49 }
 0x783   :  { %2450 = vpow2.f32 %v1804_v11  ;;  %v1961_v60 = vsub.f32 %v1960_v29, %v2802_v5  ;;  %vm2032_vm15 = vcmp.ne.f32.partialorder %v3218_v44, %v3218_v44 }
 0x785   :  { %v1962_v16 = vmul.f32 1.442695, %v1961_v60 }
 0x790   :  { %v2451_v7 = vpop.eup %2450 }
 0x791   :  { %v1806_v61 = vadd.f32 1.0, %v2451_v7  ;;  %v1809_v24 = vmul.f32 -0.5, %v2451_v7  ;;  %v1812_v56 = vand.u32 2147483647, %v2451_v7 }
 0x793   :  { %2452 = vlog2.f32 %v1806_v61  ;;  %v1810_v50 = vadd.f32 1.0, %v1809_v24  ;;  %vm1813_vm0 = vcmp.lt.f32.partialorder %v1812_v56, 0.0004427343 }
 0x795   :  { %v1811_v9 = vmul.f32 %v2451_v7, %v1810_v50 }
 0x7a0   :  { %v2453_v48 = vpop.eup %2452 }
 0x7a1   :  { %v1808_v41 = vmul.f32 0.6931472, %v2453_v48 }
 0x7a3   :  { %v1814_v51 = vsel %vm1813_vm0, %v1811_v9, %v1808_v41 }
 0x7a4   :  { %v1815_v52 = vadd.f32 %v1814_v51, %v1798_v31 }
 0x7a6   :  { %v1816_v45 = vsel %vm1800_vm3, %v1801_v62, %v1815_v52 }
 0x7a7   :  { %v1817_v33 = vsub.f32 %v1797_v8, %v1816_v45 }
 0x7a9   :  { %v1818_v15 = vmul.f32 1.442695, %v1817_v33  ;;  %v2034_v33 = vand.u32 2147483647, %v3218_v44 }
 0x7ab   :  { %2454 = vpow2.f32 %v1818_v15 }
 0x7ac   :  { %2456 = vpow2.f32 %v1962_v16 }
 0x7b8   :  { %v2455_v35 = vpop.eup %2454 }
 0x7b9   :  { %v1821_v21 = vsel %vm1820_vm6, %v2455_v35, 0.0  ;;  %v2457_v40 = vpop.eup %2456  ;;  %v2035_v35 = vsub.f32 0.0, %v2034_v33 }
 0x7ba   :  { %vm1823_vm7 = vcmp.lt.f32.partialorder %v1822_v26, %v1821_v21  ;;  %v1964_v38 = vrot.slane %v2457_v40, 4 }
 0x7bb   :  { %v2188_v36 = vsel %vm1823_vm7, 1.0, %v2575_v63 }
 0x7bc   :  { %1826 = vst [vmem:[#allocation9 + $0xc] sm:$0x1] %v2188_v36  ;;  %v2216_v22 = vtrunc.f32 %v2188_v36  ;;  %v1965_v12 = vadd.f32 %v2457_v40, %v1964_v38  ;;  %v2036_v36 = vmul.f32 1.442695, %v2035_v35 }
 0x7be   :  { %v2217_v18 = vcvt.f32.s32 %v2216_v22  ;;  %v1966_v55 = vrot.slane %v1965_v12, 2 }
 0x7c0   :  { %v3226_v0 = vsub.s32 %v3188_v27, %v2217_v18  ;;  %v1967_v61 = vadd.f32 %v1966_v55, %v1965_v12  ;;  %v1922_v18 = vld [vmem:[#allocation6 + $0xd] sm:$0x1] }
 0x7c2   :  { %v1871_v6 = vsub.s32 4, %v3226_v0  ;;  %v1968_v50 = vrot.slane %v1967_v61, 1  ;;  %vm1920_vm10 = vcmp.gt.s32.totalorder %v3226_v0, 0 }
 0x7c4   :  { %v1875_v19 = vrot.slane %v1871_v6, %v2746_v39  ;;  %v1884_v23 = vadd.s32 1, %v1871_v6  ;;  %v1969_v56 = vadd.f32 %v1968_v50, %v1967_v61 }
 0x7c6   :  { %vm1876_vm8 = vcmp.eq.s32.totalorder %v2610_v1, %v1875_v19  ;;  %v1888_v28 = vrot.slane %v1884_v23, %v2746_v39  ;;  %1970 = vst [vmem:[#allocation8 + $0xe] sm:$0x1] %v1969_v56 }
 0x7c7   :  { %v1877_v42 = vsel %vm1876_vm8, %v2633_v47, -1e+30 }
 0x7c8   :  { %v1878_v8 = vrot.slane %v1877_v42, 4  ;;  %vm1889_vm9 = vcmp.eq.s32.totalorder %v2610_v1, %v1888_v28 }
 0x7c9   :  { %v1890_v37 = vsel %vm1889_vm9, %v2633_v47, -1e+30 }
 0x7ca   :  { %v1879_v17 = vmax.f32 %v1877_v42, %v1878_v8  ;;  %v1891_v27 = vrot.slane %v1890_v37, 4 }
 0x7cc   :  { %v1880_v34 = vrot.slane %v1879_v17, 2  ;;  %v1892_v4 = vmax.f32 %v1890_v37, %v1891_v27 }
 0x7ce   :  { %v1881_v54 = vmax.f32 %v1879_v17, %v1880_v34  ;;  %v1893_v58 = vrot.slane %v1892_v4, 2 }
 0x7d0   :  { %v1882_v11 = vrot.slane %v1881_v54, 1  ;;  %v1894_v2 = vmax.f32 %v1892_v4, %v1893_v58 }
 0x7d2   :  { %v1895_v10 = vrot.slane %v1894_v2, 1  ;;  %v1883_v43 = vmax.f32 %v1881_v54, %v1882_v11 }
 0x7d4   :  { %v1896_v7 = vmax.f32 %v1894_v2, %v1895_v10 }
 0x7d6   :  { %v1897_v24 = vadd.f32 %v1896_v7, %v3162_v32 }
 0x7d8   :  { %v1899_v47 = vsub.f32 %v1883_v43, %v1897_v24  ;;  %v1898_v30 = vmax.f32 %v1883_v43, %v1897_v24  ;;  %v1901_v26 = vadd.f32 %v1897_v24, %v1883_v43 }
 0x7da   :  { %v1902_v9 = vand.u32 2147483647, %v1899_v47  ;;  %vm1900_vm2 = vcmp.ne.f32.partialorder %v1899_v47, %v1899_v47 }
 0x7dc   :  { %v1903_v48 = vsub.f32 0.0, %v1902_v9 }
 0x7de   :  { %v1904_v31 = vmul.f32 1.442695, %v1903_v48  ;;  %v3255_v48 = vld [vmem:[#allocation3 + $0xf] sm:$0x1] }
 0x7e0   :  { %2458 = vpow2.f32 %v1904_v31 }
 0x7ed   :  { %v2459_v41 = vpop.eup %2458 }
 0x7ee   :  { %v1906_v62 = vadd.f32 1.0, %v2459_v41  ;;  %v1909_v51 = vmul.f32 -0.5, %v2459_v41  ;;  %v1912_v45 = vand.u32 2147483647, %v2459_v41 }
 0x7f0   :  { %2460 = vlog2.f32 %v1906_v62  ;;  %v1910_v52 = vadd.f32 1.0, %v1909_v51  ;;  %vm1913_vm1 = vcmp.lt.f32.partialorder %v1912_v45, 0.0004427343  ;;  %v2059_v62 = vrot.slane %v3255_v48, %v2746_v39 }
 0x7f1   :  { %2462 = vpow2.f32 %v2036_v36 }
 0x7f2   :  { %v1911_v15 = vmul.f32 %v2459_v41, %v1910_v52 }
 0x7fd   :  { %v2461_v20 = vpop.eup %2460 }
 0x7fe   :  { %v1908_v32 = vmul.f32 0.6931472, %v2461_v20  ;;  %v2463_v60 = vpop.eup %2462 }
 0x7ff   :  { %v2038_v23 = vadd.f32 1.0, %v2463_v60  ;;  %v2041_v40 = vmul.f32 -0.5, %v2463_v60  ;;  %v2044_v12 = vand.u32 2147483647, %v2463_v60 }
 0x800   :  { %v1914_v13 = vsel %vm1913_vm1, %v1911_v15, %v1908_v32 }
 0x801   :  { %v1915_v21 = vadd.f32 %v1914_v13, %v1898_v30  ;;  %v2042_v38 = vadd.f32 1.0, %v2041_v40  ;;  %vm2045_vm14 = vcmp.lt.f32.partialorder %v2044_v12, 0.0004427343 }
 0x803   :  { %v1916_v53 = vsel %vm1900_vm2, %v1901_v26, %v1915_v21  ;;  %v2043_v55 = vmul.f32 %v2463_v60, %v2042_v38 }
 0x804   :  { %v1917_v29 = vsub.f32 %v1897_v24, %v1916_v53 }
 0x806   :  { %v1918_v22 = vmul.f32 1.442695, %v1917_v29 }
 0x808   :  { %2464 = vpow2.f32 %v1918_v22 }
 0x809   :  { %2466 = vlog2.f32 %v2038_v23 }
 0x815   :  { %v2465_v16 = vpop.eup %2464 }
 0x816   :  { %v1921_v6 = vsel %vm1920_vm10, %v2465_v16, 0.0 }
 0x817   :  { %vm1923_vm11 = vcmp.lt.f32.partialorder %v1922_v18, %v1921_v6 }
 0x818   :  { %v2189_v19 = vsel %vm1923_vm11, 1.0, %v2575_v63 }
 0x819   :  { %1926 = vst [vmem:[#allocation9 + $0xd] sm:$0x1] %v2189_v19  ;;  %v2218_v28 = vtrunc.f32 %v2189_v19 }
 0x81b   :  { %v2219_v42 = vcvt.f32.s32 %v2218_v28 }
 0x81d   :  { %v3240_v8 = vsub.s32 %v3226_v0, %v2219_v42  ;;  %v2467_v0 = vpop.eup %2466 }
 0x81e   :  { %v2040_v10 = vmul.f32 0.6931472, %v2467_v0 }
 0x81f   :  { %v1971_v37 = vsub.s32 4, %v3240_v8 }
 0x820   :  { %v2046_v61 = vsel %vm2045_vm14, %v2043_v55, %v2040_v10 }
 0x821   :  { %v1975_v17 = vrot.slane %v1971_v37, %v2746_v39  ;;  %v1984_v27 = vadd.s32 1, %v1971_v37  ;;  %v2047_v47 = vadd.f32 %v2046_v61, %v2030_v46 }
 0x823   :  { %vm1976_vm12 = vcmp.eq.s32.totalorder %v2610_v1, %v1975_v17  ;;  %v1988_v34 = vrot.slane %v1984_v27, %v2746_v39  ;;  %v2048_v9 = vsel %vm2032_vm15, %v3222_v14, %v2047_v47 }
 0x824   :  { %v1977_v4 = vsel %vm1976_vm12, %v2624_v25, -1e+30  ;;  %v2052_v31 = vrot.slane %v2048_v9, 7 }
 0x825   :  { %v1978_v54 = vrot.slane %v1977_v4, 4  ;;  %vm1989_vm13 = vcmp.eq.s32.totalorder %v2610_v1, %v1988_v34 }
 0x826   :  { %v1990_v58 = vsel %vm1989_vm13, %v2624_v25, -1e+30  ;;  %v2054_v51 = vsel %vm566_vm4, -1e+30, %v2052_v31 }
 0x827   :  { %v1979_v11 = vmax.f32 %v1977_v4, %v1978_v54  ;;  %v1991_v2 = vrot.slane %v1990_v58, 4  ;;  %v2055_v49 = vadd.f32 %v2054_v51, %v2614_v3 }
 0x829   :  { %v1980_v43 = vrot.slane %v1979_v11, 2  ;;  %v1992_v7 = vmax.f32 %v1990_v58, %v1991_v2  ;;  %v2060_v46 = vadd.f32 %v2059_v62, %v2055_v49 }
 0x82b   :  { %v1981_v24 = vmax.f32 %v1979_v11, %v1980_v43  ;;  %v1993_v50 = vrot.slane %v1992_v7, 2  ;;  %v2061_v33 = vsub.f32 %v2060_v46, %v2802_v5 }
 0x82d   :  { %v1982_v25 = vrot.slane %v1981_v24, 1  ;;  %v1994_v56 = vmax.f32 %v1992_v7, %v1993_v50  ;;  %v2062_v15 = vmul.f32 1.442695, %v2061_v33 }
 0x82f   :  { %v1995_v41 = vrot.slane %v1994_v56, 1  ;;  %v1983_v52 = vmax.f32 %v1981_v24, %v1982_v25  ;;  %2468 = vpow2.f32 %v2062_v15 }
 0x831   :  { %v1996_v45 = vmax.f32 %v1994_v56, %v1995_v41 }
 0x833   :  { %v1997_v57 = vadd.f32 %v1996_v45, %v3200_v59 }
 0x835   :  { %v1999_v44 = vsub.f32 %v1983_v52, %v1997_v57 }
 0x837   :  { %v2002_v14 = vand.u32 2147483647, %v1999_v44 }
 0x839   :  { %v2003_v20 = vsub.f32 0.0, %v2002_v14 }
 0x83b   :  { %v2004_v30 = vmul.f32 1.442695, %v2003_v20 }
 0x83c   :  { %v2469_v32 = vpop.eup %2468 }
 0x83d   :  { %2470 = vpow2.f32 %v2004_v30  ;;  %v2064_v26 = vrot.slane %v2469_v32, 4 }
 0x83f   :  { %v2065_v35 = vadd.f32 %v2469_v32, %v2064_v26 }
 0x841   :  { %v2066_v53 = vrot.slane %v2065_v35, 2 }
 0x843   :  { %v2067_v36 = vadd.f32 %v2066_v53, %v2065_v35 }
 0x845   :  { %v2068_v29 = vrot.slane %v2067_v36, 1 }
 0x847   :  { %v2069_v22 = vadd.f32 %v2068_v29, %v2067_v36 }
 0x849   :  { %2070 = vst [vmem:[#allocation8 + $0xf] sm:$0x1] %v2069_v22 }
 0x84a   :  { %v2471_v13 = vpop.eup %2470 }
 0x84b   :  { %v2006_v21 = vadd.f32 1.0, %v2471_v13  ;;  %v2009_v59 = vmul.f32 -0.5, %v2471_v13 }
 0x84d   :  { %2472 = vlog2.f32 %v2006_v21 }
 0x84e   :  { %2533 = shalt.err (!%p2530_p0)
}
 0x84f   :  { %2138 = dma.vmem_to_hbm [thread:$0]  %s2133_s1, 256, %s3288_s2, [#allocation5], %s2571_s15, %s2571_s15, %s2572_s16   ;;  %v2010_v5 = vadd.f32 1.0, %v2009_v59  ;;  %v2012_v60 = vand.u32 2147483647, %v2471_v13  ;;  %v1998_v6 = vmax.f32 %v1983_v52, %v1997_v57  ;;  %v2001_v23 = vadd.f32 %v1997_v57, %v1983_v52 }
 0x850   :  { %vm2000_vm0 = vcmp.ne.f32.partialorder %v1999_v44, %v1999_v44  ;;  %vm2020_vm3 = vcmp.gt.s32.totalorder %v3240_v8, 0  ;;  %v2022_v34 = vld [vmem:[#allocation6 + $0xe] sm:$0x1]  ;;  %v2122_v21 = vld [vmem:[#allocation6 + $0xf] sm:$0x1]  ;;  %s2577_s2 = smov [#allocation9]  }
 0x851   :  { %v2011_v18 = vmul.f32 %v2471_v13, %v2010_v5  ;;  %vm2013_vm4 = vcmp.lt.f32.partialorder %v2012_v60, 0.0004427343  ;;  %s2144_s27 = sshll.u32 %s2577_s2, 4  ;;  %s2145_s27 = int_to_ptr.vmem [resolvable:$true] %s2144_s27 }
 0x852   :  { %s2542_s28 = scalar_lea.vmem %s2145_s27, 256  ;;  %p2547_p2 = scmp.lt.s32.totalorder %s2145_s27, %s2145_s27 }
 0x853   :  { %p2543_p1 = scmp.ne.s32.totalorder %s2145_s27, %s2542_s28  ;;  %p2548_p3 = scmp.lt.s32.totalorder %s2542_s28, %s2542_s28 }
 0x855   :  { %p2549_p4 = por %p2548_p3, %p2547_p2 }
 0x857   :  { %p2550_p5 = pnand %p2549_p4, %p2543_p1 }
 0x85a   :  { %v2473_v16 = vpop.eup %2472 }
 0x85b   :  { %v2008_v19 = vmul.f32 0.6931472, %v2473_v16 }
 0x85d   :  { %v2014_v28 = vsel %vm2013_vm4, %v2011_v18, %v2008_v19 }
 0x85e   :  { %v2015_v42 = vadd.f32 %v2014_v28, %v1998_v6 }
 0x860   :  { %v2016_v37 = vsel %vm2000_vm0, %v2001_v23, %v2015_v42 }
 0x861   :  { %v2017_v17 = vsub.f32 %v1997_v57, %v2016_v37 }
 0x863   :  { %v2018_v27 = vmul.f32 1.442695, %v2017_v17 }
 0x865   :  { %2474 = vpow2.f32 %v2018_v27 }
 0x872   :  { %v2475_v4 = vpop.eup %2474 }
 0x873   :  { %v2021_v40 = vsel %vm2020_vm3, %v2475_v4, 0.0 }
 0x874   :  { %vm2023_vm5 = vcmp.lt.f32.partialorder %v2022_v34, %v2021_v40 }
 0x875   :  { %v2190_v54 = vsel %vm2023_vm5, 1.0, %v2575_v63 }
 0x876   :  { %2026 = vst [vmem:[#allocation9 + $0xe] sm:$0x1] %v2190_v54  ;;  %v2220_v58 = vtrunc.f32 %v2190_v54 }
 0x878   :  { %v2221_v38 = vcvt.f32.s32 %v2220_v58 }
 0x87a   :  { %v2028_v0 = vsub.s32 %v3240_v8, %v2221_v38 }
 0x87c   :  { %v2071_v11 = vsub.s32 4, %v2028_v0  ;;  %vm2120_vm1 = vcmp.gt.s32.totalorder %v2028_v0, 0 }
 0x87e   :  { %v2075_v2 = vrot.slane %v2071_v11, %v2746_v39  ;;  %v2084_v12 = vadd.s32 1, %v2071_v11 }
 0x880   :  { %vm2076_vm6 = vcmp.eq.s32.totalorder %v2610_v1, %v2075_v2  ;;  %v2088_v10 = vrot.slane %v2084_v12, %v2746_v39 }
 0x881   :  { %v2077_v55 = vsel %vm2076_vm6, %v2614_v3, -1e+30 }
 0x882   :  { %v2078_v43 = vrot.slane %v2077_v55, 4  ;;  %vm2089_vm7 = vcmp.eq.s32.totalorder %v2610_v1, %v2088_v10 }
 0x883   :  { %v2090_v7 = vsel %vm2089_vm7, %v2614_v3, -1e+30 }
 0x884   :  { %v2079_v61 = vmax.f32 %v2077_v55, %v2078_v43  ;;  %v2091_v24 = vrot.slane %v2090_v7, 4 }
 0x886   :  { %v2080_v50 = vrot.slane %v2079_v61, 2  ;;  %v2092_v47 = vmax.f32 %v2090_v7, %v2091_v24 }
 0x888   :  { %v2081_v8 = vmax.f32 %v2079_v61, %v2080_v50  ;;  %v2093_v25 = vrot.slane %v2092_v47, 2 }
 0x88a   :  { %v2082_v56 = vrot.slane %v2081_v8, 1  ;;  %v2094_v9 = vmax.f32 %v2092_v47, %v2093_v25 }
 0x88c   :  { %v2095_v31 = vrot.slane %v2094_v9, 1  ;;  %v2083_v41 = vmax.f32 %v2081_v8, %v2082_v56 }
 0x88e   :  { %v2096_v62 = vmax.f32 %v2094_v9, %v2095_v31 }
 0x890   :  { %v2097_v39 = vadd.f32 %v2096_v62, %v3255_v48 }
 0x892   :  { %v2099_v51 = vsub.f32 %v2083_v41, %v2097_v39  ;;  %v2098_v15 = vmax.f32 %v2083_v41, %v2097_v39  ;;  %v2101_v30 = vadd.f32 %v2097_v39, %v2083_v41 }
 0x894   :  { %v2102_v52 = vand.u32 2147483647, %v2099_v51  ;;  %vm2100_vm9 = vcmp.ne.f32.partialorder %v2099_v51, %v2099_v51 }
 0x896   :  { %v2103_v45 = vsub.f32 0.0, %v2102_v52 }
 0x898   :  { %v2104_v49 = vmul.f32 1.442695, %v2103_v45 }
 0x89a   :  { %2476 = vpow2.f32 %v2104_v49 }
 0x8a7   :  { %v2477_v1 = vpop.eup %2476 }
 0x8a8   :  { %v2106_v3 = vadd.f32 1.0, %v2477_v1  ;;  %v2109_v57 = vmul.f32 -0.5, %v2477_v1  ;;  %v2112_v44 = vand.u32 2147483647, %v2477_v1 }
 0x8aa   :  { %2478 = vlog2.f32 %v2106_v3  ;;  %v2110_v46 = vadd.f32 1.0, %v2109_v57  ;;  %vm2113_vm8 = vcmp.lt.f32.partialorder %v2112_v44, 0.0004427343 }
 0x8ac   :  { %v2111_v33 = vmul.f32 %v2477_v1, %v2110_v46 }
 0x8b7   :  { %v2479_v14 = vpop.eup %2478 }
 0x8b8   :  { %v2108_v20 = vmul.f32 0.6931472, %v2479_v14 }
 0x8ba   :  { %v2114_v32 = vsel %vm2113_vm8, %v2111_v33, %v2108_v20 }
 0x8bb   :  { %v2115_v48 = vadd.f32 %v2114_v32, %v2098_v15 }
 0x8bd   :  { %v2116_v26 = vsel %vm2100_vm9, %v2101_v30, %v2115_v48 }
 0x8be   :  { %v2117_v35 = vsub.f32 %v2097_v39, %v2116_v26 }
 0x8c0   :  { %v2118_v13 = vmul.f32 1.442695, %v2117_v35 }
 0x8c2   :  { %2480 = vpow2.f32 %v2118_v13 }
 0x8cf   :  { %v2481_v53 = vpop.eup %2480 }
 0x8d0   :  { %v2121_v36 = vsel %vm2120_vm1, %v2481_v53, 0.0 }
 0x8d1   :  { %vm2123_vm2 = vcmp.lt.f32.partialorder %v2122_v21, %v2121_v36 }
 0x8d2   :  { %v2191_v29 = vsel %vm2123_vm2, 1.0, %v2575_v63 }
 0x8d3   :  { %2126 = vst [vmem:[#allocation9 + $0xf] sm:$0x1] %v2191_v29 }
 0x8d4   :  { %2553 = shalt.err (!%p2550_p5)
}
 0x8d5   :  { %2150 = dma.vmem_to_hbm [thread:$0]  %s2145_s27, 256, %s3289_s3, [#allocation10], %s2571_s15, %s2571_s15, %s2572_s16  }
 0x8d6   :  { %2566 = dma.done.wait [#allocation5], 256  }
 0x8d7   :  { %2567 = vsyncadd [#allocation5], 4294967040 }
 0x8d8   :  { %2568 = dma.done.wait [#allocation10], 256  }
 0x8d9   :  { %2569 = vsyncadd [#allocation10], 4294967040 }
 0x8da   :  { %2157 = vsyncpa [#allocation4], 1 }
 0x8db   :  { %2158 = vsyncpa [#allocation7], 1 }
 0x8dc   :  { %2159 = vsyncpa [#allocation5], 1 }
 0x8dd   :  { %2160 = vsyncpa [#allocation10], 1 }

</bundles_post_ra>
